<compile_context>
chip_gen: v7x
topology: tpu7x:2x2x1
jax: 0.10.0
libtpu: 0.0.40
codegen_flags: <defaults>
</compile_context>

<pallas_src>
import functools
import math

import jax
import jax.numpy as jnp
from jax.experimental import pallas as pl
from jax.experimental.pallas import tpu as pltpu


MATMUL_DTYPE = jnp.bfloat16      # MXU operand / conv-output dtype (f32 accum)
BN_EPS = 1e-5
_LANE = 128


def _round_up(x, m):
    return (x + m - 1) // m * m


# ----------------------------------------------------------------------------
# Parameter prep: fold the 2x nearest upsample into the 3x3 conv.
#
#   out[2a+p, 2b+q] = sum_{i,j} w[i,j] * x[(2a+p+i-1)//2, (2b+q+j-1)//2]
#
# Grouping the 3 row taps i by which original row they hit gives, per row
# parity p, two effective taps (offsets {-1,0} for p=0, {0,+1} for p=1); same
# for columns.  The composite op is exactly four 2x2 convolutions (one per
# output parity (p,q)) over the original-resolution input.
# The conv bias is NOT folded: under training-mode BatchNorm the batch mean
# absorbs it exactly, so it is dropped for free.
# ----------------------------------------------------------------------------
_TAP_GROUPS = {0: ((0,), (1, 2)), 1: ((0, 1), (2,))}


def prepare_params(w, b, gamma, beta):
    """w: (Cout, Cin, 3, 3) torch layout; b/gamma/beta: (Cout,).  b is unused
    (it cancels under training-mode BN) but kept in the signature for parity."""
    del b
    cout, cin, kh, kw = w.shape
    assert (kh, kw) == (3, 3), "UpBlock2d defaults: kernel_size=3, padding=1"
    cp = _round_up(cout, _LANE)
    wt = jnp.transpose(w.astype(jnp.float32), (2, 3, 1, 0))      # (3,3,Cin,Cout)
    mats = []
    for p in range(2):
        for q in range(2):
            blocks = []
            for u in range(2):
                for v in range(2):
                    acc = jnp.zeros((cin, cout), jnp.float32)
                    for i in _TAP_GROUPS[p][u]:
                        for j in _TAP_GROUPS[q][v]:
                            acc = acc + wt[i, j]
                    blocks.append(acc)
            mats.append(jnp.concatenate(blocks, axis=0))          # (4*Cin, Cout)
    w_fold = jnp.stack(mats, axis=0)                              # (4, 4*Cin, Cout)
    w_fold = jnp.pad(w_fold, ((0, 0), (0, 0), (0, cp - cout)))
    return {
        "w_fold": w_fold.astype(MATMUL_DTYPE),
        "gamma": jnp.pad(gamma.astype(jnp.float32), (0, cp - cout),
                         constant_values=1.0).reshape(1, cp),
        "beta": jnp.pad(beta.astype(jnp.float32), (0, cp - cout)).reshape(1, cp),
    }


# ----------------------------------------------------------------------------
# Kernel 1: fused upsample+conv for one (image, row-parity) pair, plus BN
# partial statistics.  Output layout (N, H, 2, W, 2*Cp) row-major == NHWC of
# the upsampled image, so no un-interleave pass is ever needed.
# ----------------------------------------------------------------------------
def _up_conv_stats_kernel(xp_ref, w_ref, o_ref, stat_ref):
    """
    xp_ref  : (1, H+2, W+2, Cin) bf16  spatially pre-padded original-res image
    w_ref   : (2, 4*Cin, Cp)     bf16  folded weights for (this p, q=0/1)
    o_ref   : (1, H, 1, W, 2*Cp) bf16  conv output, last dim = (q, c)
    stat_ref: (1, 1, 2, Cp)      f32   [sum, sum_of_squares] for this (n, p)
    """
    _, H, _, W, C2 = o_ref.shape
    Cp = C2 // 2
    cin = xp_ref.shape[-1]
    p = pl.program_id(1)                        # output row parity (dynamic)

    s_acc = jnp.zeros((1, Cp), jnp.float32)
    q_acc = jnp.zeros((1, Cp), jnp.float32)
    for q in range(2):                          # output column parity (static)
        # 2x2-tap patches sliced straight from the ref (no whole-image value
        # materialization); already bf16, so the concat copies are half-width.
        taps = [xp_ref[0, pl.ds(p + u, H), pl.ds(q + v, W), :]
                for u in range(2) for v in range(2)]
        patches = jnp.concatenate(taps, axis=-1).reshape(H * W, 4 * cin)
        y = jnp.dot(patches, w_ref[q], preferred_element_type=jnp.float32)
        o_ref[0, :, 0, :, q * Cp:(q + 1) * Cp] = (
            y.reshape(H, W, Cp).astype(o_ref.dtype))
        # BN partials from the f32 accumulator (before the bf16 rounding).
        s_acc = s_acc + jnp.sum(y, axis=0, keepdims=True)
        q_acc = q_acc + jnp.sum(y * y, axis=0, keepdims=True)
    stat_ref[0, 0] = jnp.concatenate([s_acc, q_acc], axis=0)


def up_conv_with_stats(xp, w_fold):
    n, hp2, wp2, cin = xp.shape
    h, w = hp2 - 2, wp2 - 2
    _, k4, cp = w_fold.shape
    return pl.pallas_call(
        _up_conv_stats_kernel,
        out_shape=(
            jax.ShapeDtypeStruct((n, h, 2, w, 2 * cp), MATMUL_DTYPE),  # conv out
            jax.ShapeDtypeStruct((n, 2, 2, cp), jnp.float32),          # BN partials
        ),
        grid=(n, 2),
        in_specs=[
            # image block is index-constant along the parity axis -> no re-DMA
            pl.BlockSpec((1, hp2, wp2, cin), lambda i, p: (i, 0, 0, 0)),
            pl.BlockSpec((2, k4, cp), lambda i, p: (p, 0, 0)),
        ],
        out_specs=(
            pl.BlockSpec((1, h, 1, w, 2 * cp), lambda i, p: (i, 0, p, 0, 0)),
            pl.BlockSpec((1, 1, 2, cp), lambda i, p: (i, p, 0, 0)),
        ),
        compiler_params=pltpu.CompilerParams(
            dimension_semantics=("parallel", "parallel"),
            vmem_limit_bytes=48 * 1024 * 1024,   # safe on v7x (64 MiB physical)
        ),
    )(xp, w_fold)


# ----------------------------------------------------------------------------
# Kernel 2: per-channel affine (BatchNorm apply) + ReLU on a lane-dense slab.
# ----------------------------------------------------------------------------
def _scale_shift_relu_kernel(x_ref, s_ref, t_ref, o_ref):
    x = x_ref[...].astype(jnp.float32)
    o_ref[...] = jnp.maximum(x * s_ref[...] + t_ref[...], 0.0)


def _pick_rows_tile(m, l, max_bytes=16 * 1024 * 1024):
    """Largest row-tile (multiple of 8 or full extent) whose double-buffered
    bf16-in + f32-out footprint stays within max_bytes."""
    bytes_per_row = l * 12                       # (2 + 4) bytes * 2 buffers
    divs8 = [t for t in range(8, m + 1, 8) if m % t == 0]
    fitting = [t for t in divs8 if t * bytes_per_row <= max_bytes]
    if fitting:
        return max(fitting)
    if divs8:
        return min(divs8)
    return m                                     # full extent: always legal


def scale_shift_relu(x2d, scale_row, shift_row):
    m, l = x2d.shape
    tm = _pick_rows_tile(m, l)
    return pl.pallas_call(
        _scale_shift_relu_kernel,
        out_shape=jax.ShapeDtypeStruct((m, l), jnp.float32),
        grid=(m // tm,),
        in_specs=[
            pl.BlockSpec((tm, l), lambda i: (i, 0)),
            pl.BlockSpec((1, l), lambda i: (0, 0)),
            pl.BlockSpec((1, l), lambda i: (0, 0)),
        ],
        out_specs=pl.BlockSpec((tm, l), lambda i: (i, 0)),
        compiler_params=pltpu.CompilerParams(
            dimension_semantics=("parallel",)),
    )(x2d, scale_row, shift_row)


# ----------------------------------------------------------------------------
# UpBlock2d forward
# ----------------------------------------------------------------------------
@functools.partial(jax.jit, static_argnames=("cout",))
def up_block2d_forward(params, x, *, cout):
    """x: (N, Cin, H, W) NCHW f32  ->  (N, Cout, 2H, 2W) NCHW f32."""
    n, _, h, w = x.shape
    cp = params["w_fold"].shape[-1]

    # bf16 activation in HBM: halves input DMA + in-kernel patch-build copies.
    x_nhwc = jnp.transpose(x, (0, 2, 3, 1)).astype(MATMUL_DTYPE)
    xp = jnp.pad(x_nhwc, ((0, 0), (1, 1), (1, 1), (0, 0)))      # 1px conv halo

    conv_out, stats = up_conv_with_stats(xp, params["w_fold"])

    # Training-mode BatchNorm2d statistics from the fused partials (no extra
    # HBM pass).  E[x^2]-E[x]^2 in f32 with a clamp; fine for BN-scale inputs.
    count = jnp.float32(n * 4 * h * w)              # = N * (2H) * (2W)
    total = jnp.sum(stats, axis=(0, 1))             # (2, Cp)
    mean = total[0] / count
    var = jnp.maximum(total[1] / count - mean * mean, 0.0)      # biased var
    inv = params["gamma"][0] * jax.lax.rsqrt(var + BN_EPS)
    scale_c = inv                                    # (Cp,)
    shift_c = params["beta"][0] - mean * inv         # (Cp,)

    # conv_out (N,H,2,W,2Cp) row-major == NHWC of the upsampled image, so the
    # reshape below is metadata-only; kernel 2 sees a lane-dense (M, 2W*Cp) slab.
    L = 2 * w * cp
    x2d = conv_out.reshape(n * 2 * h, L)
    scale_row = jnp.tile(scale_c, 2 * w).reshape(1, L)
    shift_row = jnp.tile(shift_c, 2 * w).reshape(1, L)
    y2d = scale_shift_relu(x2d, scale_row, shift_row)

    # Only a plain NHWC->NCHW boundary transpose remains (module contract).
    y = y2d.reshape(n, 2 * h, 2 * w, cp)[..., :cout]
    return jnp.transpose(y, (0, 3, 1, 2))


# ----------------------------------------------------------------------------
# Pure-JAX reference (mirrors the PyTorch module) for validation.
# ----------------------------------------------------------------------------
def reference_forward(x, w, b, gamma, beta, eps=BN_EPS):
    up = jnp.repeat(jnp.repeat(x, 2, axis=2), 2, axis=3)        # nearest 2x
    y = jax.lax.conv_general_dilated(
        up, w, window_strides=(1, 1), padding=((1, 1), (1, 1)),
        dimension_numbers=("NCHW", "OIHW", "NCHW"))
    y = y + b.reshape(1, -1, 1, 1)
    mean = jnp.mean(y, axis=(0, 2, 3), keepdims=True)
    var = jnp.mean((y - mean) ** 2, axis=(0, 2, 3), keepdims=True)
    y = (y - mean) * jax.lax.rsqrt(var + eps)
    y = y * gamma.reshape(1, -1, 1, 1) + beta.reshape(1, -1, 1, 1)
    return jnp.maximum(y, 0.0)


if __name__ == "__main__":
    # Shapes matching DINet's use of UpBlock2d(128, 128) on a small feature map.
    in_features, out_features = 128, 128
    batch, height, width = 2, 16, 16

    key = jax.random.PRNGKey(0)
    kx, kw_, kb_ = jax.random.split(key, 3)
    bound = 1.0 / math.sqrt(in_features * 3 * 3)
    w = jax.random.uniform(kw_, (out_features, in_features, 3, 3),
                           jnp.float32, -bound, bound)
    b = jax.random.uniform(kb_, (out_features,), jnp.float32, -bound, bound)
    gamma = jnp.linspace(0.5, 1.5, out_features, dtype=jnp.float32)
    beta = jnp.linspace(-0.2, 0.2, out_features, dtype=jnp.float32)

    params = prepare_params(w, b, gamma, beta)
    x = jax.random.normal(kx, (batch, in_features, height, width), jnp.float32)

    out = jax.block_until_ready(up_block2d_forward(params, x, cout=out_features))
    assert out.shape == (batch, out_features, 2 * height, 2 * width), out.shape
    assert bool(jnp.all(jnp.isfinite(out)))
    assert bool(jnp.all(out >= 0.0))              # ReLU output

    ref = jax.block_until_ready(reference_forward(x, w, b, gamma, beta))
    max_err = float(jnp.max(jnp.abs(out - ref)))
    assert max_err < 1e-1, f"max abs err vs reference: {max_err}"

    print("KERNEL_OK")
</pallas_src>

<mosaic_0001>
module attributes {stable_mosaic.version = 11 : i64} {
  func.func @_up_conv_stats_kernel(%arg0: i32, %arg1: i32, %arg2: memref<1x18x18x128xbf16, #tpu.memory_space<vmem>>, %arg3: memref<2x512x128xbf16, #tpu.memory_space<vmem>>, %arg4: memref<1x16x1x16x256xbf16, #tpu.memory_space<vmem>>, %arg5: memref<1x1x2x128xf32, #tpu.memory_space<vmem>>) attributes {dimension_semantics = [#tpu.dimension_semantics<parallel>, #tpu.dimension_semantics<parallel>], iteration_bounds = array<i64: 2, 2>, scalar_prefetch = 0 : i64, scratch_operands = 0 : i64, tpu.core_type = #tpu.core_type<tc>, window_params = [{transform_indices = @transform_0, window_bounds = array<i64: 1, 18, 18, 128>}, {transform_indices = @transform_1, window_bounds = array<i64: 2, 512, 128>}, {transform_indices = @transform_2, window_bounds = array<i64: 1, 16, 1, 16, 256>}, {transform_indices = @transform_3, window_bounds = array<i64: 1, 1, 2, 128>}]} {
    %cst = arith.constant 0.000000e+00 : f32
    %0 = vector.broadcast %cst : f32 to vector<1x128xf32>
    %cst_0 = arith.constant 0.000000e+00 : f32
    %1 = vector.broadcast %cst_0 : f32 to vector<1x128xf32>
    %c0_i32 = arith.constant 0 : i32
    %2 = arith.addi %arg1, %c0_i32 : i32
    %c0 = arith.constant 0 : index
    %3 = arith.index_cast %2 : i32 to index
    %c0_1 = arith.constant 0 : index
    %c0_2 = arith.constant 0 : index
    %4 = vector.load %arg2[%c0, %3, %c0_1, %c0_2] : memref<1x18x18x128xbf16, #tpu.memory_space<vmem>>, vector<1x16x16x128xbf16>
    %5 = vector.shape_cast %4 : vector<1x16x16x128xbf16> to vector<16x16x128xbf16>
    %c0_i32_3 = arith.constant 0 : i32
    %6 = arith.addi %arg1, %c0_i32_3 : i32
    %c0_4 = arith.constant 0 : index
    %7 = arith.index_cast %6 : i32 to index
    %c1 = arith.constant 1 : index
    %c0_5 = arith.constant 0 : index
    %8 = vector.load %arg2[%c0_4, %7, %c1, %c0_5] : memref<1x18x18x128xbf16, #tpu.memory_space<vmem>>, vector<1x16x16x128xbf16>
    %9 = vector.shape_cast %8 : vector<1x16x16x128xbf16> to vector<16x16x128xbf16>
    %c1_i32 = arith.constant 1 : i32
    %10 = arith.addi %arg1, %c1_i32 : i32
    %c0_6 = arith.constant 0 : index
    %11 = arith.index_cast %10 : i32 to index
    %c0_7 = arith.constant 0 : index
    %c0_8 = arith.constant 0 : index
    %12 = vector.load %arg2[%c0_6, %11, %c0_7, %c0_8] : memref<1x18x18x128xbf16, #tpu.memory_space<vmem>>, vector<1x16x16x128xbf16>
    %13 = vector.shape_cast %12 : vector<1x16x16x128xbf16> to vector<16x16x128xbf16>
    %c1_i32_9 = arith.constant 1 : i32
    %14 = arith.addi %arg1, %c1_i32_9 : i32
    %c0_10 = arith.constant 0 : index
    %15 = arith.index_cast %14 : i32 to index
    %c1_11 = arith.constant 1 : index
    %c0_12 = arith.constant 0 : index
    %16 = vector.load %arg2[%c0_10, %15, %c1_11, %c0_12] : memref<1x18x18x128xbf16, #tpu.memory_space<vmem>>, vector<1x16x16x128xbf16>
    %17 = vector.shape_cast %16 : vector<1x16x16x128xbf16> to vector<16x16x128xbf16>
    %18 = tpu.concatenate %5, %9, %13, %17 in 2 : vector<16x16x128xbf16>, vector<16x16x128xbf16>, vector<16x16x128xbf16>, vector<16x16x128xbf16> -> vector<16x16x512xbf16>
    %19 = vector.shape_cast %18 : vector<16x16x512xbf16> to vector<256x512xbf16>
    %c0_13 = arith.constant 0 : index
    %c0_14 = arith.constant 0 : index
    %c0_15 = arith.constant 0 : index
    %20 = vector.load %arg3[%c0_13, %c0_14, %c0_15] : memref<2x512x128xbf16, #tpu.memory_space<vmem>>, vector<1x512x128xbf16>
    %21 = vector.shape_cast %20 : vector<1x512x128xbf16> to vector<512x128xbf16>
    %cst_16 = arith.constant dense<0.000000e+00> : vector<256x128xf32>
    %22 = tpu.matmul %19, %21, %cst_16 {dimension_numbers = #tpu.dot_dimension_numbers<[1], [0], [0], [1], [0, 0, 1, 1], [], []>} : vector<256x512xbf16>, vector<512x128xbf16>, vector<256x128xf32> -> vector<256x128xf32>
    %23 = vector.shape_cast %22 : vector<256x128xf32> to vector<16x16x128xf32>
    %24 = arith.truncf %23 : vector<16x16x128xf32> to vector<16x16x128xbf16>
    %c0_17 = arith.constant 0 : index
    %c0_18 = arith.constant 0 : index
    %c0_19 = arith.constant 0 : index
    %c0_20 = arith.constant 0 : index
    %c0_21 = arith.constant 0 : index
    %25 = vector.load %arg4[%c0_17, %c0_18, %c0_19, %c0_20, %c0_21] : memref<1x16x1x16x256xbf16, #tpu.memory_space<vmem>>, vector<1x16x1x16x128xbf16>
    %26 = vector.shape_cast %25 : vector<1x16x1x16x128xbf16> to vector<16x16x128xbf16>
    %27 = vector.shape_cast %24 : vector<16x16x128xbf16> to vector<1x16x1x16x128xbf16>
    tpu.vector_store %arg4[%c0_17, %c0_18, %c0_19, %c0_20, %c0_21], %27 {strides = array<i32>} : memref<1x16x1x16x256xbf16, #tpu.memory_space<vmem>>, vector<1x16x1x16x128xbf16>,
    %cst_22 = arith.constant dense<0.000000e+00> : vector<128xf32>
    %28 = vector.multi_reduction <add>, %22, %cst_22 [0] : vector<256x128xf32> to vector<128xf32>
    %29 = vector.shape_cast %28 : vector<128xf32> to vector<1x128xf32>
    %30 = arith.addf %0, %29 : vector<1x128xf32>
    %31 = arith.mulf %22, %22 : vector<256x128xf32>
    %cst_23 = arith.constant dense<0.000000e+00> : vector<128xf32>
    %32 = vector.multi_reduction <add>, %31, %cst_23 [0] : vector<256x128xf32> to vector<128xf32>
    %33 = vector.shape_cast %32 : vector<128xf32> to vector<1x128xf32>
    %34 = arith.addf %1, %33 : vector<1x128xf32>
    %c0_i32_24 = arith.constant 0 : i32
    %35 = arith.addi %arg1, %c0_i32_24 : i32
    %c0_25 = arith.constant 0 : index
    %36 = arith.index_cast %35 : i32 to index
    %c1_26 = arith.constant 1 : index
    %c0_27 = arith.constant 0 : index
    %37 = vector.load %arg2[%c0_25, %36, %c1_26, %c0_27] : memref<1x18x18x128xbf16, #tpu.memory_space<vmem>>, vector<1x16x16x128xbf16>
    %38 = vector.shape_cast %37 : vector<1x16x16x128xbf16> to vector<16x16x128xbf16>
    %c0_i32_28 = arith.constant 0 : i32
    %39 = arith.addi %arg1, %c0_i32_28 : i32
    %c0_29 = arith.constant 0 : index
    %40 = arith.index_cast %39 : i32 to index
    %c2 = arith.constant 2 : index
    %c0_30 = arith.constant 0 : index
    %41 = vector.load %arg2[%c0_29, %40, %c2, %c0_30] : memref<1x18x18x128xbf16, #tpu.memory_space<vmem>>, vector<1x16x16x128xbf16>
    %42 = vector.shape_cast %41 : vector<1x16x16x128xbf16> to vector<16x16x128xbf16>
    %c1_i32_31 = arith.constant 1 : i32
    %43 = arith.addi %arg1, %c1_i32_31 : i32
    %c0_32 = arith.constant 0 : index
    %44 = arith.index_cast %43 : i32 to index
    %c1_33 = arith.constant 1 : index
    %c0_34 = arith.constant 0 : index
    %45 = vector.load %arg2[%c0_32, %44, %c1_33, %c0_34] : memref<1x18x18x128xbf16, #tpu.memory_space<vmem>>, vector<1x16x16x128xbf16>
    %46 = vector.shape_cast %45 : vector<1x16x16x128xbf16> to vector<16x16x128xbf16>
    %c1_i32_35 = arith.constant 1 : i32
    %47 = arith.addi %arg1, %c1_i32_35 : i32
    %c0_36 = arith.constant 0 : index
    %48 = arith.index_cast %47 : i32 to index
    %c2_37 = arith.constant 2 : index
    %c0_38 = arith.constant 0 : index
    %49 = vector.load %arg2[%c0_36, %48, %c2_37, %c0_38] : memref<1x18x18x128xbf16, #tpu.memory_space<vmem>>, vector<1x16x16x128xbf16>
    %50 = vector.shape_cast %49 : vector<1x16x16x128xbf16> to vector<16x16x128xbf16>
    %51 = tpu.concatenate %38, %42, %46, %50 in 2 : vector<16x16x128xbf16>, vector<16x16x128xbf16>, vector<16x16x128xbf16>, vector<16x16x128xbf16> -> vector<16x16x512xbf16>
    %52 = vector.shape_cast %51 : vector<16x16x512xbf16> to vector<256x512xbf16>
    %c1_39 = arith.constant 1 : index
    %c0_40 = arith.constant 0 : index
    %c0_41 = arith.constant 0 : index
    %53 = vector.load %arg3[%c1_39, %c0_40, %c0_41] : memref<2x512x128xbf16, #tpu.memory_space<vmem>>, vector<1x512x128xbf16>
    %54 = vector.shape_cast %53 : vector<1x512x128xbf16> to vector<512x128xbf16>
    %cst_42 = arith.constant dense<0.000000e+00> : vector<256x128xf32>
    %55 = tpu.matmul %52, %54, %cst_42 {dimension_numbers = #tpu.dot_dimension_numbers<[1], [0], [0], [1], [0, 0, 1, 1], [], []>} : vector<256x512xbf16>, vector<512x128xbf16>, vector<256x128xf32> -> vector<256x128xf32>
    %56 = vector.shape_cast %55 : vector<256x128xf32> to vector<16x16x128xf32>
    %57 = arith.truncf %56 : vector<16x16x128xf32> to vector<16x16x128xbf16>
    %c0_43 = arith.constant 0 : index
    %c0_44 = arith.constant 0 : index
    %c0_45 = arith.constant 0 : index
    %c0_46 = arith.constant 0 : index
    %c128 = arith.constant 128 : index
    %58 = vector.load %arg4[%c0_43, %c0_44, %c0_45, %c0_46, %c128] : memref<1x16x1x16x256xbf16, #tpu.memory_space<vmem>>, vector<1x16x1x16x128xbf16>
    %59 = vector.shape_cast %58 : vector<1x16x1x16x128xbf16> to vector<16x16x128xbf16>
    %60 = vector.shape_cast %57 : vector<16x16x128xbf16> to vector<1x16x1x16x128xbf16>
    tpu.vector_store %arg4[%c0_43, %c0_44, %c0_45, %c0_46, %c128], %60 {strides = array<i32>} : memref<1x16x1x16x256xbf16, #tpu.memory_space<vmem>>, vector<1x16x1x16x128xbf16>,
    %cst_47 = arith.constant dense<0.000000e+00> : vector<128xf32>
    %61 = vector.multi_reduction <add>, %55, %cst_47 [0] : vector<256x128xf32> to vector<128xf32>
    %62 = vector.shape_cast %61 : vector<128xf32> to vector<1x128xf32>
    %63 = arith.addf %30, %62 : vector<1x128xf32>
    %64 = arith.mulf %55, %55 : vector<256x128xf32>
    %cst_48 = arith.constant dense<0.000000e+00> : vector<128xf32>
    %65 = vector.multi_reduction <add>, %64, %cst_48 [0] : vector<256x128xf32> to vector<128xf32>
    %66 = vector.shape_cast %65 : vector<128xf32> to vector<1x128xf32>
    %67 = arith.addf %34, %66 : vector<1x128xf32>
    %68 = tpu.concatenate %63, %67 in 0 : vector<1x128xf32>, vector<1x128xf32> -> vector<2x128xf32>
    %c0_49 = arith.constant 0 : index
    %c0_50 = arith.constant 0 : index
    %c0_51 = arith.constant 0 : index
    %c0_52 = arith.constant 0 : index
    %69 = vector.load %arg5[%c0_49, %c0_50, %c0_51, %c0_52] : memref<1x1x2x128xf32, #tpu.memory_space<vmem>>, vector<1x1x2x128xf32>
    %70 = vector.shape_cast %69 : vector<1x1x2x128xf32> to vector<2x128xf32>
    %71 = vector.shape_cast %68 : vector<2x128xf32> to vector<1x1x2x128xf32>
    tpu.vector_store %arg5[%c0_49, %c0_50, %c0_51, %c0_52], %71 {strides = array<i32>} : memref<1x1x2x128xf32, #tpu.memory_space<vmem>>, vector<1x1x2x128xf32>,
    return
  }
  func.func @transform_0(%arg0: i32, %arg1: i32) -> (i32, i32, i32, i32) {
    %c0_i32 = arith.constant 0 : i32
    %c0_i32_0 = arith.constant 0 : i32
    %c0_i32_1 = arith.constant 0 : i32
    %c0_i32_2 = arith.constant 0 : i32
    return %arg0, %c0_i32, %c0_i32_0, %c0_i32_1 : i32, i32, i32, i32
  }
  func.func @transform_1(%arg0: i32, %arg1: i32) -> (i32, i32, i32) {
    %c0_i32 = arith.constant 0 : i32
    %c0_i32_0 = arith.constant 0 : i32
    %c0_i32_1 = arith.constant 0 : i32
    return %arg1, %c0_i32, %c0_i32_0 : i32, i32, i32
  }
  func.func @transform_2(%arg0: i32, %arg1: i32) -> (i32, i32, i32, i32, i32) {
    %c0_i32 = arith.constant 0 : i32
    %c0_i32_0 = arith.constant 0 : i32
    %c0_i32_1 = arith.constant 0 : i32
    %c0_i32_2 = arith.constant 0 : i32
    return %arg0, %c0_i32, %arg1, %c0_i32_0, %c0_i32_1 : i32, i32, i32, i32, i32
  }
  func.func @transform_3(%arg0: i32, %arg1: i32) -> (i32, i32, i32, i32) {
    %c0_i32 = arith.constant 0 : i32
    %c0_i32_0 = arith.constant 0 : i32
    %c0_i32_1 = arith.constant 0 : i32
    return %arg0, %arg1, %c0_i32, %c0_i32_0 : i32, i32, i32, i32
  }
}

module attributes {stable_mosaic.version = 11 : i64} {
  func.func @_scale_shift_relu_kernel(%arg0: i32, %arg1: memref<64x4096xbf16, #tpu.memory_space<vmem>>, %arg2: memref<1x4096xf32, #tpu.memory_space<vmem>>, %arg3: memref<1x4096xf32, #tpu.memory_space<vmem>>, %arg4: memref<64x4096xf32, #tpu.memory_space<vmem>>) attributes {dimension_semantics = [#tpu.dimension_semantics<parallel>], iteration_bounds = array<i64: 1>, scalar_prefetch = 0 : i64, scratch_operands = 0 : i64, tpu.core_type = #tpu.core_type<tc>, window_params = [{transform_indices = @transform_0, window_bounds = array<i64: 64, 4096>}, {pipeline_mode = #tpu.pipeline_mode<synchronous>, transform_indices = @transform_1, window_bounds = array<i64: 1, 4096>}, {pipeline_mode = #tpu.pipeline_mode<synchronous>, transform_indices = @transform_2, window_bounds = array<i64: 1, 4096>}, {transform_indices = @transform_3, window_bounds = array<i64: 64, 4096>}]} {
    %c0 = arith.constant 0 : index
    %c0_0 = arith.constant 0 : index
    %0 = vector.load %arg1[%c0, %c0_0] : memref<64x4096xbf16, #tpu.memory_space<vmem>>, vector<64x4096xbf16>
    %1 = arith.extf %0 : vector<64x4096xbf16> to vector<64x4096xf32>
    %c0_1 = arith.constant 0 : index
    %c0_2 = arith.constant 0 : index
    %2 = vector.load %arg2[%c0_1, %c0_2] : memref<1x4096xf32, #tpu.memory_space<vmem>>, vector<1x4096xf32>
    %3 = vector.broadcast %2 : vector<1x4096xf32> to vector<64x4096xf32>
    %4 = arith.mulf %1, %3 : vector<64x4096xf32>
    %c0_3 = arith.constant 0 : index
    %c0_4 = arith.constant 0 : index
    %5 = vector.load %arg3[%c0_3, %c0_4] : memref<1x4096xf32, #tpu.memory_space<vmem>>, vector<1x4096xf32>
    %6 = vector.broadcast %5 : vector<1x4096xf32> to vector<64x4096xf32>
    %7 = arith.addf %4, %6 : vector<64x4096xf32>
    %cst = arith.constant 0.000000e+00 : f32
    %8 = vector.broadcast %cst : f32 to vector<64x4096xf32>
    %9 = arith.maximumf %7, %8 : vector<64x4096xf32>
    %c0_5 = arith.constant 0 : index
    %c0_6 = arith.constant 0 : index
    %10 = vector.load %arg4[%c0_5, %c0_6] : memref<64x4096xf32, #tpu.memory_space<vmem>>, vector<64x4096xf32>
    tpu.vector_store %arg4[%c0_5, %c0_6], %9 {strides = array<i32>} : memref<64x4096xf32, #tpu.memory_space<vmem>>, vector<64x4096xf32>,
    return
  }
  func.func @transform_0(%arg0: i32) -> (i32, i32) {
    %c0_i32 = arith.constant 0 : i32
    %c0_i32_0 = arith.constant 0 : i32
    return %arg0, %c0_i32 : i32, i32
  }
  func.func @transform_1(%arg0: i32) -> (i32, i32) {
    %c0_i32 = arith.constant 0 : i32
    %c0_i32_0 = arith.constant 0 : i32
    %c0_i32_1 = arith.constant 0 : i32
    return %c0_i32, %c0_i32_0 : i32, i32
  }
  func.func @transform_2(%arg0: i32) -> (i32, i32) {
    %c0_i32 = arith.constant 0 : i32
    %c0_i32_0 = arith.constant 0 : i32
    %c0_i32_1 = arith.constant 0 : i32
    return %c0_i32, %c0_i32_0 : i32, i32
  }
  func.func @transform_3(%arg0: i32) -> (i32, i32) {
    %c0_i32 = arith.constant 0 : i32
    %c0_i32_0 = arith.constant 0 : i32
    return %arg0, %c0_i32 : i32, i32
  }
}

</mosaic_0001>

<bundles_post_ra>
// kernel: tile.13
= control target key start
LH: loop header
LB: loop body
LE: loop exit
PB: predicated region body
PF: predicated region fallthrough
CT: control target
= control target key end

     0   :  { %s40_s0 = inlined_call_operand.vmem [shape: f32[128], index: 0, kind: input, shape index: {}]   ;;  %s41_s1 = inlined_call_operand.vmem [shape: f32[32,128], index: 1, kind: output, shape index: {}]  }
   0x1   :  { %v4_v0 = vld [vmem:[%s40_s0] ss:$0 sm:$0xff] }
   0x2   :  { %5 = vst [vmem:[%s41_s1] sm:$0xff] %v4_v0  ;;  %12 = vst [vmem:[%s41_s1 + $0x8] sm:$0xff] %v4_v0 }
   0x3   :  { %13 = vst [vmem:[%s41_s1 + $0x10] sm:$0xff] %v4_v0  ;;  %14 = vst [vmem:[%s41_s1 + $0x18] sm:$0xff] %v4_v0 }

// kernel: up_block2d_forward.3
= control target key start
LH: loop header
LB: loop body
LE: loop exit
PB: predicated region body
PF: predicated region fallthrough
CT: control target
= control target key end

     0   :  { %v406_v0 = vlaneseq  ;;  %s3762_s0 = inlined_call_operand.vmem [shape: bf16[64,4096], index: 0, kind: input, shape index: {}]   ;;  %s3763_s1 = inlined_call_operand.vmem [shape: f32[1,4096], index: 1, kind: input, shape index: {}]   ;;  %s3764_s2 = inlined_call_operand.vmem [shape: f32[1,4096], index: 2, kind: input, shape index: {}]   ;;  %s3765_s3 = inlined_call_operand.vmem [shape: f32[64,4096], index: 3, kind: output, shape index: {}]  }
   0x1   :  { %v14_v1 = vld [vmem:[%s3762_s0] sm:$0xff]  ;;  %v15_v5 = vld [vmem:[%s3762_s0 + $0x8] sm:$0xff]  ;;  %v16_v6 = vld [vmem:[%s3762_s0 + $0x10] sm:$0xff] }
   0x2   :  { %v142_v2 = vunpack.c.l.bf16 %v14_v1  ;;  %v407_v3 = vshrl.u32 %v406_v0, 7  ;;  %v143_v4 = vunpack.c.h.bf16 %v14_v1  ;;  %v1794_v7 = vld [vmem:[%s3762_s0 + $0x18] sm:$0xff]  ;;  %v1799_v8 = vld [vmem:[%s3763_s1] sm:$0xff]  ;;  %v144_v10 = vunpack.c.l.bf16 %v15_v5  ;;  %v1895_v51 = vld [vmem:[%s3763_s1 + $0x8] sm:$0xff] }
   0x3   :  { %v1804_v9 = vld [vmem:[%s3764_s2] sm:$0xff]  ;;  %v145_v11 = vunpack.c.h.bf16 %v15_v5  ;;  %v146_v12 = vunpack.c.l.bf16 %v16_v6  ;;  %v147_v13 = vunpack.c.h.bf16 %v16_v6  ;;  %v148_v20 = vunpack.c.l.bf16 %v1794_v7  ;;  %v1900_v52 = vld [vmem:[%s3764_s2 + $0x8] sm:$0xff] }
   0x4   :  { %v1806_v14 = vsub.s32 0, %v407_v3  ;;  %v1808_v15 = vsub.s32 1, %v407_v3  ;;  %v1810_v16 = vsub.s32 2, %v407_v3  ;;  %v1812_v17 = vsub.s32 3, %v407_v3  ;;  %v18_v46 = vld [vmem:[%s3762_s0 + $0x20] sm:$0xff]  ;;  %v19_v61 = vld [vmem:[%s3762_s0 + $0x28] sm:$0xff] }
   0x5   :  { %v1814_v18 = vsub.s32 4, %v407_v3  ;;  %v1816_v19 = vsub.s32 5, %v407_v3  ;;  %v1819_v21 = vsub.s32 6, %v407_v3  ;;  %v149_v56 = vunpack.c.h.bf16 %v1794_v7 }
   0x6   :  { %v1823_v22 = vrot.slane %v1799_v8, %v1806_v14  ;;  %v1827_v23 = vrot.slane %v1804_v9, %v1806_v14  ;;  %v1831_v24 = vrot.slane %v1799_v8, %v1808_v15  ;;  %v1835_v25 = vrot.slane %v1804_v9, %v1808_v15 }
   0x7   :  { %v1839_v26 = vrot.slane %v1799_v8, %v1810_v16  ;;  %v1843_v27 = vrot.slane %v1804_v9, %v1810_v16  ;;  %v1847_v28 = vrot.slane %v1799_v8, %v1812_v17  ;;  %v1851_v29 = vrot.slane %v1804_v9, %v1812_v17 }
   0x8   :  { %v566_v30 = vmul.f32 %v1823_v22, %v142_v2  ;;  %v567_v31 = vmul.f32 %v1831_v24, %v143_v4  ;;  %v1857_v32 = vrot.slane %v1799_v8, %v1814_v18  ;;  %v1861_v33 = vrot.slane %v1804_v9, %v1814_v18 }
   0x9   :  { %v568_v34 = vmul.f32 %v1839_v26, %v144_v10  ;;  %v569_v35 = vmul.f32 %v1847_v28, %v145_v11  ;;  %v1867_v36 = vrot.slane %v1799_v8, %v1816_v19  ;;  %v1871_v37 = vrot.slane %v1804_v9, %v1816_v19 }
   0xa   :  { %v990_v38 = vadd.f32 %v1827_v23, %v566_v30  ;;  %v991_v39 = vadd.f32 %v1835_v25, %v567_v31  ;;  %v570_v40 = vmul.f32 %v1857_v32, %v146_v12  ;;  %v1878_v41 = vrot.slane %v1799_v8, %v1819_v21 }
   0xb   :  { %3850 = vst [vmem:[#allocation2_spill] sm:$0xff] %v1867_v36  ;;  %v992_v42 = vadd.f32 %v1843_v27, %v568_v34  ;;  %v993_v43 = vadd.f32 %v1851_v29, %v569_v35  ;;  %v571_v44 = vmul.f32 %v1867_v36, %v147_v13  ;;  %v1885_v45 = vrot.slane %v1804_v9, %v1819_v21 }
   0xc   :  { %v1246_v47 = vmax.f32 %v990_v38, 0.0  ;;  %v1247_v48 = vmax.f32 %v991_v39, 0.0  ;;  %v994_v49 = vadd.f32 %v1861_v33, %v570_v40  ;;  %v572_v50 = vmul.f32 %v1878_v41, %v148_v20 }
   0xd   :  { %v1248_v53 = vmax.f32 %v992_v42, 0.0  ;;  %v1249_v54 = vmax.f32 %v993_v43, 0.0  ;;  %v995_v55 = vadd.f32 %v1871_v37, %v571_v44  ;;  %v1911_v59 = vsub.s32 7, %v407_v3 }
   0xe   :  { %1502 = vst [vmem:[%s3765_s3] sm:$0xff] %v1246_v47  ;;  %1503 = vst [vmem:[%s3765_s3 + $0x8] sm:$0xff] %v1247_v48  ;;  %v1250_v57 = vmax.f32 %v994_v49, 0.0  ;;  %v996_v58 = vadd.f32 %v1885_v45, %v572_v50  ;;  %v150_v60 = vunpack.c.l.bf16 %v18_v46  ;;  %v1924_v63 = vrot.slane %v1895_v51, %v1806_v14  ;;  %v21_v48 = vld [vmem:[%s3762_s0 + $0x38] sm:$0xff] }
   0xf   :  { %1504 = vst [vmem:[%s3765_s3 + $0x10] sm:$0xff] %v1248_v53  ;;  %1505 = vst [vmem:[%s3765_s3 + $0x18] sm:$0xff] %v1249_v54  ;;  %v1251_v62 = vmax.f32 %v995_v55, 0.0  ;;  %v1928_v0 = vrot.slane %v1900_v52, %v1806_v14  ;;  %v151_v1 = vunpack.c.h.bf16 %v18_v46  ;;  %v1935_v3 = vrot.slane %v1799_v8, %v1911_v59 }
  0x10   :  { %1506 = vst [vmem:[%s3765_s3 + $0x20] sm:$0xff] %v1250_v57  ;;  %v1252_v2 = vmax.f32 %v996_v58, 0.0  ;;  %v1939_v4 = vrot.slane %v1804_v9, %v1911_v59  ;;  %v1943_v5 = vrot.slane %v1895_v51, %v1808_v15  ;;  %v574_v6 = vmul.f32 %v1924_v63, %v150_v60  ;;  %v20_v9 = vld [vmem:[%s3762_s0 + $0x30] sm:$0xff]  ;;  %v22_v60 = vld [vmem:[%s3762_s0 + $0x40] sm:$0xff] }
  0x11   :  { %1507 = vst [vmem:[%s3765_s3 + $0x28] sm:$0xff] %v1251_v62  ;;  %v1951_v7 = vrot.slane %v1900_v52, %v1808_v15  ;;  %v152_v8 = vunpack.c.l.bf16 %v19_v61  ;;  %v1955_v10 = vrot.slane %v1895_v51, %v1810_v16  ;;  %v573_v11 = vmul.f32 %v1935_v3, %v149_v56 }
  0x12   :  { %3851 = vst [vmem:[#allocation3_spill] sm:$0xff] %v1943_v5  ;;  %1508 = vst [vmem:[%s3765_s3 + $0x30] sm:$0xff] %v1252_v2  ;;  %v575_v12 = vmul.f32 %v1943_v5, %v151_v1  ;;  %v1967_v13 = vrot.slane %v1900_v52, %v1810_v16  ;;  %v153_v20 = vunpack.c.h.bf16 %v19_v61  ;;  %v998_v30 = vadd.f32 %v1928_v0, %v574_v6  ;;  %v2028_v6 = vld [vmem:[%s3763_s1 + $0x10] sm:$0xff] }
  0x13   :  { %3852 = vst [vmem:[#allocation4_spill] sm:$0xff] %v1955_v10  ;;  %v576_v31 = vmul.f32 %v1955_v10, %v152_v8  ;;  %v1973_v34 = vrot.slane %v1895_v51, %v1812_v17  ;;  %v1977_v35 = vrot.slane %v1900_v52, %v1812_v17  ;;  %v997_v38 = vadd.f32 %v1939_v4, %v573_v11  ;;  %v2033_v8 = vld [vmem:[%s3764_s2 + $0x10] sm:$0xff] }
  0x14   :  { %3853 = vst [vmem:[#allocation5_spill] sm:$0xff] %v1967_v13  ;;  %v999_v39 = vadd.f32 %v1951_v7, %v575_v12  ;;  %v154_v40 = vunpack.c.l.bf16 %v20_v9  ;;  %v1983_v42 = vrot.slane %v1895_v51, %v1814_v18  ;;  %v1254_v43 = vmax.f32 %v998_v30, 0.0 }
  0x15   :  { %3854 = vst [vmem:[#allocation6_spill] sm:$0xff] %v1977_v35  ;;  %v1000_v44 = vadd.f32 %v1967_v13, %v576_v31  ;;  %v577_v46 = vmul.f32 %v1973_v34, %v153_v20  ;;  %v1989_v47 = vrot.slane %v1900_v52, %v1814_v18  ;;  %v1253_v49 = vmax.f32 %v997_v38, 0.0 }
  0x16   :  { %3855 = vst [vmem:[#allocation7_spill] sm:$0xff] %v1983_v42  ;;  %v1255_v50 = vmax.f32 %v999_v39, 0.0  ;;  %v578_v53 = vmul.f32 %v1983_v42, %v154_v40  ;;  %v155_v54 = vunpack.c.h.bf16 %v20_v9  ;;  %1510 = vst [vmem:[%s3765_s3 + $0x40] sm:$0xff] %v1254_v43  ;;  %v2001_v57 = vrot.slane %v1895_v51, %v1816_v19  ;;  %v23_v40 = vld [vmem:[%s3762_s0 + $0x48] sm:$0xff] }
  0x17   :  { %v1256_v55 = vmax.f32 %v1000_v44, 0.0  ;;  %v1001_v56 = vadd.f32 %v1977_v35, %v577_v46  ;;  %v2005_v58 = vrot.slane %v1900_v52, %v1816_v19  ;;  %1509 = vst [vmem:[%s3765_s3 + $0x38] sm:$0xff] %v1253_v49  ;;  %v156_v62 = vunpack.c.l.bf16 %v21_v48 }
  0x18   :  { %3856 = vst [vmem:[#allocation8_spill] sm:$0xff] %v2001_v57  ;;  %1511 = vst [vmem:[%s3765_s3 + $0x48] sm:$0xff] %v1255_v50  ;;  %v1002_v61 = vadd.f32 %v1989_v47, %v578_v53  ;;  %v2019_v1 = vrot.slane %v1895_v51, %v1819_v21  ;;  %v2023_v2 = vrot.slane %v1900_v52, %v1819_v21  ;;  %v157_v12 = vunpack.c.h.bf16 %v21_v48 }
  0x19   :  { %3857 = vst [vmem:[#allocation9_spill] sm:$0xff] %v2005_v58  ;;  %1512 = vst [vmem:[%s3765_s3 + $0x50] sm:$0xff] %v1256_v55  ;;  %v1257_v9 = vmax.f32 %v1001_v56, 0.0  ;;  %v579_v11 = vmul.f32 %v2001_v57, %v155_v54  ;;  %v2041_v20 = vrot.slane %v1895_v51, %v1911_v59  ;;  %v2046_v38 = vrot.slane %v1900_v52, %v1911_v59 }
  0x1a   :  { %3858 = vst [vmem:[#allocation10_spill] sm:$0xff] %v2019_v1  ;;  %3859 = vst [vmem:[#allocation11_spill] sm:$0xff] %v2023_v2  ;;  %v1258_v30 = vmax.f32 %v1002_v61, 0.0  ;;  %v580_v31 = vmul.f32 %v2019_v1, %v156_v62  ;;  %v158_v39 = vunpack.c.l.bf16 %v22_v60  ;;  %v2058_v44 = vrot.slane %v2028_v6, %v1806_v14  ;;  %v24_v61 = vld [vmem:[%s3762_s0 + $0x50] sm:$0xff] }
  0x1b   :  { %3860 = vst [vmem:[#allocation12_spill] sm:$0xff] %v2041_v20  ;;  %3861 = vst [vmem:[#allocation13_spill] sm:$0xff] %v2046_v38  ;;  %v1003_v43 = vadd.f32 %v2005_v58, %v579_v11  ;;  %v581_v51 = vmul.f32 %v2041_v20, %v157_v12  ;;  %v2062_v52 = vrot.slane %v2033_v8, %v1806_v14  ;;  %v159_v48 = vunpack.c.h.bf16 %v22_v60 }
  0x1c   :  { %1513 = vst [vmem:[%s3765_s3 + $0x58] sm:$0xff] %v1257_v9  ;;  %3862 = vst [vmem:[#allocation14_spill] sm:$0xff] %v2058_v44  ;;  %v1004_v46 = vadd.f32 %v2023_v2, %v580_v31  ;;  %v2070_v49 = vrot.slane %v2028_v6, %v1808_v15  ;;  %v2074_v50 = vrot.slane %v2033_v8, %v1808_v15  ;;  %v160_v56 = vunpack.c.l.bf16 %v23_v40 }
  0x1d   :  { %3863 = vst [vmem:[#allocation15_spill] sm:$0xff] %v2062_v52  ;;  %1514 = vst [vmem:[%s3765_s3 + $0x60] sm:$0xff] %v1258_v30  ;;  %v1259_v53 = vmax.f32 %v1003_v43, 0.0  ;;  %v1005_v54 = vadd.f32 %v2046_v38, %v581_v51  ;;  %v582_v55 = vmul.f32 %v2058_v44, %v158_v39  ;;  %v2084_v9 = vrot.slane %v2028_v6, %v1810_v16 }
  0x1e   :  { %3864 = vst [vmem:[#allocation16_spill] sm:$0xff] %v2070_v49  ;;  %3865 = vst [vmem:[#allocation17_spill] sm:$0xff] %v2074_v50  ;;  %v1260_v62 = vmax.f32 %v1004_v46, 0.0  ;;  %v583_v60 = vmul.f32 %v2070_v49, %v159_v48  ;;  %v2088_v11 = vrot.slane %v2033_v8, %v1810_v16  ;;  %v161_v31 = vunpack.c.h.bf16 %v23_v40  ;;  %v25_v40 = vld [vmem:[%s3762_s0 + $0x58] sm:$0xff] }
  0x1f   :  { %3866 = vst [vmem:[#allocation18_spill] sm:$0xff] %v2084_v9  ;;  %1515 = vst [vmem:[%s3765_s3 + $0x68] sm:$0xff] %v1259_v53  ;;  %v1261_v12 = vmax.f32 %v1005_v54, 0.0  ;;  %v1006_v30 = vadd.f32 %v2062_v52, %v582_v55  ;;  %v2096_v39 = vrot.slane %v2028_v6, %v1812_v17  ;;  %v584_v51 = vmul.f32 %v2084_v9, %v160_v56 }
  0x20   :  { %3867 = vst [vmem:[#allocation19_spill] sm:$0xff] %v2088_v11  ;;  %1516 = vst [vmem:[%s3765_s3 + $0x70] sm:$0xff] %v1260_v62  ;;  %v1007_v43 = vadd.f32 %v2074_v50, %v583_v60  ;;  %v2105_v46 = vrot.slane %v2033_v8, %v1812_v17  ;;  %v162_v48 = vunpack.c.l.bf16 %v24_v61  ;;  %v2116_v55 = vrot.slane %v2028_v6, %v1814_v18 }
  0x21   :  { %3868 = vst [vmem:[#allocation20_spill] sm:$0xff] %v2096_v39  ;;  %1517 = vst [vmem:[%s3765_s3 + $0x78] sm:$0xff] %v1261_v12  ;;  %v1262_v53 = vmax.f32 %v1006_v30, 0.0  ;;  %v585_v54 = vmul.f32 %v2096_v39, %v161_v31  ;;  %v2120_v56 = vrot.slane %v2033_v8, %v1814_v18  ;;  %v1008_v60 = vadd.f32 %v2088_v11, %v584_v51 }
  0x22   :  { %3869 = vst [vmem:[#allocation21_spill] sm:$0xff] %v2105_v46  ;;  %3870 = vst [vmem:[#allocation22_spill] sm:$0xff] %v2116_v55  ;;  %v1263_v62 = vmax.f32 %v1007_v43, 0.0  ;;  %v163_v50 = vunpack.c.h.bf16 %v24_v61  ;;  %v2125_v52 = vrot.slane %v2028_v6, %v1816_v19  ;;  %v586_v30 = vmul.f32 %v2116_v55, %v162_v48  ;;  %v26_v61 = vld [vmem:[%s3762_s0 + $0x60] sm:$0xff] }
  0x23   :  { %1518 = vst [vmem:[%s3765_s3 + $0x80] sm:$0xff] %v1262_v53  ;;  %v1009_v12 = vadd.f32 %v2105_v46, %v585_v54  ;;  %v2134_v31 = vrot.slane %v2033_v8, %v1816_v19  ;;  %v164_v43 = vunpack.c.l.bf16 %v25_v40  ;;  %v1264_v51 = vmax.f32 %v1008_v60, 0.0  ;;  %v2154_v46 = vld [vmem:[%s3763_s1 + $0x18] sm:$0xff] }
  0x24   :  { %3871 = vst [vmem:[#allocation23_spill] sm:$0xff] %v2125_v52  ;;  %1519 = vst [vmem:[%s3765_s3 + $0x88] sm:$0xff] %v1263_v62  ;;  %v587_v53 = vmul.f32 %v2125_v52, %v163_v50  ;;  %v2145_v54 = vrot.slane %v2028_v6, %v1819_v21  ;;  %v2149_v48 = vrot.slane %v2033_v8, %v1819_v21  ;;  %v2159_v62 = vld [vmem:[%s3764_s2 + $0x18] sm:$0xff]  ;;  %v165_v52 = vunpack.c.h.bf16 %v25_v40  ;;  %v27_v40 = vld [vmem:[%s3762_s0 + $0x68] sm:$0xff] }
  0x25   :  { %3872 = vst [vmem:[#allocation24_spill] sm:$0xff] %v2134_v31  ;;  %v1265_v60 = vmax.f32 %v1009_v12, 0.0  ;;  %v1010_v50 = vadd.f32 %v2120_v56, %v586_v30  ;;  %v2164_v55 = vrot.slane %v2028_v6, %v1911_v59  ;;  %1520 = vst [vmem:[%s3765_s3 + $0x90] sm:$0xff] %v1264_v51  ;;  %v2173_v9 = vrot.slane %v2033_v8, %v1911_v59 }
  0x26   :  { %3873 = vst [vmem:[#allocation25_spill] sm:$0xff] %v2145_v54  ;;  %v1011_v11 = vadd.f32 %v2134_v31, %v587_v53  ;;  %v588_v39 = vmul.f32 %v2145_v54, %v164_v43  ;;  %v166_v12 = vunpack.c.l.bf16 %v26_v61  ;;  %v2184_v51 = vrot.slane %v2154_v46, %v1806_v14 }
  0x27   :  { %3874 = vst [vmem:[#allocation26_spill] sm:$0xff] %v2164_v55  ;;  %3875 = vst [vmem:[#allocation27_spill] sm:$0xff] %v2173_v9  ;;  %v1266_v6 = vmax.f32 %v1010_v50, 0.0  ;;  %v589_v30 = vmul.f32 %v2164_v55, %v165_v52  ;;  %v2188_v8 = vrot.slane %v2159_v62, %v1806_v14  ;;  %v167_v54 = vunpack.c.h.bf16 %v26_v61 }
  0x28   :  { %1521 = vst [vmem:[%s3765_s3 + $0x98] sm:$0xff] %v1265_v60  ;;  %3876 = vst [vmem:[#allocation28_spill] sm:$0xff] %v2184_v51  ;;  %v1267_v43 = vmax.f32 %v1011_v11, 0.0  ;;  %v1012_v53 = vadd.f32 %v2149_v48, %v588_v39  ;;  %v2193_v31 = vrot.slane %v2154_v46, %v1808_v15  ;;  %v590_v60 = vmul.f32 %v2184_v51, %v166_v12  ;;  %v28_v39 = vld [vmem:[%s3762_s0 + $0x70] sm:$0xff] }
  0x29   :  { %3877 = vst [vmem:[#allocation29_spill] sm:$0xff] %v2188_v8  ;;  %1522 = vst [vmem:[%s3765_s3 + $0xa0] sm:$0xff] %v1266_v6  ;;  %v1013_v52 = vadd.f32 %v2173_v9, %v589_v30  ;;  %v2202_v14 = vrot.slane %v2159_v62, %v1808_v15  ;;  %v168_v11 = vunpack.c.l.bf16 %v27_v40  ;;  %v2213_v6 = vrot.slane %v2154_v46, %v1810_v16 }
  0x2a   :  { %3878 = vst [vmem:[#allocation30_spill] sm:$0xff] %v2193_v31  ;;  %1523 = vst [vmem:[%s3765_s3 + $0xa8] sm:$0xff] %v1267_v43  ;;  %v1268_v61 = vmax.f32 %v1012_v53, 0.0  ;;  %v591_v50 = vmul.f32 %v2193_v31, %v167_v54  ;;  %v2217_v15 = vrot.slane %v2159_v62, %v1810_v16  ;;  %v1014_v30 = vadd.f32 %v2188_v8, %v590_v60 }
  0x2b   :  { %3879 = vst [vmem:[#allocation31_spill] sm:$0xff] %v2202_v14  ;;  %3880 = vst [vmem:[#allocation32_spill] sm:$0xff] %v2213_v6  ;;  %v1269_v12 = vmax.f32 %v1013_v52, 0.0  ;;  %v169_v9 = vunpack.c.h.bf16 %v27_v40  ;;  %v2222_v51 = vrot.slane %v2154_v46, %v1812_v17  ;;  %v592_v43 = vmul.f32 %v2213_v6, %v168_v11  ;;  %v29_v40 = vld [vmem:[%s3762_s0 + $0x78] sm:$0xff] }
  0x2c   :  { %3881 = vst [vmem:[#allocation33_spill] sm:$0xff] %v2217_v15  ;;  %1524 = vst [vmem:[%s3765_s3 + $0xb0] sm:$0xff] %v1268_v61  ;;  %v1015_v54 = vadd.f32 %v2202_v14, %v591_v50  ;;  %v2231_v16 = vrot.slane %v2159_v62, %v1812_v17  ;;  %v170_v53 = vunpack.c.l.bf16 %v28_v39  ;;  %v1270_v52 = vmax.f32 %v1014_v30, 0.0 }
  0x2d   :  { %1525 = vst [vmem:[%s3765_s3 + $0xb8] sm:$0xff] %v1269_v12  ;;  %v593_v60 = vmul.f32 %v2222_v51, %v169_v9  ;;  %v2242_v61 = vrot.slane %v2154_v46, %v1814_v18  ;;  %v2246_v17 = vrot.slane %v2159_v62, %v1814_v18  ;;  %v1016_v50 = vadd.f32 %v2217_v15, %v592_v43 }
  0x2e   :  { %3882 = vst [vmem:[#allocation34_spill] sm:$0xff] %v2231_v16  ;;  %v1271_v11 = vmax.f32 %v1015_v54, 0.0  ;;  %v171_v14 = vunpack.c.h.bf16 %v28_v39  ;;  %v2251_v8 = vrot.slane %v2154_v46, %v1816_v19  ;;  %1526 = vst [vmem:[%s3765_s3 + $0xc0] sm:$0xff] %v1270_v52  ;;  %v2260_v18 = vrot.slane %v2159_v62, %v1816_v19  ;;  %v30_v39 = vld [vmem:[%s3762_s0 + $0x80] sm:$0xff] }
  0x2f   :  { %3883 = vst [vmem:[#allocation35_spill] sm:$0xff] %v2242_v61  ;;  %3884 = vst [vmem:[#allocation36_spill] sm:$0xff] %v2246_v17  ;;  %v1017_v9 = vadd.f32 %v2231_v16, %v593_v60  ;;  %v594_v12 = vmul.f32 %v2242_v61, %v170_v53  ;;  %v172_v30 = vunpack.c.l.bf16 %v29_v40  ;;  %v1272_v54 = vmax.f32 %v1016_v50, 0.0  ;;  %v31_v53 = vld [vmem:[%s3762_s0 + $0x88] sm:$0xff] }
  0x30   :  { %3885 = vst [vmem:[#allocation37_spill] sm:$0xff] %v2251_v8  ;;  %3886 = vst [vmem:[#allocation38_spill] sm:$0xff] %v2260_v18  ;;  %v595_v43 = vmul.f32 %v2251_v8, %v171_v14  ;;  %v2271_v52 = vrot.slane %v2154_v46, %v1819_v21  ;;  %v2275_v19 = vrot.slane %v2159_v62, %v1819_v21  ;;  %v173_v61 = vunpack.c.h.bf16 %v29_v40  ;;  %v32_v40 = vld [vmem:[%s3762_s0 + $0x90] sm:$0xff] }
  0x31   :  { %1527 = vst [vmem:[%s3765_s3 + $0xc8] sm:$0xff] %v1271_v11  ;;  %v1273_v60 = vmax.f32 %v1017_v9, 0.0  ;;  %v1018_v16 = vadd.f32 %v2246_v17, %v594_v12  ;;  %v2283_v11 = vrot.slane %v2154_v46, %v1911_v59  ;;  %1528 = vst [vmem:[%s3765_s3 + $0xd0] sm:$0xff] %v1272_v54  ;;  %v2292_v50 = vrot.slane %v2159_v62, %v1911_v59 }
  0x32   :  { %3887 = vst [vmem:[#allocation39_spill] sm:$0xff] %v2271_v52  ;;  %v1019_v14 = vadd.f32 %v2260_v18, %v595_v43  ;;  %v596_v21 = vmul.f32 %v2271_v52, %v172_v30  ;;  %v174_v9 = vunpack.c.l.bf16 %v30_v39  ;;  %v175_v54 = vunpack.c.h.bf16 %v30_v39 }
  0x33   :  { %1529 = vst [vmem:[%s3765_s3 + $0xd8] sm:$0xff] %v1273_v60  ;;  %v1274_v46 = vmax.f32 %v1018_v16, 0.0  ;;  %v597_v12 = vmul.f32 %v2283_v11, %v173_v61  ;;  %v176_v43 = vunpack.c.l.bf16 %v31_v53  ;;  %v177_v62 = vunpack.c.h.bf16 %v31_v53  ;;  %v33_v61 = vld [vmem:[%s3762_s0 + $0x98] sm:$0xff] }
  0x34   :  { %v1275_v18 = vmax.f32 %v1019_v14, 0.0  ;;  %v1020_v30 = vadd.f32 %v2275_v19, %v596_v21  ;;  %v598_v59 = vmul.f32 %v1823_v22, %v174_v9  ;;  %v599_v17 = vmul.f32 %v1831_v24, %v175_v54 }
  0x35   :  { %1530 = vst [vmem:[%s3765_s3 + $0xe0] sm:$0xff] %v1274_v46  ;;  %v1021_v52 = vadd.f32 %v2292_v50, %v597_v12  ;;  %v600_v16 = vmul.f32 %v1839_v26, %v176_v43  ;;  %v178_v60 = vunpack.c.l.bf16 %v32_v40  ;;  %v601_v14 = vmul.f32 %v1847_v28, %v177_v62  ;;  %v34_v43 = vld [vmem:[%s3762_s0 + $0xa0] sm:$0xff] }
  0x36   :  { %1531 = vst [vmem:[%s3765_s3 + $0xe8] sm:$0xff] %v1275_v18  ;;  %v1276_v39 = vmax.f32 %v1020_v30, 0.0  ;;  %v1022_v53 = vadd.f32 %v1827_v23, %v598_v59  ;;  %v179_v21 = vunpack.c.h.bf16 %v32_v40  ;;  %v1023_v46 = vadd.f32 %v1835_v25, %v599_v17  ;;  %v35_v17 = vld [vmem:[%s3762_s0 + $0xa8] sm:$0xff] }
  0x37   :  { %v1277_v9 = vmax.f32 %v1021_v52, 0.0  ;;  %v1024_v12 = vadd.f32 %v1843_v27, %v600_v16  ;;  %v602_v54 = vmul.f32 %v1857_v32, %v178_v60  ;;  %v1025_v30 = vadd.f32 %v1851_v29, %v601_v14 }
  0x38   :  { %1532 = vst [vmem:[%s3765_s3 + $0xf0] sm:$0xff] %v1276_v39  ;;  %v1278_v18 = vmax.f32 %v1022_v53, 0.0  ;;  %v603_v40 = vmul.f32 %v1867_v36, %v179_v21  ;;  %v180_v52 = vunpack.c.l.bf16 %v33_v61  ;;  %v1279_v59 = vmax.f32 %v1023_v46, 0.0  ;;  %v36_v36 = vld [vmem:[%s3762_s0 + $0xb0] sm:$0xff] }
  0x39   :  { %1533 = vst [vmem:[%s3765_s3 + $0xf8] sm:$0xff] %v1277_v9  ;;  %v1280_v62 = vmax.f32 %v1024_v12, 0.0  ;;  %v1026_v16 = vadd.f32 %v1861_v33, %v602_v54  ;;  %v181_v60 = vunpack.c.h.bf16 %v33_v61  ;;  %v1281_v39 = vmax.f32 %v1025_v30, 0.0 }
  0x3a   :  { %1534 = vst [vmem:[%s3765_s3 + $0x100] sm:$0xff] %v1278_v18  ;;  %v1027_v53 = vadd.f32 %v1871_v37, %v603_v40  ;;  %v604_v14 = vmul.f32 %v1878_v41, %v180_v52  ;;  %v182_v21 = vunpack.c.l.bf16 %v34_v43  ;;  %1535 = vst [vmem:[%s3765_s3 + $0x108] sm:$0xff] %v1279_v59  ;;  %v183_v46 = vunpack.c.h.bf16 %v34_v43 }
  0x3b   :  { %1536 = vst [vmem:[%s3765_s3 + $0x110] sm:$0xff] %v1280_v62  ;;  %v1282_v61 = vmax.f32 %v1026_v16, 0.0  ;;  %v605_v9 = vmul.f32 %v1935_v3, %v181_v60  ;;  %v184_v12 = vunpack.c.l.bf16 %v35_v17  ;;  %1537 = vst [vmem:[%s3765_s3 + $0x118] sm:$0xff] %v1281_v39  ;;  %v185_v40 = vunpack.c.h.bf16 %v35_v17  ;;  %v37_v16 = vld [vmem:[%s3762_s0 + $0xb8] sm:$0xff] }
  0x3c   :  { %v1283_v54 = vmax.f32 %v1027_v53, 0.0  ;;  %v1028_v18 = vadd.f32 %v1885_v45, %v604_v14  ;;  %v606_v30 = vmul.f32 %v1924_v63, %v182_v21  ;;  %v607_v59 = vmul.f32 %v1943_v5, %v183_v46  ;;  %v38_v46 = vld [vmem:[%s3762_s0 + $0xc0] sm:$0xff] }
  0x3d   :  { %1538 = vst [vmem:[%s3765_s3 + $0x120] sm:$0xff] %v1282_v61  ;;  %v1029_v52 = vadd.f32 %v1939_v4, %v605_v9  ;;  %v608_v43 = vmul.f32 %v1955_v10, %v184_v12  ;;  %v186_v62 = vunpack.c.l.bf16 %v36_v36  ;;  %v609_v39 = vmul.f32 %v1973_v34, %v185_v40 }
  0x3e   :  { %1539 = vst [vmem:[%s3765_s3 + $0x128] sm:$0xff] %v1283_v54  ;;  %v1284_v17 = vmax.f32 %v1028_v18, 0.0  ;;  %v1030_v60 = vadd.f32 %v1928_v0, %v606_v30  ;;  %v187_v53 = vunpack.c.h.bf16 %v36_v36  ;;  %v1031_v21 = vadd.f32 %v1951_v7, %v607_v59  ;;  %v39_v30 = vld [vmem:[%s3762_s0 + $0xc8] sm:$0xff] }
  0x3f   :  { %v1285_v14 = vmax.f32 %v1029_v52, 0.0  ;;  %v1032_v61 = vadd.f32 %v1967_v13, %v608_v43  ;;  %v610_v9 = vmul.f32 %v1983_v42, %v186_v62  ;;  %v1033_v54 = vadd.f32 %v1977_v35, %v609_v39 }
  0x40   :  { %1540 = vst [vmem:[%s3765_s3 + $0x130] sm:$0xff] %v1284_v17  ;;  %v1286_v12 = vmax.f32 %v1030_v60, 0.0  ;;  %v611_v36 = vmul.f32 %v2001_v57, %v187_v53  ;;  %v188_v18 = vunpack.c.l.bf16 %v37_v16  ;;  %v1287_v40 = vmax.f32 %v1031_v21, 0.0  ;;  %v40_v53 = vld [vmem:[%s3762_s0 + $0xd0] sm:$0xff] }
  0x41   :  { %1541 = vst [vmem:[%s3765_s3 + $0x138] sm:$0xff] %v1285_v14  ;;  %v1288_v52 = vmax.f32 %v1032_v61, 0.0  ;;  %v1034_v59 = vadd.f32 %v1989_v47, %v610_v9  ;;  %v189_v43 = vunpack.c.h.bf16 %v37_v16  ;;  %v1289_v62 = vmax.f32 %v1033_v54, 0.0 }
  0x42   :  { %1542 = vst [vmem:[%s3765_s3 + $0x140] sm:$0xff] %v1286_v12  ;;  %v1035_v17 = vadd.f32 %v2005_v58, %v611_v36  ;;  %v612_v60 = vmul.f32 %v2019_v1, %v188_v18  ;;  %v190_v39 = vunpack.c.l.bf16 %v38_v46  ;;  %1543 = vst [vmem:[%s3765_s3 + $0x148] sm:$0xff] %v1287_v40  ;;  %v191_v21 = vunpack.c.h.bf16 %v38_v46  ;;  %v3888_v46 = vld [vmem:[#allocation18_spill] sm:$0xff] }
  0x43   :  { %1544 = vst [vmem:[%s3765_s3 + $0x150] sm:$0xff] %v1288_v52  ;;  %v1290_v16 = vmax.f32 %v1034_v59, 0.0  ;;  %v613_v14 = vmul.f32 %v2041_v20, %v189_v43  ;;  %v192_v61 = vunpack.c.l.bf16 %v39_v30  ;;  %1545 = vst [vmem:[%s3765_s3 + $0x158] sm:$0xff] %v1289_v62  ;;  %v193_v36 = vunpack.c.h.bf16 %v39_v30  ;;  %v41_v43 = vld [vmem:[%s3762_s0 + $0xd8] sm:$0xff]  ;;  %v3889_v62 = vld [vmem:[#allocation15_spill] sm:$0xff] }
  0x44   :  { %v1291_v9 = vmax.f32 %v1035_v17, 0.0  ;;  %v1036_v12 = vadd.f32 %v2023_v2, %v612_v60  ;;  %v614_v54 = vmul.f32 %v2058_v44, %v190_v39  ;;  %v615_v40 = vmul.f32 %v2070_v49, %v191_v21  ;;  %v3890_v60 = vld [vmem:[#allocation20_spill] sm:$0xff]  ;;  %v3892_v49 = vld [vmem:[#allocation19_spill] sm:$0xff]  ;;  %v42_v2 = vld [vmem:[%s3762_s0 + $0xe0] sm:$0xff] }
  0x45   :  { %1546 = vst [vmem:[%s3765_s3 + $0x160] sm:$0xff] %v1290_v16  ;;  %v1037_v18 = vadd.f32 %v2046_v38, %v613_v14  ;;  %v616_v52 = vmul.f32 %v3888_v46, %v192_v61  ;;  %v194_v59 = vunpack.c.l.bf16 %v40_v53  ;;  %v617_v39 = vmul.f32 %v3890_v60, %v193_v36  ;;  %v3891_v38 = vld [vmem:[#allocation17_spill] sm:$0xff]  ;;  %v3893_v46 = vld [vmem:[#allocation22_spill] sm:$0xff]  ;;  %v3895_v36 = vld [vmem:[#allocation23_spill] sm:$0xff] }
  0x46   :  { %1547 = vst [vmem:[%s3765_s3 + $0x168] sm:$0xff] %v1291_v9  ;;  %v1292_v30 = vmax.f32 %v1036_v12, 0.0  ;;  %v1038_v17 = vadd.f32 %v3889_v62, %v614_v54  ;;  %v195_v16 = vunpack.c.h.bf16 %v40_v53  ;;  %v1039_v21 = vadd.f32 %v3891_v38, %v615_v40  ;;  %v3894_v12 = vld [vmem:[#allocation21_spill] sm:$0xff]  ;;  %v43_v40 = vld [vmem:[%s3762_s0 + $0xe8] sm:$0xff]  ;;  %v44_v38 = vld [vmem:[%s3762_s0 + $0xf0] sm:$0xff] }
  0x47   :  { %v1293_v14 = vmax.f32 %v1037_v18, 0.0  ;;  %v1040_v61 = vadd.f32 %v3892_v49, %v616_v52  ;;  %v618_v44 = vmul.f32 %v3893_v46, %v194_v59  ;;  %v1041_v54 = vadd.f32 %v3894_v12, %v617_v39 }
  0x48   :  { %1548 = vst [vmem:[%s3765_s3 + $0x170] sm:$0xff] %v1292_v30  ;;  %v1294_v9 = vmax.f32 %v1038_v17, 0.0  ;;  %v619_v53 = vmul.f32 %v3895_v36, %v195_v16  ;;  %v196_v18 = vunpack.c.l.bf16 %v41_v43  ;;  %v1295_v52 = vmax.f32 %v1039_v21, 0.0  ;;  %v3896_v17 = vld [vmem:[#allocation24_spill] sm:$0xff]  ;;  %v3897_v16 = vld [vmem:[#allocation25_spill] sm:$0xff] }
  0x49   :  { %1549 = vst [vmem:[%s3765_s3 + $0x178] sm:$0xff] %v1293_v14  ;;  %v1296_v59 = vmax.f32 %v1040_v61, 0.0  ;;  %v1042_v46 = vadd.f32 %v2120_v56, %v618_v44  ;;  %v197_v49 = vunpack.c.h.bf16 %v41_v43  ;;  %v1297_v30 = vmax.f32 %v1041_v54, 0.0  ;;  %v3898_v54 = vld [vmem:[#allocation28_spill] sm:$0xff] }
  0x4a   :  { %1550 = vst [vmem:[%s3765_s3 + $0x180] sm:$0xff] %v1294_v9  ;;  %v1043_v39 = vadd.f32 %v3896_v17, %v619_v53  ;;  %v620_v36 = vmul.f32 %v3897_v16, %v196_v18  ;;  %v198_v12 = vunpack.c.l.bf16 %v42_v2  ;;  %1551 = vst [vmem:[%s3765_s3 + $0x188] sm:$0xff] %v1295_v52  ;;  %v199_v14 = vunpack.c.h.bf16 %v42_v2  ;;  %v3899_v52 = vld [vmem:[#allocation27_spill] sm:$0xff] }
  0x4b   :  { %1552 = vst [vmem:[%s3765_s3 + $0x190] sm:$0xff] %v1296_v59  ;;  %v1298_v44 = vmax.f32 %v1042_v46, 0.0  ;;  %v621_v43 = vmul.f32 %v2164_v55, %v197_v49  ;;  %v200_v21 = vunpack.c.l.bf16 %v43_v40  ;;  %1553 = vst [vmem:[%s3765_s3 + $0x198] sm:$0xff] %v1297_v30  ;;  %v201_v18 = vunpack.c.h.bf16 %v43_v40  ;;  %v45_v30 = vld [vmem:[%s3762_s0 + $0xf8] sm:$0xff] }
  0x4c   :  { %v1299_v61 = vmax.f32 %v1043_v39, 0.0  ;;  %v1044_v9 = vadd.f32 %v2149_v48, %v620_v36  ;;  %v622_v53 = vmul.f32 %v3898_v54, %v198_v12  ;;  %v623_v49 = vmul.f32 %v2193_v31, %v199_v14  ;;  %v3900_v36 = vld [vmem:[#allocation29_spill] sm:$0xff]  ;;  %v46_v54 = vld [vmem:[%s3762_s0 + $0x100] sm:$0xff] }
  0x4d   :  { %1554 = vst [vmem:[%s3765_s3 + $0x1a0] sm:$0xff] %v1298_v44  ;;  %v1045_v46 = vadd.f32 %v3899_v52, %v621_v43  ;;  %v624_v2 = vmul.f32 %v2213_v6, %v200_v21  ;;  %v202_v59 = vunpack.c.l.bf16 %v44_v38  ;;  %v625_v39 = vmul.f32 %v2222_v51, %v201_v18  ;;  %v3901_v52 = vld [vmem:[#allocation31_spill] sm:$0xff] }
  0x4e   :  { %1555 = vst [vmem:[%s3765_s3 + $0x1a8] sm:$0xff] %v1299_v61  ;;  %v1300_v12 = vmax.f32 %v1044_v9, 0.0  ;;  %v1046_v40 = vadd.f32 %v3900_v36, %v622_v53  ;;  %v203_v44 = vunpack.c.h.bf16 %v44_v38  ;;  %v1047_v14 = vadd.f32 %v3901_v52, %v623_v49  ;;  %v3902_v6 = vld [vmem:[#allocation35_spill] sm:$0xff]  ;;  %v3903_v9 = vld [vmem:[#allocation34_spill] sm:$0xff]  ;;  %v48_v52 = vld [vmem:[%s3762_s0 + $0x110] sm:$0xff] }
  0x4f   :  { %v1301_v43 = vmax.f32 %v1045_v46, 0.0  ;;  %v1048_v21 = vadd.f32 %v2217_v15, %v624_v2  ;;  %v626_v31 = vmul.f32 %v3902_v6, %v202_v59  ;;  %v1049_v53 = vadd.f32 %v3903_v9, %v625_v39  ;;  %v47_v46 = vld [vmem:[%s3762_s0 + $0x108] sm:$0xff]  ;;  %v3904_v59 = vld [vmem:[#allocation36_spill] sm:$0xff] }
  0x50   :  { %1556 = vst [vmem:[%s3765_s3 + $0x1b0] sm:$0xff] %v1300_v12  ;;  %v1302_v61 = vmax.f32 %v1046_v40, 0.0  ;;  %v627_v38 = vmul.f32 %v2251_v8, %v203_v44  ;;  %v204_v18 = vunpack.c.l.bf16 %v45_v30  ;;  %v1303_v49 = vmax.f32 %v1047_v14, 0.0  ;;  %v3905_v40 = vld [vmem:[#allocation38_spill] sm:$0xff]  ;;  %v3906_v44 = vld [vmem:[#allocation39_spill] sm:$0xff] }
  0x51   :  { %1557 = vst [vmem:[%s3765_s3 + $0x1b8] sm:$0xff] %v1301_v43  ;;  %v1304_v2 = vmax.f32 %v1048_v21, 0.0  ;;  %v1050_v6 = vadd.f32 %v3904_v59, %v626_v31  ;;  %v205_v15 = vunpack.c.h.bf16 %v45_v30  ;;  %v1305_v12 = vmax.f32 %v1049_v53, 0.0 }
  0x52   :  { %1558 = vst [vmem:[%s3765_s3 + $0x1c0] sm:$0xff] %v1302_v61  ;;  %v1051_v39 = vadd.f32 %v3905_v40, %v627_v38  ;;  %v628_v8 = vmul.f32 %v3906_v44, %v204_v18  ;;  %v206_v9 = vunpack.c.l.bf16 %v46_v54  ;;  %1559 = vst [vmem:[%s3765_s3 + $0x1c8] sm:$0xff] %v1303_v49  ;;  %v207_v43 = vunpack.c.h.bf16 %v46_v54  ;;  %v49_v49 = vld [vmem:[%s3762_s0 + $0x118] sm:$0xff] }
  0x53   :  { %1560 = vst [vmem:[%s3765_s3 + $0x1d0] sm:$0xff] %v1304_v2  ;;  %v1306_v31 = vmax.f32 %v1050_v6, 0.0  ;;  %v629_v30 = vmul.f32 %v2283_v11, %v205_v15  ;;  %v208_v14 = vunpack.c.l.bf16 %v47_v46  ;;  %1561 = vst [vmem:[%s3765_s3 + $0x1d8] sm:$0xff] %v1305_v12  ;;  %v209_v38 = vunpack.c.h.bf16 %v47_v46 }
  0x54   :  { %v1307_v21 = vmax.f32 %v1051_v39, 0.0  ;;  %v1052_v61 = vadd.f32 %v2275_v19, %v628_v8  ;;  %v630_v53 = vmul.f32 %v1823_v22, %v206_v9  ;;  %v631_v15 = vmul.f32 %v1831_v24, %v207_v43  ;;  %v50_v43 = vld [vmem:[%s3762_s0 + $0x120] sm:$0xff] }
  0x55   :  { %1562 = vst [vmem:[%s3765_s3 + $0x1e0] sm:$0xff] %v1306_v31  ;;  %v1053_v6 = vadd.f32 %v2292_v50, %v629_v30  ;;  %v632_v54 = vmul.f32 %v1839_v26, %v208_v14  ;;  %v210_v18 = vunpack.c.l.bf16 %v48_v52  ;;  %v633_v46 = vmul.f32 %v1847_v28, %v209_v38  ;;  %v51_v38 = vld [vmem:[%s3762_s0 + $0x128] sm:$0xff] }
  0x56   :  { %1563 = vst [vmem:[%s3765_s3 + $0x1e8] sm:$0xff] %v1307_v21  ;;  %v1308_v8 = vmax.f32 %v1052_v61, 0.0  ;;  %v1054_v9 = vadd.f32 %v1827_v23, %v630_v53  ;;  %v211_v2 = vunpack.c.h.bf16 %v48_v52  ;;  %v1055_v39 = vadd.f32 %v1835_v25, %v631_v15  ;;  %v3907_v61 = vld [vmem:[#allocation2_spill] sm:$0xff] }
  0x57   :  { %v1309_v12 = vmax.f32 %v1053_v6, 0.0  ;;  %v1056_v31 = vadd.f32 %v1843_v27, %v632_v54  ;;  %v634_v30 = vmul.f32 %v1857_v32, %v210_v18  ;;  %v1057_v21 = vadd.f32 %v1851_v29, %v633_v46 }
  0x58   :  { %1564 = vst [vmem:[%s3765_s3 + $0x1f0] sm:$0xff] %v1308_v8  ;;  %v1310_v14 = vmax.f32 %v1054_v9, 0.0  ;;  %v635_v52 = vmul.f32 %v3907_v61, %v211_v2  ;;  %v212_v53 = vunpack.c.l.bf16 %v49_v49  ;;  %v1311_v6 = vmax.f32 %v1055_v39, 0.0  ;;  %v52_v61 = vld [vmem:[%s3762_s0 + $0x130] sm:$0xff] }
  0x59   :  { %1565 = vst [vmem:[%s3765_s3 + $0x1f8] sm:$0xff] %v1309_v12  ;;  %v1312_v15 = vmax.f32 %v1056_v31, 0.0  ;;  %v1058_v54 = vadd.f32 %v1861_v33, %v634_v30  ;;  %v213_v18 = vunpack.c.h.bf16 %v49_v49  ;;  %v1313_v8 = vmax.f32 %v1057_v21, 0.0 }
  0x5a   :  { %1566 = vst [vmem:[%s3765_s3 + $0x200] sm:$0xff] %v1310_v14  ;;  %v1059_v9 = vadd.f32 %v1871_v37, %v635_v52  ;;  %v636_v46 = vmul.f32 %v1878_v41, %v212_v53  ;;  %v214_v2 = vunpack.c.l.bf16 %v50_v43  ;;  %1567 = vst [vmem:[%s3765_s3 + $0x208] sm:$0xff] %v1311_v6  ;;  %v215_v39 = vunpack.c.h.bf16 %v50_v43 }
  0x5b   :  { %1568 = vst [vmem:[%s3765_s3 + $0x210] sm:$0xff] %v1312_v15  ;;  %v1314_v49 = vmax.f32 %v1058_v54, 0.0  ;;  %v637_v12 = vmul.f32 %v1935_v3, %v213_v18  ;;  %v216_v31 = vunpack.c.l.bf16 %v51_v38  ;;  %1569 = vst [vmem:[%s3765_s3 + $0x218] sm:$0xff] %v1313_v8  ;;  %v217_v52 = vunpack.c.h.bf16 %v51_v38  ;;  %v53_v54 = vld [vmem:[%s3762_s0 + $0x138] sm:$0xff] }
  0x5c   :  { %v1315_v30 = vmax.f32 %v1059_v9, 0.0  ;;  %v1060_v14 = vadd.f32 %v1885_v45, %v636_v46  ;;  %v638_v21 = vmul.f32 %v1924_v63, %v214_v2  ;;  %v639_v6 = vmul.f32 %v1943_v5, %v215_v39  ;;  %v54_v39 = vld [vmem:[%s3762_s0 + $0x140] sm:$0xff] }
  0x5d   :  { %1570 = vst [vmem:[%s3765_s3 + $0x220] sm:$0xff] %v1314_v49  ;;  %v1061_v53 = vadd.f32 %v1939_v4, %v637_v12  ;;  %v640_v43 = vmul.f32 %v1955_v10, %v216_v31  ;;  %v218_v15 = vunpack.c.l.bf16 %v52_v61  ;;  %v641_v8 = vmul.f32 %v1973_v34, %v217_v52 }
  0x5e   :  { %1571 = vst [vmem:[%s3765_s3 + $0x228] sm:$0xff] %v1315_v30  ;;  %v1316_v38 = vmax.f32 %v1060_v14, 0.0  ;;  %v1062_v18 = vadd.f32 %v1928_v0, %v638_v21  ;;  %v219_v9 = vunpack.c.h.bf16 %v52_v61  ;;  %v1063_v2 = vadd.f32 %v1951_v7, %v639_v6  ;;  %v55_v21 = vld [vmem:[%s3762_s0 + $0x148] sm:$0xff] }
  0x5f   :  { %v1317_v46 = vmax.f32 %v1061_v53, 0.0  ;;  %v1064_v49 = vadd.f32 %v1967_v13, %v640_v43  ;;  %v642_v12 = vmul.f32 %v1983_v42, %v218_v15  ;;  %v1065_v30 = vadd.f32 %v1977_v35, %v641_v8 }
  0x60   :  { %1572 = vst [vmem:[%s3765_s3 + $0x230] sm:$0xff] %v1316_v38  ;;  %v1318_v31 = vmax.f32 %v1062_v18, 0.0  ;;  %v643_v61 = vmul.f32 %v2001_v57, %v219_v9  ;;  %v220_v14 = vunpack.c.l.bf16 %v53_v54  ;;  %v1319_v52 = vmax.f32 %v1063_v2, 0.0  ;;  %v56_v9 = vld [vmem:[%s3762_s0 + $0x150] sm:$0xff] }
  0x61   :  { %1573 = vst [vmem:[%s3765_s3 + $0x238] sm:$0xff] %v1317_v46  ;;  %v1320_v53 = vmax.f32 %v1064_v49, 0.0  ;;  %v1066_v6 = vadd.f32 %v1989_v47, %v642_v12  ;;  %v221_v43 = vunpack.c.h.bf16 %v53_v54  ;;  %v1321_v15 = vmax.f32 %v1065_v30, 0.0 }
  0x62   :  { %1574 = vst [vmem:[%s3765_s3 + $0x240] sm:$0xff] %v1318_v31  ;;  %v1067_v38 = vadd.f32 %v2005_v58, %v643_v61  ;;  %v644_v18 = vmul.f32 %v2019_v1, %v220_v14  ;;  %v222_v8 = vunpack.c.l.bf16 %v54_v39  ;;  %1575 = vst [vmem:[%s3765_s3 + $0x248] sm:$0xff] %v1319_v52  ;;  %v223_v2 = vunpack.c.h.bf16 %v54_v39  ;;  %v3908_v31 = vld [vmem:[#allocation11_spill] sm:$0xff]  ;;  %v3909_v61 = vld [vmem:[#allocation14_spill] sm:$0xff] }
  0x63   :  { %1576 = vst [vmem:[%s3765_s3 + $0x250] sm:$0xff] %v1320_v53  ;;  %v1322_v54 = vmax.f32 %v1066_v6, 0.0  ;;  %v645_v46 = vmul.f32 %v2041_v20, %v221_v43  ;;  %v224_v49 = vunpack.c.l.bf16 %v55_v21  ;;  %1577 = vst [vmem:[%s3765_s3 + $0x258] sm:$0xff] %v1321_v15  ;;  %v225_v1 = vunpack.c.h.bf16 %v55_v21  ;;  %v3910_v52 = vld [vmem:[#allocation13_spill] sm:$0xff]  ;;  %v3911_v6 = vld [vmem:[#allocation16_spill] sm:$0xff] }
  0x64   :  { %v1323_v12 = vmax.f32 %v1067_v38, 0.0  ;;  %v1068_v30 = vadd.f32 %v3908_v31, %v644_v18  ;;  %v646_v14 = vmul.f32 %v3909_v61, %v222_v8  ;;  %v647_v43 = vmul.f32 %v3911_v6, %v223_v2  ;;  %v3912_v39 = vld [vmem:[#allocation18_spill] sm:$0xff]  ;;  %v57_v15 = vld [vmem:[%s3762_s0 + $0x158] sm:$0xff]  ;;  %v3914_v6 = vld [vmem:[#allocation19_spill] sm:$0xff] }
  0x65   :  { %1578 = vst [vmem:[%s3765_s3 + $0x260] sm:$0xff] %v1322_v54  ;;  %v1069_v53 = vadd.f32 %v3910_v52, %v645_v46  ;;  %v648_v20 = vmul.f32 %v3912_v39, %v224_v49  ;;  %v226_v58 = vunpack.c.l.bf16 %v56_v9  ;;  %v649_v18 = vmul.f32 %v3890_v60, %v225_v1  ;;  %v3913_v46 = vld [vmem:[#allocation17_spill] sm:$0xff]  ;;  %v3915_v39 = vld [vmem:[#allocation22_spill] sm:$0xff]  ;;  %v3917_v1 = vld [vmem:[#allocation23_spill] sm:$0xff] }
  0x66   :  { %1579 = vst [vmem:[%s3765_s3 + $0x268] sm:$0xff] %v1323_v12  ;;  %v1324_v21 = vmax.f32 %v1068_v30, 0.0  ;;  %v1070_v38 = vadd.f32 %v3889_v62, %v646_v14  ;;  %v227_v8 = vunpack.c.h.bf16 %v56_v9  ;;  %v1071_v2 = vadd.f32 %v3913_v46, %v647_v43  ;;  %v58_v61 = vld [vmem:[%s3762_s0 + $0x160] sm:$0xff]  ;;  %v3916_v30 = vld [vmem:[#allocation21_spill] sm:$0xff] }
  0x67   :  { %v1325_v54 = vmax.f32 %v1069_v53, 0.0  ;;  %v1072_v49 = vadd.f32 %v3914_v6, %v648_v20  ;;  %v650_v52 = vmul.f32 %v3915_v39, %v226_v58  ;;  %v1073_v14 = vadd.f32 %v3916_v30, %v649_v18  ;;  %v59_v20 = vld [vmem:[%s3762_s0 + $0x168] sm:$0xff] }
  0x68   :  { %1580 = vst [vmem:[%s3765_s3 + $0x270] sm:$0xff] %v1324_v21  ;;  %v1326_v12 = vmax.f32 %v1070_v38, 0.0  ;;  %v651_v9 = vmul.f32 %v3917_v1, %v227_v8  ;;  %v228_v53 = vunpack.c.l.bf16 %v57_v15  ;;  %v1327_v58 = vmax.f32 %v1071_v2, 0.0  ;;  %v60_v1 = vld [vmem:[%s3762_s0 + $0x170] sm:$0xff] }
  0x69   :  { %1581 = vst [vmem:[%s3765_s3 + $0x278] sm:$0xff] %v1325_v54  ;;  %v1328_v43 = vmax.f32 %v1072_v49, 0.0  ;;  %v1074_v39 = vadd.f32 %v2120_v56, %v650_v52  ;;  %v229_v6 = vunpack.c.h.bf16 %v57_v15  ;;  %v1329_v21 = vmax.f32 %v1073_v14, 0.0  ;;  %v3918_v14 = vld [vmem:[#allocation28_spill] sm:$0xff] }
  0x6a   :  { %1582 = vst [vmem:[%s3765_s3 + $0x280] sm:$0xff] %v1326_v12  ;;  %v1075_v38 = vadd.f32 %v3896_v17, %v651_v9  ;;  %v652_v18 = vmul.f32 %v3897_v16, %v228_v53  ;;  %v230_v8 = vunpack.c.l.bf16 %v58_v61  ;;  %1583 = vst [vmem:[%s3765_s3 + $0x288] sm:$0xff] %v1327_v58  ;;  %v231_v54 = vunpack.c.h.bf16 %v58_v61  ;;  %v3919_v58 = vld [vmem:[#allocation27_spill] sm:$0xff]  ;;  %v3921_v61 = vld [vmem:[#allocation32_spill] sm:$0xff] }
  0x6b   :  { %1584 = vst [vmem:[%s3765_s3 + $0x290] sm:$0xff] %v1328_v43  ;;  %v1330_v52 = vmax.f32 %v1074_v39, 0.0  ;;  %v653_v15 = vmul.f32 %v2164_v55, %v229_v6  ;;  %v232_v2 = vunpack.c.l.bf16 %v59_v20  ;;  %1585 = vst [vmem:[%s3765_s3 + $0x298] sm:$0xff] %v1329_v21  ;;  %v233_v53 = vunpack.c.h.bf16 %v59_v20  ;;  %v3920_v43 = vld [vmem:[#allocation30_spill] sm:$0xff]  ;;  %v61_v21 = vld [vmem:[%s3762_s0 + $0x178] sm:$0xff] }
  0x6c   :  { %v1331_v49 = vmax.f32 %v1075_v38, 0.0  ;;  %v1076_v12 = vadd.f32 %v2149_v48, %v652_v18  ;;  %v654_v9 = vmul.f32 %v3918_v14, %v230_v8  ;;  %v655_v6 = vmul.f32 %v3920_v43, %v231_v54  ;;  %v3923_v43 = vld [vmem:[#allocation33_spill] sm:$0xff]  ;;  %v62_v14 = vld [vmem:[%s3762_s0 + $0x180] sm:$0xff] }
  0x6d   :  { %1586 = vst [vmem:[%s3765_s3 + $0x2a0] sm:$0xff] %v1330_v52  ;;  %v1077_v39 = vadd.f32 %v3919_v58, %v653_v15  ;;  %v656_v55 = vmul.f32 %v3921_v61, %v232_v2  ;;  %v234_v16 = vunpack.c.l.bf16 %v60_v1  ;;  %v657_v18 = vmul.f32 %v2222_v51, %v233_v53  ;;  %v3922_v15 = vld [vmem:[#allocation31_spill] sm:$0xff]  ;;  %v3926_v53 = vld [vmem:[#allocation37_spill] sm:$0xff] }
  0x6e   :  { %1587 = vst [vmem:[%s3765_s3 + $0x2a8] sm:$0xff] %v1331_v49  ;;  %v1332_v20 = vmax.f32 %v1076_v12, 0.0  ;;  %v1078_v38 = vadd.f32 %v3900_v36, %v654_v9  ;;  %v235_v8 = vunpack.c.h.bf16 %v60_v1  ;;  %v1079_v54 = vadd.f32 %v3922_v15, %v655_v6  ;;  %v3924_v61 = vld [vmem:[#allocation35_spill] sm:$0xff]  ;;  %v3925_v12 = vld [vmem:[#allocation34_spill] sm:$0xff] }
  0x6f   :  { %v1333_v52 = vmax.f32 %v1077_v39, 0.0  ;;  %v1080_v2 = vadd.f32 %v3923_v43, %v656_v55  ;;  %v658_v58 = vmul.f32 %v3924_v61, %v234_v16  ;;  %v1081_v9 = vadd.f32 %v3925_v12, %v657_v18  ;;  %v63_v55 = vld [vmem:[%s3762_s0 + $0x188] sm:$0xff] }
  0x70   :  { %1588 = vst [vmem:[%s3765_s3 + $0x2b0] sm:$0xff] %v1332_v20  ;;  %v1334_v49 = vmax.f32 %v1078_v38, 0.0  ;;  %v659_v1 = vmul.f32 %v3926_v53, %v235_v8  ;;  %v236_v39 = vunpack.c.l.bf16 %v61_v21  ;;  %v1335_v16 = vmax.f32 %v1079_v54, 0.0  ;;  %v64_v53 = vld [vmem:[%s3762_s0 + $0x190] sm:$0xff] }
  0x71   :  { %1589 = vst [vmem:[%s3765_s3 + $0x2b8] sm:$0xff] %v1333_v52  ;;  %v1336_v6 = vmax.f32 %v1080_v2, 0.0  ;;  %v1082_v61 = vadd.f32 %v3904_v59, %v658_v58  ;;  %v237_v43 = vunpack.c.h.bf16 %v61_v21  ;;  %v1337_v20 = vmax.f32 %v1081_v9, 0.0 }
  0x72   :  { %1590 = vst [vmem:[%s3765_s3 + $0x2c0] sm:$0xff] %v1334_v49  ;;  %v1083_v38 = vadd.f32 %v3905_v40, %v659_v1  ;;  %v660_v18 = vmul.f32 %v3906_v44, %v236_v39  ;;  %v238_v8 = vunpack.c.l.bf16 %v62_v14  ;;  %1591 = vst [vmem:[%s3765_s3 + $0x2c8] sm:$0xff] %v1335_v16  ;;  %v239_v52 = vunpack.c.h.bf16 %v62_v14  ;;  %v65_v16 = vld [vmem:[%s3762_s0 + $0x198] sm:$0xff] }
  0x73   :  { %1592 = vst [vmem:[%s3765_s3 + $0x2d0] sm:$0xff] %v1336_v6  ;;  %v1338_v58 = vmax.f32 %v1082_v61, 0.0  ;;  %v661_v21 = vmul.f32 %v2283_v11, %v237_v43  ;;  %v240_v54 = vunpack.c.l.bf16 %v63_v55  ;;  %1593 = vst [vmem:[%s3765_s3 + $0x2d8] sm:$0xff] %v1337_v20  ;;  %v241_v1 = vunpack.c.h.bf16 %v63_v55 }
  0x74   :  { %v1339_v2 = vmax.f32 %v1083_v38, 0.0  ;;  %v1084_v49 = vadd.f32 %v2275_v19, %v660_v18  ;;  %v662_v9 = vmul.f32 %v1823_v22, %v238_v8  ;;  %v663_v43 = vmul.f32 %v1831_v24, %v239_v52  ;;  %v66_v52 = vld [vmem:[%s3762_s0 + $0x1a0] sm:$0xff] }
  0x75   :  { %1594 = vst [vmem:[%s3765_s3 + $0x2e0] sm:$0xff] %v1338_v58  ;;  %v1085_v61 = vadd.f32 %v2292_v50, %v661_v21  ;;  %v664_v14 = vmul.f32 %v1839_v26, %v240_v54  ;;  %v242_v39 = vunpack.c.l.bf16 %v64_v53  ;;  %v665_v20 = vmul.f32 %v1847_v28, %v241_v1  ;;  %v67_v1 = vld [vmem:[%s3762_s0 + $0x1a8] sm:$0xff] }
  0x76   :  { %1595 = vst [vmem:[%s3765_s3 + $0x2e8] sm:$0xff] %v1339_v2  ;;  %v1340_v55 = vmax.f32 %v1084_v49, 0.0  ;;  %v1086_v6 = vadd.f32 %v1827_v23, %v662_v9  ;;  %v243_v38 = vunpack.c.h.bf16 %v64_v53  ;;  %v1087_v8 = vadd.f32 %v1835_v25, %v663_v43  ;;  %v3927_v49 = vld [vmem:[#allocation2_spill] sm:$0xff] }
  0x77   :  { %v1341_v18 = vmax.f32 %v1085_v61, 0.0  ;;  %v1088_v58 = vadd.f32 %v1843_v27, %v664_v14  ;;  %v666_v21 = vmul.f32 %v1857_v32, %v242_v39  ;;  %v1089_v2 = vadd.f32 %v1851_v29, %v665_v20 }
  0x78   :  { %1596 = vst [vmem:[%s3765_s3 + $0x2f0] sm:$0xff] %v1340_v55  ;;  %v1342_v54 = vmax.f32 %v1086_v6, 0.0  ;;  %v667_v53 = vmul.f32 %v3927_v49, %v243_v38  ;;  %v244_v9 = vunpack.c.l.bf16 %v65_v16  ;;  %v1343_v61 = vmax.f32 %v1087_v8, 0.0  ;;  %v68_v49 = vld [vmem:[%s3762_s0 + $0x1b0] sm:$0xff] }
  0x79   :  { %1597 = vst [vmem:[%s3765_s3 + $0x2f8] sm:$0xff] %v1341_v18  ;;  %v1344_v43 = vmax.f32 %v1088_v58, 0.0  ;;  %v1090_v14 = vadd.f32 %v1861_v33, %v666_v21  ;;  %v245_v39 = vunpack.c.h.bf16 %v65_v16  ;;  %v1345_v55 = vmax.f32 %v1089_v2, 0.0 }
  0x7a   :  { %1598 = vst [vmem:[%s3765_s3 + $0x300] sm:$0xff] %v1342_v54  ;;  %v1091_v6 = vadd.f32 %v1871_v37, %v667_v53  ;;  %v668_v20 = vmul.f32 %v1878_v41, %v244_v9  ;;  %v246_v38 = vunpack.c.l.bf16 %v66_v52  ;;  %1599 = vst [vmem:[%s3765_s3 + $0x308] sm:$0xff] %v1343_v61  ;;  %v247_v8 = vunpack.c.h.bf16 %v66_v52 }
  0x7b   :  { %1600 = vst [vmem:[%s3765_s3 + $0x310] sm:$0xff] %v1344_v43  ;;  %v1346_v16 = vmax.f32 %v1090_v14, 0.0  ;;  %v669_v18 = vmul.f32 %v1935_v3, %v245_v39  ;;  %v248_v58 = vunpack.c.l.bf16 %v67_v1  ;;  %1601 = vst [vmem:[%s3765_s3 + $0x318] sm:$0xff] %v1345_v55  ;;  %v249_v53 = vunpack.c.h.bf16 %v67_v1  ;;  %v69_v14 = vld [vmem:[%s3762_s0 + $0x1b8] sm:$0xff] }
  0x7c   :  { %v1347_v21 = vmax.f32 %v1091_v6, 0.0  ;;  %v1092_v54 = vadd.f32 %v1885_v45, %v668_v20  ;;  %v670_v2 = vmul.f32 %v1924_v63, %v246_v38  ;;  %v671_v61 = vmul.f32 %v1943_v5, %v247_v8  ;;  %v70_v8 = vld [vmem:[%s3762_s0 + $0x1c0] sm:$0xff] }
  0x7d   :  { %1602 = vst [vmem:[%s3765_s3 + $0x320] sm:$0xff] %v1346_v16  ;;  %v1093_v9 = vadd.f32 %v1939_v4, %v669_v18  ;;  %v672_v52 = vmul.f32 %v1955_v10, %v248_v58  ;;  %v250_v43 = vunpack.c.l.bf16 %v68_v49  ;;  %v673_v55 = vmul.f32 %v1973_v34, %v249_v53 }
  0x7e   :  { %1603 = vst [vmem:[%s3765_s3 + $0x328] sm:$0xff] %v1347_v21  ;;  %v1348_v1 = vmax.f32 %v1092_v54, 0.0  ;;  %v1094_v39 = vadd.f32 %v1928_v0, %v670_v2  ;;  %v251_v6 = vunpack.c.h.bf16 %v68_v49  ;;  %v1095_v38 = vadd.f32 %v1951_v7, %v671_v61  ;;  %v71_v2 = vld [vmem:[%s3762_s0 + $0x1c8] sm:$0xff] }
  0x7f   :  { %v1349_v20 = vmax.f32 %v1093_v9, 0.0  ;;  %v1096_v16 = vadd.f32 %v1967_v13, %v672_v52  ;;  %v674_v18 = vmul.f32 %v1983_v42, %v250_v43  ;;  %v1097_v21 = vadd.f32 %v1977_v35, %v673_v55  ;;  %v3929_v55 = vld [vmem:[#allocation10_spill] sm:$0xff]  ;;  %v72_v35 = vld [vmem:[%s3762_s0 + $0x1d0] sm:$0xff] }
  0x80   :  { %1604 = vst [vmem:[%s3765_s3 + $0x330] sm:$0xff] %v1348_v1  ;;  %v1350_v58 = vmax.f32 %v1094_v39, 0.0  ;;  %v675_v49 = vmul.f32 %v2001_v57, %v251_v6  ;;  %v252_v54 = vunpack.c.l.bf16 %v69_v14  ;;  %v1351_v53 = vmax.f32 %v1095_v38, 0.0  ;;  %v3928_v1 = vld [vmem:[#allocation9_spill] sm:$0xff] }
  0x81   :  { %1605 = vst [vmem:[%s3765_s3 + $0x338] sm:$0xff] %v1349_v20  ;;  %v1352_v9 = vmax.f32 %v1096_v16, 0.0  ;;  %v1098_v61 = vadd.f32 %v1989_v47, %v674_v18  ;;  %v253_v52 = vunpack.c.h.bf16 %v69_v14  ;;  %v1353_v43 = vmax.f32 %v1097_v21, 0.0  ;;  %v3930_v20 = vld [vmem:[#allocation12_spill] sm:$0xff] }
  0x82   :  { %1606 = vst [vmem:[%s3765_s3 + $0x340] sm:$0xff] %v1350_v58  ;;  %v1099_v39 = vadd.f32 %v3928_v1, %v675_v49  ;;  %v676_v6 = vmul.f32 %v3929_v55, %v252_v54  ;;  %v254_v57 = vunpack.c.l.bf16 %v70_v8  ;;  %1607 = vst [vmem:[%s3765_s3 + $0x348] sm:$0xff] %v1351_v53  ;;  %v255_v16 = vunpack.c.h.bf16 %v70_v8  ;;  %v3931_v49 = vld [vmem:[#allocation14_spill] sm:$0xff]  ;;  %v3932_v53 = vld [vmem:[#allocation13_spill] sm:$0xff] }
  0x83   :  { %1608 = vst [vmem:[%s3765_s3 + $0x350] sm:$0xff] %v1352_v9  ;;  %v1354_v14 = vmax.f32 %v1098_v61, 0.0  ;;  %v677_v38 = vmul.f32 %v3930_v20, %v253_v52  ;;  %v256_v18 = vunpack.c.l.bf16 %v71_v2  ;;  %1609 = vst [vmem:[%s3765_s3 + $0x358] sm:$0xff] %v1353_v43  ;;  %v257_v55 = vunpack.c.h.bf16 %v71_v2  ;;  %v3933_v61 = vld [vmem:[#allocation16_spill] sm:$0xff]  ;;  %v3934_v8 = vld [vmem:[#allocation18_spill] sm:$0xff] }
  0x84   :  { %v1355_v58 = vmax.f32 %v1099_v39, 0.0  ;;  %v1100_v21 = vadd.f32 %v3908_v31, %v676_v6  ;;  %v678_v54 = vmul.f32 %v3931_v49, %v254_v57  ;;  %v679_v52 = vmul.f32 %v3933_v61, %v255_v16  ;;  %v73_v43 = vld [vmem:[%s3762_s0 + $0x1d8] sm:$0xff]  ;;  %v3935_v16 = vld [vmem:[#allocation19_spill] sm:$0xff] }
  0x85   :  { %1610 = vst [vmem:[%s3765_s3 + $0x360] sm:$0xff] %v1354_v14  ;;  %v1101_v9 = vadd.f32 %v3932_v53, %v677_v38  ;;  %v680_v20 = vmul.f32 %v3934_v8, %v256_v18  ;;  %v258_v1 = vunpack.c.l.bf16 %v72_v35  ;;  %v681_v39 = vmul.f32 %v3890_v60, %v257_v55  ;;  %v3936_v8 = vld [vmem:[#allocation22_spill] sm:$0xff]  ;;  %v3937_v55 = vld [vmem:[#allocation23_spill] sm:$0xff] }
  0x86   :  { %1611 = vst [vmem:[%s3765_s3 + $0x368] sm:$0xff] %v1355_v58  ;;  %v1356_v57 = vmax.f32 %v1100_v21, 0.0  ;;  %v1102_v2 = vadd.f32 %v3889_v62, %v678_v54  ;;  %v259_v6 = vunpack.c.h.bf16 %v72_v35  ;;  %v1103_v38 = vadd.f32 %v3913_v46, %v679_v52  ;;  %v74_v53 = vld [vmem:[%s3762_s0 + $0x1e0] sm:$0xff] }
  0x87   :  { %v1357_v14 = vmax.f32 %v1101_v9, 0.0  ;;  %v1104_v18 = vadd.f32 %v3935_v16, %v680_v20  ;;  %v682_v61 = vmul.f32 %v3936_v8, %v258_v1  ;;  %v1105_v21 = vadd.f32 %v3916_v30, %v681_v39  ;;  %v75_v20 = vld [vmem:[%s3762_s0 + $0x1e8] sm:$0xff]  ;;  %v3938_v39 = vld [vmem:[#allocation25_spill] sm:$0xff]  ;;  %v76_v30 = vld [vmem:[%s3762_s0 + $0x1f0] sm:$0xff] }
  0x88   :  { %1612 = vst [vmem:[%s3765_s3 + $0x370] sm:$0xff] %v1356_v57  ;;  %v1358_v58 = vmax.f32 %v1102_v2, 0.0  ;;  %v683_v35 = vmul.f32 %v3937_v55, %v259_v6  ;;  %v260_v54 = vunpack.c.l.bf16 %v73_v43  ;;  %v1359_v1 = vmax.f32 %v1103_v38, 0.0 }
  0x89   :  { %1613 = vst [vmem:[%s3765_s3 + $0x378] sm:$0xff] %v1357_v14  ;;  %v1360_v9 = vmax.f32 %v1104_v18, 0.0  ;;  %v1106_v52 = vadd.f32 %v2120_v56, %v682_v61  ;;  %v261_v8 = vunpack.c.h.bf16 %v73_v43  ;;  %v1361_v57 = vmax.f32 %v1105_v21, 0.0  ;;  %v3939_v43 = vld [vmem:[#allocation26_spill] sm:$0xff] }
  0x8a   :  { %1614 = vst [vmem:[%s3765_s3 + $0x380] sm:$0xff] %v1358_v58  ;;  %v1107_v2 = vadd.f32 %v3896_v17, %v683_v35  ;;  %v684_v6 = vmul.f32 %v3938_v39, %v260_v54  ;;  %v262_v55 = vunpack.c.l.bf16 %v74_v53  ;;  %1615 = vst [vmem:[%s3765_s3 + $0x388] sm:$0xff] %v1359_v1  ;;  %v263_v38 = vunpack.c.h.bf16 %v74_v53  ;;  %v3940_v35 = vld [vmem:[#allocation28_spill] sm:$0xff]  ;;  %v3941_v1 = vld [vmem:[#allocation27_spill] sm:$0xff] }
  0x8b   :  { %1616 = vst [vmem:[%s3765_s3 + $0x390] sm:$0xff] %v1360_v9  ;;  %v1362_v61 = vmax.f32 %v1106_v52, 0.0  ;;  %v685_v14 = vmul.f32 %v3939_v43, %v261_v8  ;;  %v264_v18 = vunpack.c.l.bf16 %v75_v20  ;;  %1617 = vst [vmem:[%s3765_s3 + $0x398] sm:$0xff] %v1361_v57  ;;  %v265_v39 = vunpack.c.h.bf16 %v75_v20  ;;  %v3942_v52 = vld [vmem:[#allocation30_spill] sm:$0xff]  ;;  %v3943_v53 = vld [vmem:[#allocation32_spill] sm:$0xff] }
  0x8c   :  { %v1363_v58 = vmax.f32 %v1107_v2, 0.0  ;;  %v1108_v21 = vadd.f32 %v2149_v48, %v684_v6  ;;  %v686_v54 = vmul.f32 %v3940_v35, %v262_v55  ;;  %v687_v8 = vmul.f32 %v3942_v52, %v263_v38  ;;  %v77_v57 = vld [vmem:[%s3762_s0 + $0x1f8] sm:$0xff] }
  0x8d   :  { %1618 = vst [vmem:[%s3765_s3 + $0x3a0] sm:$0xff] %v1362_v61  ;;  %v1109_v9 = vadd.f32 %v3941_v1, %v685_v14  ;;  %v688_v43 = vmul.f32 %v3943_v53, %v264_v18  ;;  %v266_v17 = vunpack.c.l.bf16 %v76_v30  ;;  %v689_v2 = vmul.f32 %v2222_v51, %v265_v39  ;;  %v3944_v38 = vld [vmem:[#allocation33_spill] sm:$0xff]  ;;  %v3945_v53 = vld [vmem:[#allocation35_spill] sm:$0xff]  ;;  %v78_v1 = vld [vmem:[%s3762_s0 + $0x200] sm:$0xff] }
  0x8e   :  { %1619 = vst [vmem:[%s3765_s3 + $0x3a8] sm:$0xff] %v1363_v58  ;;  %v1364_v55 = vmax.f32 %v1108_v21, 0.0  ;;  %v1110_v20 = vadd.f32 %v3900_v36, %v686_v54  ;;  %v267_v6 = vunpack.c.h.bf16 %v76_v30  ;;  %v1111_v14 = vadd.f32 %v3922_v15, %v687_v8  ;;  %v3946_v39 = vld [vmem:[#allocation37_spill] sm:$0xff] }
  0x8f   :  { %v1365_v61 = vmax.f32 %v1109_v9, 0.0  ;;  %v1112_v18 = vadd.f32 %v3944_v38, %v688_v43  ;;  %v690_v52 = vmul.f32 %v3945_v53, %v266_v17  ;;  %v1113_v21 = vadd.f32 %v3925_v12, %v689_v2  ;;  %v79_v43 = vld [vmem:[%s3762_s0 + $0x208] sm:$0xff] }
  0x90   :  { %1620 = vst [vmem:[%s3765_s3 + $0x3b0] sm:$0xff] %v1364_v55  ;;  %v1366_v58 = vmax.f32 %v1110_v20, 0.0  ;;  %v691_v30 = vmul.f32 %v3946_v39, %v267_v6  ;;  %v268_v54 = vunpack.c.l.bf16 %v77_v57  ;;  %v1367_v17 = vmax.f32 %v1111_v14, 0.0  ;;  %v80_v39 = vld [vmem:[%s3762_s0 + $0x210] sm:$0xff] }
  0x91   :  { %1621 = vst [vmem:[%s3765_s3 + $0x3b8] sm:$0xff] %v1365_v61  ;;  %v1368_v9 = vmax.f32 %v1112_v18, 0.0  ;;  %v1114_v8 = vadd.f32 %v3904_v59, %v690_v52  ;;  %v269_v53 = vunpack.c.h.bf16 %v77_v57  ;;  %v1369_v55 = vmax.f32 %v1113_v21, 0.0 }
  0x92   :  { %1622 = vst [vmem:[%s3765_s3 + $0x3c0] sm:$0xff] %v1366_v58  ;;  %v1115_v20 = vadd.f32 %v3905_v40, %v691_v30  ;;  %v692_v2 = vmul.f32 %v3906_v44, %v268_v54  ;;  %v270_v6 = vunpack.c.l.bf16 %v78_v1  ;;  %1623 = vst [vmem:[%s3765_s3 + $0x3c8] sm:$0xff] %v1367_v17  ;;  %v271_v61 = vunpack.c.h.bf16 %v78_v1 }
  0x93   :  { %1624 = vst [vmem:[%s3765_s3 + $0x3d0] sm:$0xff] %v1368_v9  ;;  %v1370_v52 = vmax.f32 %v1114_v8, 0.0  ;;  %v693_v57 = vmul.f32 %v2283_v11, %v269_v53  ;;  %v272_v14 = vunpack.c.l.bf16 %v79_v43  ;;  %1625 = vst [vmem:[%s3765_s3 + $0x3d8] sm:$0xff] %v1369_v55  ;;  %v273_v30 = vunpack.c.h.bf16 %v79_v43  ;;  %v81_v9 = vld [vmem:[%s3762_s0 + $0x218] sm:$0xff] }
  0x94   :  { %v1371_v18 = vmax.f32 %v1115_v20, 0.0  ;;  %v1116_v58 = vadd.f32 %v2275_v19, %v692_v2  ;;  %v694_v21 = vmul.f32 %v1823_v22, %v270_v6  ;;  %v695_v53 = vmul.f32 %v1831_v24, %v271_v61  ;;  %v82_v61 = vld [vmem:[%s3762_s0 + $0x220] sm:$0xff] }
  0x95   :  { %1626 = vst [vmem:[%s3765_s3 + $0x3e0] sm:$0xff] %v1370_v52  ;;  %v1117_v54 = vadd.f32 %v2292_v50, %v693_v57  ;;  %v696_v1 = vmul.f32 %v1839_v26, %v272_v14  ;;  %v274_v17 = vunpack.c.l.bf16 %v80_v39  ;;  %v697_v55 = vmul.f32 %v1847_v28, %v273_v30  ;;  %v83_v30 = vld [vmem:[%s3762_s0 + $0x228] sm:$0xff] }
  0x96   :  { %1627 = vst [vmem:[%s3765_s3 + $0x3e8] sm:$0xff] %v1371_v18  ;;  %v1372_v43 = vmax.f32 %v1116_v58, 0.0  ;;  %v1118_v8 = vadd.f32 %v1827_v23, %v694_v21  ;;  %v275_v20 = vunpack.c.h.bf16 %v80_v39  ;;  %v1119_v6 = vadd.f32 %v1835_v25, %v695_v53  ;;  %v3947_v58 = vld [vmem:[#allocation2_spill] sm:$0xff] }
  0x97   :  { %v1373_v2 = vmax.f32 %v1117_v54, 0.0  ;;  %v1120_v52 = vadd.f32 %v1843_v27, %v696_v1  ;;  %v698_v57 = vmul.f32 %v1857_v32, %v274_v17  ;;  %v1121_v18 = vadd.f32 %v1851_v29, %v697_v55 }
  0x98   :  { %1628 = vst [vmem:[%s3765_s3 + $0x3f0] sm:$0xff] %v1372_v43  ;;  %v1374_v14 = vmax.f32 %v1118_v8, 0.0  ;;  %v699_v39 = vmul.f32 %v3947_v58, %v275_v20  ;;  %v276_v21 = vunpack.c.l.bf16 %v81_v9  ;;  %v1375_v54 = vmax.f32 %v1119_v6, 0.0  ;;  %v84_v58 = vld [vmem:[%s3762_s0 + $0x230] sm:$0xff] }
  0x99   :  { %1629 = vst [vmem:[%s3765_s3 + $0x3f8] sm:$0xff] %v1373_v2  ;;  %v1376_v53 = vmax.f32 %v1120_v52, 0.0  ;;  %v1122_v1 = vadd.f32 %v1861_v33, %v698_v57  ;;  %v277_v17 = vunpack.c.h.bf16 %v81_v9  ;;  %v1377_v43 = vmax.f32 %v1121_v18, 0.0 }
  0x9a   :  { %1630 = vst [vmem:[%s3765_s3 + $0x400] sm:$0xff] %v1374_v14  ;;  %v1123_v8 = vadd.f32 %v1871_v37, %v699_v39  ;;  %v700_v55 = vmul.f32 %v1878_v41, %v276_v21  ;;  %v278_v20 = vunpack.c.l.bf16 %v82_v61  ;;  %1631 = vst [vmem:[%s3765_s3 + $0x408] sm:$0xff] %v1375_v54  ;;  %v279_v6 = vunpack.c.h.bf16 %v82_v61 }
  0x9b   :  { %1632 = vst [vmem:[%s3765_s3 + $0x410] sm:$0xff] %v1376_v53  ;;  %v1378_v9 = vmax.f32 %v1122_v1, 0.0  ;;  %v701_v2 = vmul.f32 %v1935_v3, %v277_v17  ;;  %v280_v52 = vunpack.c.l.bf16 %v83_v30  ;;  %1633 = vst [vmem:[%s3765_s3 + $0x418] sm:$0xff] %v1377_v43  ;;  %v281_v39 = vunpack.c.h.bf16 %v83_v30  ;;  %v85_v1 = vld [vmem:[%s3762_s0 + $0x238] sm:$0xff] }
  0x9c   :  { %v1379_v57 = vmax.f32 %v1123_v8, 0.0  ;;  %v1124_v14 = vadd.f32 %v1885_v45, %v700_v55  ;;  %v702_v18 = vmul.f32 %v1924_v63, %v278_v20  ;;  %v703_v54 = vmul.f32 %v1943_v5, %v279_v6  ;;  %v86_v6 = vld [vmem:[%s3762_s0 + $0x240] sm:$0xff] }
  0x9d   :  { %1634 = vst [vmem:[%s3765_s3 + $0x420] sm:$0xff] %v1378_v9  ;;  %v1125_v21 = vadd.f32 %v1939_v4, %v701_v2  ;;  %v704_v61 = vmul.f32 %v1955_v10, %v280_v52  ;;  %v282_v53 = vunpack.c.l.bf16 %v84_v58  ;;  %v705_v43 = vmul.f32 %v1973_v34, %v281_v39 }
  0x9e   :  { %1635 = vst [vmem:[%s3765_s3 + $0x428] sm:$0xff] %v1379_v57  ;;  %v1380_v30 = vmax.f32 %v1124_v14, 0.0  ;;  %v1126_v17 = vadd.f32 %v1928_v0, %v702_v18  ;;  %v283_v8 = vunpack.c.h.bf16 %v84_v58  ;;  %v1127_v20 = vadd.f32 %v1951_v7, %v703_v54  ;;  %v3948_v57 = vld [vmem:[#allocation6_spill] sm:$0xff]  ;;  %v3949_v18 = vld [vmem:[#allocation8_spill] sm:$0xff] }
  0x9f   :  { %v1381_v55 = vmax.f32 %v1125_v21, 0.0  ;;  %v1128_v9 = vadd.f32 %v1967_v13, %v704_v61  ;;  %v706_v2 = vmul.f32 %v1983_v42, %v282_v53  ;;  %v1129_v14 = vadd.f32 %v3948_v57, %v705_v43  ;;  %v87_v21 = vld [vmem:[%s3762_s0 + $0x248] sm:$0xff]  ;;  %v88_v13 = vld [vmem:[%s3762_s0 + $0x250] sm:$0xff] }
  0xa0   :  { %1636 = vst [vmem:[%s3765_s3 + $0x430] sm:$0xff] %v1380_v30  ;;  %v1382_v52 = vmax.f32 %v1126_v17, 0.0  ;;  %v707_v58 = vmul.f32 %v3949_v18, %v283_v8  ;;  %v284_v39 = vunpack.c.l.bf16 %v85_v1  ;;  %v1383_v54 = vmax.f32 %v1127_v20, 0.0  ;;  %v3950_v17 = vld [vmem:[#allocation9_spill] sm:$0xff]  ;;  %v3951_v8 = vld [vmem:[#allocation10_spill] sm:$0xff] }
  0xa1   :  { %1637 = vst [vmem:[%s3765_s3 + $0x438] sm:$0xff] %v1381_v55  ;;  %v1384_v61 = vmax.f32 %v1128_v9, 0.0  ;;  %v1130_v53 = vadd.f32 %v1989_v47, %v706_v2  ;;  %v285_v42 = vunpack.c.h.bf16 %v85_v1  ;;  %v1385_v30 = vmax.f32 %v1129_v14, 0.0  ;;  %v3952_v55 = vld [vmem:[#allocation12_spill] sm:$0xff] }
  0xa2   :  { %1638 = vst [vmem:[%s3765_s3 + $0x440] sm:$0xff] %v1382_v52  ;;  %v1131_v43 = vadd.f32 %v3950_v17, %v707_v58  ;;  %v708_v18 = vmul.f32 %v3951_v8, %v284_v39  ;;  %v286_v57 = vunpack.c.l.bf16 %v86_v6  ;;  %1639 = vst [vmem:[%s3765_s3 + $0x448] sm:$0xff] %v1383_v54  ;;  %v287_v9 = vunpack.c.h.bf16 %v86_v6  ;;  %v3953_v54 = vld [vmem:[#allocation13_spill] sm:$0xff]  ;;  %v3955_v6 = vld [vmem:[#allocation18_spill] sm:$0xff] }
  0xa3   :  { %1640 = vst [vmem:[%s3765_s3 + $0x450] sm:$0xff] %v1384_v61  ;;  %v1386_v1 = vmax.f32 %v1130_v53, 0.0  ;;  %v709_v20 = vmul.f32 %v3952_v55, %v285_v42  ;;  %v288_v2 = vunpack.c.l.bf16 %v87_v21  ;;  %1641 = vst [vmem:[%s3765_s3 + $0x458] sm:$0xff] %v1385_v30  ;;  %v289_v39 = vunpack.c.h.bf16 %v87_v21  ;;  %v3954_v53 = vld [vmem:[#allocation16_spill] sm:$0xff]  ;;  %v89_v30 = vld [vmem:[%s3762_s0 + $0x258] sm:$0xff] }
  0xa4   :  { %v1387_v52 = vmax.f32 %v1131_v43, 0.0  ;;  %v1132_v14 = vadd.f32 %v3908_v31, %v708_v18  ;;  %v710_v58 = vmul.f32 %v3931_v49, %v286_v57  ;;  %v711_v42 = vmul.f32 %v3954_v53, %v287_v9  ;;  %v90_v53 = vld [vmem:[%s3762_s0 + $0x260] sm:$0xff] }
  0xa5   :  { %1642 = vst [vmem:[%s3765_s3 + $0x460] sm:$0xff] %v1386_v1  ;;  %v1133_v61 = vadd.f32 %v3953_v54, %v709_v20  ;;  %v712_v55 = vmul.f32 %v3955_v6, %v288_v2  ;;  %v290_v8 = vunpack.c.l.bf16 %v88_v13  ;;  %v713_v21 = vmul.f32 %v3890_v60, %v289_v39  ;;  %v3956_v2 = vld [vmem:[#allocation22_spill] sm:$0xff]  ;;  %v3958_v39 = vld [vmem:[#allocation23_spill] sm:$0xff] }
  0xa6   :  { %1643 = vst [vmem:[%s3765_s3 + $0x468] sm:$0xff] %v1387_v52  ;;  %v1388_v57 = vmax.f32 %v1132_v14, 0.0  ;;  %v1134_v18 = vadd.f32 %v3889_v62, %v710_v58  ;;  %v291_v43 = vunpack.c.h.bf16 %v88_v13  ;;  %v1135_v20 = vadd.f32 %v3913_v46, %v711_v42  ;;  %v3957_v14 = vld [vmem:[#allocation21_spill] sm:$0xff]  ;;  %v92_v46 = vld [vmem:[%s3762_s0 + $0x270] sm:$0xff] }
  0xa7   :  { %v1389_v1 = vmax.f32 %v1133_v61, 0.0  ;;  %v1136_v9 = vadd.f32 %v3935_v16, %v712_v55  ;;  %v714_v6 = vmul.f32 %v3956_v2, %v290_v8  ;;  %v1137_v58 = vadd.f32 %v3957_v14, %v713_v21  ;;  %v91_v55 = vld [vmem:[%s3762_s0 + $0x268] sm:$0xff] }
  0xa8   :  { %1644 = vst [vmem:[%s3765_s3 + $0x470] sm:$0xff] %v1388_v57  ;;  %v1390_v52 = vmax.f32 %v1134_v18, 0.0  ;;  %v715_v13 = vmul.f32 %v3958_v39, %v291_v43  ;;  %v292_v61 = vunpack.c.l.bf16 %v89_v30  ;;  %v1391_v8 = vmax.f32 %v1135_v20, 0.0  ;;  %v3959_v18 = vld [vmem:[#allocation24_spill] sm:$0xff]  ;;  %v3960_v43 = vld [vmem:[#allocation25_spill] sm:$0xff] }
  0xa9   :  { %1645 = vst [vmem:[%s3765_s3 + $0x478] sm:$0xff] %v1389_v1  ;;  %v1392_v42 = vmax.f32 %v1136_v9, 0.0  ;;  %v1138_v2 = vadd.f32 %v2120_v56, %v714_v6  ;;  %v293_v16 = vunpack.c.h.bf16 %v89_v30  ;;  %v1393_v57 = vmax.f32 %v1137_v58, 0.0  ;;  %v3961_v30 = vld [vmem:[#allocation26_spill] sm:$0xff] }
  0xaa   :  { %1646 = vst [vmem:[%s3765_s3 + $0x480] sm:$0xff] %v1390_v52  ;;  %v1139_v21 = vadd.f32 %v3959_v18, %v715_v13  ;;  %v716_v39 = vmul.f32 %v3960_v43, %v292_v61  ;;  %v294_v14 = vunpack.c.l.bf16 %v90_v53  ;;  %1647 = vst [vmem:[%s3765_s3 + $0x488] sm:$0xff] %v1391_v8  ;;  %v295_v20 = vunpack.c.h.bf16 %v90_v53  ;;  %v3962_v8 = vld [vmem:[#allocation27_spill] sm:$0xff]  ;;  %v3964_v53 = vld [vmem:[#allocation32_spill] sm:$0xff] }
  0xab   :  { %1648 = vst [vmem:[%s3765_s3 + $0x490] sm:$0xff] %v1392_v42  ;;  %v1394_v6 = vmax.f32 %v1138_v2, 0.0  ;;  %v717_v1 = vmul.f32 %v3961_v30, %v293_v16  ;;  %v296_v9 = vunpack.c.l.bf16 %v91_v55  ;;  %1649 = vst [vmem:[%s3765_s3 + $0x498] sm:$0xff] %v1393_v57  ;;  %v297_v61 = vunpack.c.h.bf16 %v91_v55  ;;  %v3963_v42 = vld [vmem:[#allocation30_spill] sm:$0xff]  ;;  %v93_v57 = vld [vmem:[%s3762_s0 + $0x278] sm:$0xff] }
  0xac   :  { %v1395_v52 = vmax.f32 %v1139_v21, 0.0  ;;  %v1140_v58 = vadd.f32 %v2149_v48, %v716_v39  ;;  %v718_v13 = vmul.f32 %v3940_v35, %v294_v14  ;;  %v719_v16 = vmul.f32 %v3963_v42, %v295_v20  ;;  %v94_v42 = vld [vmem:[%s3762_s0 + $0x280] sm:$0xff] }
  0xad   :  { %1650 = vst [vmem:[%s3765_s3 + $0x4a0] sm:$0xff] %v1394_v6  ;;  %v1141_v2 = vadd.f32 %v3962_v8, %v717_v1  ;;  %v720_v30 = vmul.f32 %v3964_v53, %v296_v9  ;;  %v298_v43 = vunpack.c.l.bf16 %v92_v46  ;;  %v721_v55 = vmul.f32 %v2222_v51, %v297_v61  ;;  %v3965_v9 = vld [vmem:[#allocation35_spill] sm:$0xff] }
  0xae   :  { %1651 = vst [vmem:[%s3765_s3 + $0x4a8] sm:$0xff] %v1395_v52  ;;  %v1396_v14 = vmax.f32 %v1140_v58, 0.0  ;;  %v1142_v39 = vadd.f32 %v3900_v36, %v718_v13  ;;  %v299_v21 = vunpack.c.h.bf16 %v92_v46  ;;  %v1143_v1 = vadd.f32 %v3922_v15, %v719_v16  ;;  %v3966_v13 = vld [vmem:[#allocation37_spill] sm:$0xff] }
  0xaf   :  { %v1397_v6 = vmax.f32 %v1141_v2, 0.0  ;;  %v1144_v20 = vadd.f32 %v3944_v38, %v720_v30  ;;  %v722_v53 = vmul.f32 %v3965_v9, %v298_v43  ;;  %v1145_v58 = vadd.f32 %v3925_v12, %v721_v55  ;;  %v95_v30 = vld [vmem:[%s3762_s0 + $0x288] sm:$0xff] }
  0xb0   :  { %1652 = vst [vmem:[%s3765_s3 + $0x4b0] sm:$0xff] %v1396_v14  ;;  %v1398_v52 = vmax.f32 %v1142_v39, 0.0  ;;  %v723_v46 = vmul.f32 %v3966_v13, %v299_v21  ;;  %v300_v61 = vunpack.c.l.bf16 %v93_v57  ;;  %v1399_v43 = vmax.f32 %v1143_v1, 0.0  ;;  %v96_v13 = vld [vmem:[%s3762_s0 + $0x290] sm:$0xff] }
  0xb1   :  { %1653 = vst [vmem:[%s3765_s3 + $0x4b8] sm:$0xff] %v1397_v6  ;;  %v1400_v2 = vmax.f32 %v1144_v20, 0.0  ;;  %v1146_v16 = vadd.f32 %v3904_v59, %v722_v53  ;;  %v301_v9 = vunpack.c.h.bf16 %v93_v57  ;;  %v1401_v14 = vmax.f32 %v1145_v58, 0.0 }
  0xb2   :  { %1654 = vst [vmem:[%s3765_s3 + $0x4c0] sm:$0xff] %v1398_v52  ;;  %v1147_v39 = vadd.f32 %v3905_v40, %v723_v46  ;;  %v724_v55 = vmul.f32 %v3906_v44, %v300_v61  ;;  %v302_v21 = vunpack.c.l.bf16 %v94_v42  ;;  %1655 = vst [vmem:[%s3765_s3 + $0x4c8] sm:$0xff] %v1399_v43  ;;  %v303_v6 = vunpack.c.h.bf16 %v94_v42 }
  0xb3   :  { %1656 = vst [vmem:[%s3765_s3 + $0x4d0] sm:$0xff] %v1400_v2  ;;  %v1402_v53 = vmax.f32 %v1146_v16, 0.0  ;;  %v725_v57 = vmul.f32 %v2283_v11, %v301_v9  ;;  %v304_v1 = vunpack.c.l.bf16 %v95_v30  ;;  %1657 = vst [vmem:[%s3765_s3 + $0x4d8] sm:$0xff] %v1401_v14  ;;  %v305_v46 = vunpack.c.h.bf16 %v95_v30  ;;  %v97_v2 = vld [vmem:[%s3762_s0 + $0x298] sm:$0xff] }
  0xb4   :  { %v1403_v20 = vmax.f32 %v1147_v39, 0.0  ;;  %v1148_v52 = vadd.f32 %v2275_v19, %v724_v55  ;;  %v726_v58 = vmul.f32 %v1823_v22, %v302_v21  ;;  %v727_v9 = vmul.f32 %v1831_v24, %v303_v6  ;;  %v98_v6 = vld [vmem:[%s3762_s0 + $0x2a0] sm:$0xff] }
  0xb5   :  { %1658 = vst [vmem:[%s3765_s3 + $0x4e0] sm:$0xff] %v1402_v53  ;;  %v1149_v61 = vadd.f32 %v2292_v50, %v725_v57  ;;  %v728_v42 = vmul.f32 %v1839_v26, %v304_v1  ;;  %v306_v43 = vunpack.c.l.bf16 %v96_v13  ;;  %v729_v14 = vmul.f32 %v1847_v28, %v305_v46  ;;  %v99_v46 = vld [vmem:[%s3762_s0 + $0x2a8] sm:$0xff] }
  0xb6   :  { %1659 = vst [vmem:[%s3765_s3 + $0x4e8] sm:$0xff] %v1403_v20  ;;  %v1404_v30 = vmax.f32 %v1148_v52, 0.0  ;;  %v1150_v16 = vadd.f32 %v1827_v23, %v726_v58  ;;  %v307_v39 = vunpack.c.h.bf16 %v96_v13  ;;  %v1151_v21 = vadd.f32 %v1835_v25, %v727_v9  ;;  %v3967_v52 = vld [vmem:[#allocation2_spill] sm:$0xff] }
  0xb7   :  { %v1405_v55 = vmax.f32 %v1149_v61, 0.0  ;;  %v1152_v53 = vadd.f32 %v1843_v27, %v728_v42  ;;  %v730_v57 = vmul.f32 %v1857_v32, %v306_v43  ;;  %v1153_v20 = vadd.f32 %v1851_v29, %v729_v14 }
  0xb8   :  { %1660 = vst [vmem:[%s3765_s3 + $0x4f0] sm:$0xff] %v1404_v30  ;;  %v1406_v1 = vmax.f32 %v1150_v16, 0.0  ;;  %v731_v13 = vmul.f32 %v3967_v52, %v307_v39  ;;  %v308_v58 = vunpack.c.l.bf16 %v97_v2  ;;  %v1407_v61 = vmax.f32 %v1151_v21, 0.0  ;;  %v100_v52 = vld [vmem:[%s3762_s0 + $0x2b0] sm:$0xff] }
  0xb9   :  { %1661 = vst [vmem:[%s3765_s3 + $0x4f8] sm:$0xff] %v1405_v55  ;;  %v1408_v9 = vmax.f32 %v1152_v53, 0.0  ;;  %v1154_v42 = vadd.f32 %v1861_v33, %v730_v57  ;;  %v309_v43 = vunpack.c.h.bf16 %v97_v2  ;;  %v1409_v30 = vmax.f32 %v1153_v20, 0.0 }
  0xba   :  { %1662 = vst [vmem:[%s3765_s3 + $0x500] sm:$0xff] %v1406_v1  ;;  %v1155_v16 = vadd.f32 %v1871_v37, %v731_v13  ;;  %v732_v14 = vmul.f32 %v1878_v41, %v308_v58  ;;  %v310_v39 = vunpack.c.l.bf16 %v98_v6  ;;  %1663 = vst [vmem:[%s3765_s3 + $0x508] sm:$0xff] %v1407_v61  ;;  %v311_v21 = vunpack.c.h.bf16 %v98_v6 }
  0xbb   :  { %1664 = vst [vmem:[%s3765_s3 + $0x510] sm:$0xff] %v1408_v9  ;;  %v1410_v2 = vmax.f32 %v1154_v42, 0.0  ;;  %v733_v55 = vmul.f32 %v1935_v3, %v309_v43  ;;  %v312_v53 = vunpack.c.l.bf16 %v99_v46  ;;  %1665 = vst [vmem:[%s3765_s3 + $0x518] sm:$0xff] %v1409_v30  ;;  %v313_v13 = vunpack.c.h.bf16 %v99_v46  ;;  %v101_v42 = vld [vmem:[%s3762_s0 + $0x2b8] sm:$0xff] }
  0xbc   :  { %v1411_v57 = vmax.f32 %v1155_v16, 0.0  ;;  %v1156_v1 = vadd.f32 %v1885_v45, %v732_v14  ;;  %v734_v20 = vmul.f32 %v1924_v63, %v310_v39  ;;  %v735_v61 = vmul.f32 %v1943_v5, %v311_v21  ;;  %v3969_v21 = vld [vmem:[#allocation7_spill] sm:$0xff] }
  0xbd   :  { %1666 = vst [vmem:[%s3765_s3 + $0x520] sm:$0xff] %v1410_v2  ;;  %v1157_v58 = vadd.f32 %v1939_v4, %v733_v55  ;;  %v736_v6 = vmul.f32 %v1955_v10, %v312_v53  ;;  %v314_v9 = vunpack.c.l.bf16 %v100_v52  ;;  %v737_v30 = vmul.f32 %v1973_v34, %v313_v13  ;;  %v3968_v2 = vld [vmem:[#allocation5_spill] sm:$0xff]  ;;  %v102_v10 = vld [vmem:[%s3762_s0 + $0x2c0] sm:$0xff]  ;;  %v3971_v13 = vld [vmem:[#allocation8_spill] sm:$0xff] }
  0xbe   :  { %1667 = vst [vmem:[%s3765_s3 + $0x528] sm:$0xff] %v1411_v57  ;;  %v1412_v46 = vmax.f32 %v1156_v1, 0.0  ;;  %v1158_v43 = vadd.f32 %v1928_v0, %v734_v20  ;;  %v315_v16 = vunpack.c.h.bf16 %v100_v52  ;;  %v1159_v39 = vadd.f32 %v1951_v7, %v735_v61  ;;  %v3970_v1 = vld [vmem:[#allocation6_spill] sm:$0xff]  ;;  %v103_v61 = vld [vmem:[%s3762_s0 + $0x2c8] sm:$0xff] }
  0xbf   :  { %v1413_v14 = vmax.f32 %v1157_v58, 0.0  ;;  %v1160_v55 = vadd.f32 %v3968_v2, %v736_v6  ;;  %v738_v53 = vmul.f32 %v3969_v21, %v314_v9  ;;  %v1161_v20 = vadd.f32 %v3970_v1, %v737_v30  ;;  %v3972_v30 = vld [vmem:[#allocation10_spill] sm:$0xff]  ;;  %v104_v1 = vld [vmem:[%s3762_s0 + $0x2d0] sm:$0xff] }
  0xc0   :  { %1668 = vst [vmem:[%s3765_s3 + $0x530] sm:$0xff] %v1412_v46  ;;  %v1414_v57 = vmax.f32 %v1158_v43, 0.0  ;;  %v739_v52 = vmul.f32 %v3971_v13, %v315_v16  ;;  %v316_v58 = vunpack.c.l.bf16 %v101_v42  ;;  %v1415_v6 = vmax.f32 %v1159_v39, 0.0 }
  0xc1   :  { %1669 = vst [vmem:[%s3765_s3 + $0x538] sm:$0xff] %v1413_v14  ;;  %v1416_v9 = vmax.f32 %v1160_v55, 0.0  ;;  %v1162_v21 = vadd.f32 %v1989_v47, %v738_v53  ;;  %v317_v2 = vunpack.c.h.bf16 %v101_v42  ;;  %v1417_v46 = vmax.f32 %v1161_v20, 0.0  ;;  %v3973_v14 = vld [vmem:[#allocation12_spill] sm:$0xff] }
  0xc2   :  { %1670 = vst [vmem:[%s3765_s3 + $0x540] sm:$0xff] %v1414_v57  ;;  %v1163_v43 = vadd.f32 %v3950_v17, %v739_v52  ;;  %v740_v16 = vmul.f32 %v3972_v30, %v316_v58  ;;  %v318_v13 = vunpack.c.l.bf16 %v102_v10  ;;  %1671 = vst [vmem:[%s3765_s3 + $0x548] sm:$0xff] %v1415_v6  ;;  %v319_v55 = vunpack.c.h.bf16 %v102_v10  ;;  %v3974_v6 = vld [vmem:[#allocation16_spill] sm:$0xff]  ;;  %v3975_v10 = vld [vmem:[#allocation18_spill] sm:$0xff] }
  0xc3   :  { %1672 = vst [vmem:[%s3765_s3 + $0x550] sm:$0xff] %v1416_v9  ;;  %v1418_v42 = vmax.f32 %v1162_v21, 0.0  ;;  %v741_v39 = vmul.f32 %v3973_v14, %v317_v2  ;;  %v320_v53 = vunpack.c.l.bf16 %v103_v61  ;;  %1673 = vst [vmem:[%s3765_s3 + $0x558] sm:$0xff] %v1417_v46  ;;  %v321_v58 = vunpack.c.h.bf16 %v103_v61  ;;  %v105_v46 = vld [vmem:[%s3762_s0 + $0x2d8] sm:$0xff] }
  0xc4   :  { %v1419_v57 = vmax.f32 %v1163_v43, 0.0  ;;  %v1164_v20 = vadd.f32 %v3908_v31, %v740_v16  ;;  %v742_v52 = vmul.f32 %v3931_v49, %v318_v13  ;;  %v743_v2 = vmul.f32 %v3974_v6, %v319_v55  ;;  %v3977_v6 = vld [vmem:[#allocation19_spill] sm:$0xff]  ;;  %v106_v49 = vld [vmem:[%s3762_s0 + $0x2e0] sm:$0xff] }
  0xc5   :  { %1674 = vst [vmem:[%s3765_s3 + $0x560] sm:$0xff] %v1418_v42  ;;  %v1165_v21 = vadd.f32 %v3953_v54, %v741_v39  ;;  %v744_v9 = vmul.f32 %v3975_v10, %v320_v53  ;;  %v322_v14 = vunpack.c.l.bf16 %v104_v1  ;;  %v745_v43 = vmul.f32 %v3890_v60, %v321_v58  ;;  %v3976_v39 = vld [vmem:[#allocation17_spill] sm:$0xff]  ;;  %v3978_v10 = vld [vmem:[#allocation22_spill] sm:$0xff]  ;;  %v3980_v58 = vld [vmem:[#allocation23_spill] sm:$0xff] }
  0xc6   :  { %1675 = vst [vmem:[%s3765_s3 + $0x568] sm:$0xff] %v1419_v57  ;;  %v1420_v13 = vmax.f32 %v1164_v20, 0.0  ;;  %v1166_v61 = vadd.f32 %v3889_v62, %v742_v52  ;;  %v323_v16 = vunpack.c.h.bf16 %v104_v1  ;;  %v1167_v55 = vadd.f32 %v3976_v39, %v743_v2  ;;  %v3979_v20 = vld [vmem:[#allocation21_spill] sm:$0xff]  ;;  %v107_v2 = vld [vmem:[%s3762_s0 + $0x2e8] sm:$0xff] }
  0xc7   :  { %v1421_v42 = vmax.f32 %v1165_v21, 0.0  ;;  %v1168_v53 = vadd.f32 %v3977_v6, %v744_v9  ;;  %v746_v54 = vmul.f32 %v3978_v10, %v322_v14  ;;  %v1169_v52 = vadd.f32 %v3979_v20, %v745_v43  ;;  %v3981_v43 = vld [vmem:[#allocation25_spill] sm:$0xff]  ;;  %v108_v20 = vld [vmem:[%s3762_s0 + $0x2f0] sm:$0xff] }
  0xc8   :  { %1676 = vst [vmem:[%s3765_s3 + $0x570] sm:$0xff] %v1420_v13  ;;  %v1422_v57 = vmax.f32 %v1166_v61, 0.0  ;;  %v747_v1 = vmul.f32 %v3980_v58, %v323_v16  ;;  %v324_v21 = vunpack.c.l.bf16 %v105_v46  ;;  %v1423_v14 = vmax.f32 %v1167_v55, 0.0 }
  0xc9   :  { %1677 = vst [vmem:[%s3765_s3 + $0x578] sm:$0xff] %v1421_v42  ;;  %v1424_v9 = vmax.f32 %v1168_v53, 0.0  ;;  %v1170_v10 = vadd.f32 %v2120_v56, %v746_v54  ;;  %v325_v6 = vunpack.c.h.bf16 %v105_v46  ;;  %v1425_v13 = vmax.f32 %v1169_v52, 0.0  ;;  %v3982_v46 = vld [vmem:[#allocation26_spill] sm:$0xff] }
  0xca   :  { %1678 = vst [vmem:[%s3765_s3 + $0x580] sm:$0xff] %v1422_v57  ;;  %v1171_v61 = vadd.f32 %v3959_v18, %v747_v1  ;;  %v748_v16 = vmul.f32 %v3981_v43, %v324_v21  ;;  %v326_v58 = vunpack.c.l.bf16 %v106_v49  ;;  %1679 = vst [vmem:[%s3765_s3 + $0x588] sm:$0xff] %v1423_v14  ;;  %v327_v55 = vunpack.c.h.bf16 %v106_v49  ;;  %v3983_v14 = vld [vmem:[#allocation30_spill] sm:$0xff]  ;;  %v3984_v49 = vld [vmem:[#allocation32_spill] sm:$0xff] }
  0xcb   :  { %1680 = vst [vmem:[%s3765_s3 + $0x590] sm:$0xff] %v1424_v9  ;;  %v1426_v54 = vmax.f32 %v1170_v10, 0.0  ;;  %v749_v42 = vmul.f32 %v3982_v46, %v325_v6  ;;  %v328_v53 = vunpack.c.l.bf16 %v107_v2  ;;  %1681 = vst [vmem:[%s3765_s3 + $0x598] sm:$0xff] %v1425_v13  ;;  %v329_v21 = vunpack.c.h.bf16 %v107_v2  ;;  %v109_v13 = vld [vmem:[%s3762_s0 + $0x2f8] sm:$0xff] }
  0xcc   :  { %v1427_v57 = vmax.f32 %v1171_v61, 0.0  ;;  %v1172_v52 = vadd.f32 %v2149_v48, %v748_v16  ;;  %v750_v1 = vmul.f32 %v3940_v35, %v326_v58  ;;  %v751_v6 = vmul.f32 %v3983_v14, %v327_v55  ;;  %v110_v14 = vld [vmem:[%s3762_s0 + $0x300] sm:$0xff] }
  0xcd   :  { %1682 = vst [vmem:[%s3765_s3 + $0x5a0] sm:$0xff] %v1426_v54  ;;  %v1173_v10 = vadd.f32 %v3962_v8, %v749_v42  ;;  %v752_v9 = vmul.f32 %v3984_v49, %v328_v53  ;;  %v330_v46 = vunpack.c.l.bf16 %v108_v20  ;;  %v753_v61 = vmul.f32 %v2222_v51, %v329_v21  ;;  %v3985_v53 = vld [vmem:[#allocation35_spill] sm:$0xff] }
  0xce   :  { %1683 = vst [vmem:[%s3765_s3 + $0x5a8] sm:$0xff] %v1427_v57  ;;  %v1428_v58 = vmax.f32 %v1172_v52, 0.0  ;;  %v1174_v2 = vadd.f32 %v3900_v36, %v750_v1  ;;  %v331_v16 = vunpack.c.h.bf16 %v108_v20  ;;  %v1175_v42 = vadd.f32 %v3922_v15, %v751_v6  ;;  %v3986_v1 = vld [vmem:[#allocation37_spill] sm:$0xff] }
  0xcf   :  { %v1429_v54 = vmax.f32 %v1173_v10, 0.0  ;;  %v1176_v55 = vadd.f32 %v3944_v38, %v752_v9  ;;  %v754_v49 = vmul.f32 %v3985_v53, %v330_v46  ;;  %v1177_v52 = vadd.f32 %v3925_v12, %v753_v61  ;;  %v111_v10 = vld [vmem:[%s3762_s0 + $0x308] sm:$0xff] }
  0xd0   :  { %1684 = vst [vmem:[%s3765_s3 + $0x5b0] sm:$0xff] %v1428_v58  ;;  %v1430_v57 = vmax.f32 %v1174_v2, 0.0  ;;  %v755_v20 = vmul.f32 %v3986_v1, %v331_v16  ;;  %v332_v21 = vunpack.c.l.bf16 %v109_v13  ;;  %v1431_v46 = vmax.f32 %v1175_v42, 0.0  ;;  %v112_v1 = vld [vmem:[%s3762_s0 + $0x310] sm:$0xff] }
  0xd1   :  { %1685 = vst [vmem:[%s3765_s3 + $0x5b8] sm:$0xff] %v1429_v54  ;;  %v1432_v6 = vmax.f32 %v1176_v55, 0.0  ;;  %v1178_v9 = vadd.f32 %v3904_v59, %v754_v49  ;;  %v333_v53 = vunpack.c.h.bf16 %v109_v13  ;;  %v1433_v58 = vmax.f32 %v1177_v52, 0.0 }
  0xd2   :  { %1686 = vst [vmem:[%s3765_s3 + $0x5c0] sm:$0xff] %v1430_v57  ;;  %v1179_v2 = vadd.f32 %v3905_v40, %v755_v20  ;;  %v756_v61 = vmul.f32 %v3906_v44, %v332_v21  ;;  %v334_v16 = vunpack.c.l.bf16 %v110_v14  ;;  %1687 = vst [vmem:[%s3765_s3 + $0x5c8] sm:$0xff] %v1431_v46  ;;  %v335_v54 = vunpack.c.h.bf16 %v110_v14 }
  0xd3   :  { %1688 = vst [vmem:[%s3765_s3 + $0x5d0] sm:$0xff] %v1432_v6  ;;  %v1434_v49 = vmax.f32 %v1178_v9, 0.0  ;;  %v757_v13 = vmul.f32 %v2283_v11, %v333_v53  ;;  %v336_v42 = vunpack.c.l.bf16 %v111_v10  ;;  %1689 = vst [vmem:[%s3765_s3 + $0x5d8] sm:$0xff] %v1433_v58  ;;  %v337_v20 = vunpack.c.h.bf16 %v111_v10  ;;  %v113_v6 = vld [vmem:[%s3762_s0 + $0x318] sm:$0xff] }
  0xd4   :  { %v1435_v55 = vmax.f32 %v1179_v2, 0.0  ;;  %v1180_v57 = vadd.f32 %v2275_v19, %v756_v61  ;;  %v758_v52 = vmul.f32 %v1823_v22, %v334_v16  ;;  %v759_v53 = vmul.f32 %v1831_v24, %v335_v54  ;;  %v114_v54 = vld [vmem:[%s3762_s0 + $0x320] sm:$0xff] }
  0xd5   :  { %1690 = vst [vmem:[%s3765_s3 + $0x5e0] sm:$0xff] %v1434_v49  ;;  %v1181_v21 = vadd.f32 %v2292_v50, %v757_v13  ;;  %v760_v14 = vmul.f32 %v1839_v26, %v336_v42  ;;  %v338_v46 = vunpack.c.l.bf16 %v112_v1  ;;  %v761_v58 = vmul.f32 %v1847_v28, %v337_v20  ;;  %v115_v20 = vld [vmem:[%s3762_s0 + $0x328] sm:$0xff] }
  0xd6   :  { %1691 = vst [vmem:[%s3765_s3 + $0x5e8] sm:$0xff] %v1435_v55  ;;  %v1436_v10 = vmax.f32 %v1180_v57, 0.0  ;;  %v1182_v9 = vadd.f32 %v1827_v23, %v758_v52  ;;  %v339_v2 = vunpack.c.h.bf16 %v112_v1  ;;  %v1183_v16 = vadd.f32 %v1835_v25, %v759_v53  ;;  %v3987_v57 = vld [vmem:[#allocation2_spill] sm:$0xff] }
  0xd7   :  { %v1437_v61 = vmax.f32 %v1181_v21, 0.0  ;;  %v1184_v49 = vadd.f32 %v1843_v27, %v760_v14  ;;  %v762_v13 = vmul.f32 %v1857_v32, %v338_v46  ;;  %v1185_v55 = vadd.f32 %v1851_v29, %v761_v58 }
  0xd8   :  { %1692 = vst [vmem:[%s3765_s3 + $0x5f0] sm:$0xff] %v1436_v10  ;;  %v1438_v42 = vmax.f32 %v1182_v9, 0.0  ;;  %v763_v1 = vmul.f32 %v3987_v57, %v339_v2  ;;  %v340_v52 = vunpack.c.l.bf16 %v113_v6  ;;  %v1439_v21 = vmax.f32 %v1183_v16, 0.0  ;;  %v116_v57 = vld [vmem:[%s3762_s0 + $0x330] sm:$0xff] }
  0xd9   :  { %1693 = vst [vmem:[%s3765_s3 + $0x5f8] sm:$0xff] %v1437_v61  ;;  %v1440_v53 = vmax.f32 %v1184_v49, 0.0  ;;  %v1186_v14 = vadd.f32 %v1861_v33, %v762_v13  ;;  %v341_v46 = vunpack.c.h.bf16 %v113_v6  ;;  %v1441_v10 = vmax.f32 %v1185_v55, 0.0 }
  0xda   :  { %1694 = vst [vmem:[%s3765_s3 + $0x600] sm:$0xff] %v1438_v42  ;;  %v1187_v9 = vadd.f32 %v1871_v37, %v763_v1  ;;  %v764_v58 = vmul.f32 %v1878_v41, %v340_v52  ;;  %v342_v2 = vunpack.c.l.bf16 %v114_v54  ;;  %1695 = vst [vmem:[%s3765_s3 + $0x608] sm:$0xff] %v1439_v21  ;;  %v343_v16 = vunpack.c.h.bf16 %v114_v54  ;;  %v3988_v54 = vld [vmem:[#allocation4_spill] sm:$0xff] }
  0xdb   :  { %1696 = vst [vmem:[%s3765_s3 + $0x610] sm:$0xff] %v1440_v53  ;;  %v1442_v6 = vmax.f32 %v1186_v14, 0.0  ;;  %v765_v61 = vmul.f32 %v1935_v3, %v341_v46  ;;  %v344_v49 = vunpack.c.l.bf16 %v115_v20  ;;  %1697 = vst [vmem:[%s3765_s3 + $0x618] sm:$0xff] %v1441_v10  ;;  %v345_v1 = vunpack.c.h.bf16 %v115_v20  ;;  %v117_v46 = vld [vmem:[%s3762_s0 + $0x338] sm:$0xff] }
  0xdc   :  { %v1443_v13 = vmax.f32 %v1187_v9, 0.0  ;;  %v1188_v42 = vadd.f32 %v1885_v45, %v764_v58  ;;  %v766_v55 = vmul.f32 %v1924_v63, %v342_v2  ;;  %v767_v21 = vmul.f32 %v1943_v5, %v343_v16  ;;  %v118_v5 = vld [vmem:[%s3762_s0 + $0x340] sm:$0xff] }
  0xdd   :  { %1698 = vst [vmem:[%s3765_s3 + $0x620] sm:$0xff] %v1442_v6  ;;  %v1189_v52 = vadd.f32 %v1939_v4, %v765_v61  ;;  %v768_v53 = vmul.f32 %v3988_v54, %v344_v49  ;;  %v346_v14 = vunpack.c.l.bf16 %v116_v57  ;;  %v769_v9 = vmul.f32 %v1973_v34, %v345_v1  ;;  %v3989_v61 = vld [vmem:[#allocation5_spill] sm:$0xff]  ;;  %v3990_v49 = vld [vmem:[#allocation7_spill] sm:$0xff]  ;;  %v3992_v1 = vld [vmem:[#allocation8_spill] sm:$0xff] }
  0xde   :  { %1699 = vst [vmem:[%s3765_s3 + $0x628] sm:$0xff] %v1443_v13  ;;  %v1444_v20 = vmax.f32 %v1188_v42, 0.0  ;;  %v1190_v10 = vadd.f32 %v1928_v0, %v766_v55  ;;  %v347_v58 = vunpack.c.h.bf16 %v116_v57  ;;  %v1191_v6 = vadd.f32 %v1951_v7, %v767_v21  ;;  %v3991_v42 = vld [vmem:[#allocation6_spill] sm:$0xff]  ;;  %v119_v21 = vld [vmem:[%s3762_s0 + $0x348] sm:$0xff] }
  0xdf   :  { %v1445_v2 = vmax.f32 %v1189_v52, 0.0  ;;  %v1192_v16 = vadd.f32 %v3989_v61, %v768_v53  ;;  %v770_v54 = vmul.f32 %v3990_v49, %v346_v14  ;;  %v1193_v55 = vadd.f32 %v3991_v42, %v769_v9 }
  0xe0   :  { %1700 = vst [vmem:[%s3765_s3 + $0x630] sm:$0xff] %v1444_v20  ;;  %v1446_v13 = vmax.f32 %v1190_v10, 0.0  ;;  %v771_v57 = vmul.f32 %v3992_v1, %v347_v58  ;;  %v348_v52 = vunpack.c.l.bf16 %v117_v46  ;;  %v1447_v53 = vmax.f32 %v1191_v6, 0.0  ;;  %v120_v1 = vld [vmem:[%s3762_s0 + $0x350] sm:$0xff] }
  0xe1   :  { %1701 = vst [vmem:[%s3765_s3 + $0x638] sm:$0xff] %v1445_v2  ;;  %v1448_v14 = vmax.f32 %v1192_v16, 0.0  ;;  %v1194_v49 = vadd.f32 %v1989_v47, %v770_v54  ;;  %v349_v61 = vunpack.c.h.bf16 %v117_v46  ;;  %v1449_v20 = vmax.f32 %v1193_v55, 0.0  ;;  %v3993_v46 = vld [vmem:[#allocation12_spill] sm:$0xff] }
  0xe2   :  { %1702 = vst [vmem:[%s3765_s3 + $0x640] sm:$0xff] %v1446_v13  ;;  %v1195_v10 = vadd.f32 %v3950_v17, %v771_v57  ;;  %v772_v9 = vmul.f32 %v3972_v30, %v348_v52  ;;  %v350_v58 = vunpack.c.l.bf16 %v118_v5  ;;  %1703 = vst [vmem:[%s3765_s3 + $0x648] sm:$0xff] %v1447_v53  ;;  %v351_v6 = vunpack.c.h.bf16 %v118_v5  ;;  %v3994_v57 = vld [vmem:[#allocation14_spill] sm:$0xff]  ;;  %v3995_v53 = vld [vmem:[#allocation13_spill] sm:$0xff] }
  0xe3   :  { %1704 = vst [vmem:[%s3765_s3 + $0x650] sm:$0xff] %v1448_v14  ;;  %v1450_v54 = vmax.f32 %v1194_v49, 0.0  ;;  %v773_v2 = vmul.f32 %v3993_v46, %v349_v61  ;;  %v352_v16 = vunpack.c.l.bf16 %v119_v21  ;;  %1705 = vst [vmem:[%s3765_s3 + $0x658] sm:$0xff] %v1449_v20  ;;  %v353_v30 = vunpack.c.h.bf16 %v119_v21  ;;  %v3996_v14 = vld [vmem:[#allocation16_spill] sm:$0xff]  ;;  %v3997_v5 = vld [vmem:[#allocation18_spill] sm:$0xff] }
  0xe4   :  { %v1451_v13 = vmax.f32 %v1195_v10, 0.0  ;;  %v1196_v55 = vadd.f32 %v3908_v31, %v772_v9  ;;  %v774_v52 = vmul.f32 %v3994_v57, %v350_v58  ;;  %v775_v61 = vmul.f32 %v3996_v14, %v351_v6  ;;  %v121_v20 = vld [vmem:[%s3762_s0 + $0x358] sm:$0xff]  ;;  %v3998_v6 = vld [vmem:[#allocation19_spill] sm:$0xff] }
  0xe5   :  { %1706 = vst [vmem:[%s3765_s3 + $0x660] sm:$0xff] %v1450_v54  ;;  %v1197_v49 = vadd.f32 %v3995_v53, %v773_v2  ;;  %v776_v46 = vmul.f32 %v3997_v5, %v352_v16  ;;  %v354_v17 = vunpack.c.l.bf16 %v120_v1  ;;  %v777_v9 = vmul.f32 %v3890_v60, %v353_v30  ;;  %v3999_v5 = vld [vmem:[#allocation22_spill] sm:$0xff]  ;;  %v4001_v30 = vld [vmem:[#allocation23_spill] sm:$0xff] }
  0xe6   :  { %1707 = vst [vmem:[%s3765_s3 + $0x668] sm:$0xff] %v1451_v13  ;;  %v1452_v21 = vmax.f32 %v1196_v55, 0.0  ;;  %v1198_v10 = vadd.f32 %v3889_v62, %v774_v52  ;;  %v355_v58 = vunpack.c.h.bf16 %v120_v1  ;;  %v1199_v2 = vadd.f32 %v3976_v39, %v775_v61  ;;  %v122_v53 = vld [vmem:[%s3762_s0 + $0x360] sm:$0xff]  ;;  %v4000_v55 = vld [vmem:[#allocation21_spill] sm:$0xff] }
  0xe7   :  { %v1453_v54 = vmax.f32 %v1197_v49, 0.0  ;;  %v1200_v16 = vadd.f32 %v3998_v6, %v776_v46  ;;  %v778_v14 = vmul.f32 %v3999_v5, %v354_v17  ;;  %v1201_v52 = vadd.f32 %v4000_v55, %v777_v9  ;;  %v123_v46 = vld [vmem:[%s3762_s0 + $0x368] sm:$0xff] }
  0xe8   :  { %1708 = vst [vmem:[%s3765_s3 + $0x670] sm:$0xff] %v1452_v21  ;;  %v1454_v13 = vmax.f32 %v1198_v10, 0.0  ;;  %v779_v1 = vmul.f32 %v4001_v30, %v355_v58  ;;  %v356_v49 = vunpack.c.l.bf16 %v121_v20  ;;  %v1455_v17 = vmax.f32 %v1199_v2, 0.0  ;;  %v124_v30 = vld [vmem:[%s3762_s0 + $0x370] sm:$0xff] }
  0xe9   :  { %1709 = vst [vmem:[%s3765_s3 + $0x678] sm:$0xff] %v1453_v54  ;;  %v1456_v61 = vmax.f32 %v1200_v16, 0.0  ;;  %v1202_v5 = vadd.f32 %v2120_v56, %v778_v14  ;;  %v357_v6 = vunpack.c.h.bf16 %v121_v20  ;;  %v1457_v21 = vmax.f32 %v1201_v52, 0.0  ;;  %v4002_v20 = vld [vmem:[#allocation26_spill] sm:$0xff] }
  0xea   :  { %1710 = vst [vmem:[%s3765_s3 + $0x680] sm:$0xff] %v1454_v13  ;;  %v1203_v10 = vadd.f32 %v3959_v18, %v779_v1  ;;  %v780_v9 = vmul.f32 %v3981_v43, %v356_v49  ;;  %v358_v58 = vunpack.c.l.bf16 %v122_v53  ;;  %1711 = vst [vmem:[%s3765_s3 + $0x688] sm:$0xff] %v1455_v17  ;;  %v359_v2 = vunpack.c.h.bf16 %v122_v53  ;;  %v4003_v17 = vld [vmem:[#allocation30_spill] sm:$0xff]  ;;  %v4004_v53 = vld [vmem:[#allocation32_spill] sm:$0xff] }
  0xeb   :  { %1712 = vst [vmem:[%s3765_s3 + $0x690] sm:$0xff] %v1456_v61  ;;  %v1458_v14 = vmax.f32 %v1202_v5, 0.0  ;;  %v781_v54 = vmul.f32 %v4002_v20, %v357_v6  ;;  %v360_v16 = vunpack.c.l.bf16 %v123_v46  ;;  %1713 = vst [vmem:[%s3765_s3 + $0x698] sm:$0xff] %v1457_v21  ;;  %v361_v49 = vunpack.c.h.bf16 %v123_v46  ;;  %v125_v21 = vld [vmem:[%s3762_s0 + $0x378] sm:$0xff] }
  0xec   :  { %v1459_v13 = vmax.f32 %v1203_v10, 0.0  ;;  %v1204_v52 = vadd.f32 %v2149_v48, %v780_v9  ;;  %v782_v1 = vmul.f32 %v3940_v35, %v358_v58  ;;  %v783_v6 = vmul.f32 %v4003_v17, %v359_v2  ;;  %v126_v17 = vld [vmem:[%s3762_s0 + $0x380] sm:$0xff] }
  0xed   :  { %1714 = vst [vmem:[%s3765_s3 + $0x6a0] sm:$0xff] %v1458_v14  ;;  %v1205_v5 = vadd.f32 %v3962_v8, %v781_v54  ;;  %v784_v61 = vmul.f32 %v4004_v53, %v360_v16  ;;  %v362_v20 = vunpack.c.l.bf16 %v124_v30  ;;  %v785_v9 = vmul.f32 %v2222_v51, %v361_v49  ;;  %v4005_v16 = vld [vmem:[#allocation35_spill] sm:$0xff] }
  0xee   :  { %1715 = vst [vmem:[%s3765_s3 + $0x6a8] sm:$0xff] %v1459_v13  ;;  %v1460_v46 = vmax.f32 %v1204_v52, 0.0  ;;  %v1206_v10 = vadd.f32 %v3900_v36, %v782_v1  ;;  %v363_v58 = vunpack.c.h.bf16 %v124_v30  ;;  %v1207_v54 = vadd.f32 %v3922_v15, %v783_v6  ;;  %v4006_v1 = vld [vmem:[#allocation37_spill] sm:$0xff] }
  0xef   :  { %v1461_v14 = vmax.f32 %v1205_v5, 0.0  ;;  %v1208_v2 = vadd.f32 %v3944_v38, %v784_v61  ;;  %v786_v53 = vmul.f32 %v4005_v16, %v362_v20  ;;  %v1209_v52 = vadd.f32 %v3925_v12, %v785_v9  ;;  %v127_v5 = vld [vmem:[%s3762_s0 + $0x388] sm:$0xff] }
  0xf0   :  { %1716 = vst [vmem:[%s3765_s3 + $0x6b0] sm:$0xff] %v1460_v46  ;;  %v1462_v13 = vmax.f32 %v1206_v10, 0.0  ;;  %v787_v30 = vmul.f32 %v4006_v1, %v363_v58  ;;  %v364_v49 = vunpack.c.l.bf16 %v125_v21  ;;  %v1463_v20 = vmax.f32 %v1207_v54, 0.0  ;;  %v128_v1 = vld [vmem:[%s3762_s0 + $0x390] sm:$0xff] }
  0xf1   :  { %1717 = vst [vmem:[%s3765_s3 + $0x6b8] sm:$0xff] %v1461_v14  ;;  %v1464_v6 = vmax.f32 %v1208_v2, 0.0  ;;  %v1210_v61 = vadd.f32 %v3904_v59, %v786_v53  ;;  %v365_v16 = vunpack.c.h.bf16 %v125_v21  ;;  %v1465_v46 = vmax.f32 %v1209_v52, 0.0 }
  0xf2   :  { %1718 = vst [vmem:[%s3765_s3 + $0x6c0] sm:$0xff] %v1462_v13  ;;  %v1211_v10 = vadd.f32 %v3905_v40, %v787_v30  ;;  %v788_v9 = vmul.f32 %v3906_v44, %v364_v49  ;;  %v366_v58 = vunpack.c.l.bf16 %v126_v17  ;;  %1719 = vst [vmem:[%s3765_s3 + $0x6c8] sm:$0xff] %v1463_v20  ;;  %v367_v14 = vunpack.c.h.bf16 %v126_v17 }
  0xf3   :  { %1720 = vst [vmem:[%s3765_s3 + $0x6d0] sm:$0xff] %v1464_v6  ;;  %v1466_v53 = vmax.f32 %v1210_v61, 0.0  ;;  %v789_v21 = vmul.f32 %v2283_v11, %v365_v16  ;;  %v368_v54 = vunpack.c.l.bf16 %v127_v5  ;;  %1721 = vst [vmem:[%s3765_s3 + $0x6d8] sm:$0xff] %v1465_v46  ;;  %v369_v30 = vunpack.c.h.bf16 %v127_v5  ;;  %v129_v6 = vld [vmem:[%s3762_s0 + $0x398] sm:$0xff] }
  0xf4   :  { %v1467_v2 = vmax.f32 %v1211_v10, 0.0  ;;  %v1212_v13 = vadd.f32 %v2275_v19, %v788_v9  ;;  %v790_v52 = vmul.f32 %v1823_v22, %v366_v58  ;;  %v791_v16 = vmul.f32 %v1831_v24, %v367_v14  ;;  %v130_v58 = vld [vmem:[%s3762_s0 + $0x3a0] sm:$0xff] }
  0xf5   :  { %1722 = vst [vmem:[%s3765_s3 + $0x6e0] sm:$0xff] %v1466_v53  ;;  %v1213_v49 = vadd.f32 %v2292_v50, %v789_v21  ;;  %v792_v17 = vmul.f32 %v1839_v26, %v368_v54  ;;  %v370_v20 = vunpack.c.l.bf16 %v128_v1  ;;  %v793_v61 = vmul.f32 %v1847_v28, %v369_v30  ;;  %v4007_v28 = vld [vmem:[#allocation2_spill] sm:$0xff]  ;;  %v132_v30 = vld [vmem:[%s3762_s0 + $0x3b0] sm:$0xff] }
  0xf6   :  { %1723 = vst [vmem:[%s3765_s3 + $0x6e8] sm:$0xff] %v1467_v2  ;;  %v1468_v22 = vmax.f32 %v1212_v13, 0.0  ;;  %v1214_v5 = vadd.f32 %v1827_v23, %v790_v52  ;;  %v371_v46 = vunpack.c.h.bf16 %v128_v1  ;;  %v1215_v24 = vadd.f32 %v1835_v25, %v791_v16  ;;  %v131_v25 = vld [vmem:[%s3762_s0 + $0x3a8] sm:$0xff] }
  0xf7   :  { %v1469_v10 = vmax.f32 %v1213_v49, 0.0  ;;  %v1216_v26 = vadd.f32 %v1843_v27, %v792_v17  ;;  %v794_v9 = vmul.f32 %v1857_v32, %v370_v20  ;;  %v1217_v23 = vadd.f32 %v1851_v29, %v793_v61  ;;  %v4009_v61 = vld [vmem:[#allocation4_spill] sm:$0xff] }
  0xf8   :  { %1724 = vst [vmem:[%s3765_s3 + $0x6f0] sm:$0xff] %v1468_v22  ;;  %v1470_v53 = vmax.f32 %v1214_v5, 0.0  ;;  %v795_v1 = vmul.f32 %v4007_v28, %v371_v46  ;;  %v372_v21 = vunpack.c.l.bf16 %v129_v6  ;;  %v1471_v27 = vmax.f32 %v1215_v24, 0.0  ;;  %v4008_v5 = vld [vmem:[#allocation3_spill] sm:$0xff]  ;;  %v133_v24 = vld [vmem:[%s3762_s0 + $0x3b8] sm:$0xff] }
  0xf9   :  { %1725 = vst [vmem:[%s3765_s3 + $0x6f8] sm:$0xff] %v1469_v10  ;;  %v1472_v32 = vmax.f32 %v1216_v26, 0.0  ;;  %v1218_v14 = vadd.f32 %v1861_v33, %v794_v9  ;;  %v373_v54 = vunpack.c.h.bf16 %v129_v6  ;;  %v1473_v29 = vmax.f32 %v1217_v23, 0.0  ;;  %v4011_v28 = vld [vmem:[#allocation7_spill] sm:$0xff] }
  0xfa   :  { %1726 = vst [vmem:[%s3765_s3 + $0x700] sm:$0xff] %v1470_v53  ;;  %v1219_v2 = vadd.f32 %v1871_v37, %v795_v1  ;;  %v796_v13 = vmul.f32 %v1878_v41, %v372_v21  ;;  %v374_v52 = vunpack.c.l.bf16 %v130_v58  ;;  %1727 = vst [vmem:[%s3765_s3 + $0x708] sm:$0xff] %v1471_v27  ;;  %v375_v16 = vunpack.c.h.bf16 %v130_v58  ;;  %v4010_v53 = vld [vmem:[#allocation5_spill] sm:$0xff]  ;;  %v134_v21 = vld [vmem:[%s3762_s0 + $0x3c0] sm:$0xff] }
  0xfb   :  { %1728 = vst [vmem:[%s3765_s3 + $0x710] sm:$0xff] %v1472_v32  ;;  %v1474_v33 = vmax.f32 %v1218_v14, 0.0  ;;  %v797_v49 = vmul.f32 %v1935_v3, %v373_v54  ;;  %v376_v37 = vunpack.c.l.bf16 %v131_v25  ;;  %1729 = vst [vmem:[%s3765_s3 + $0x718] sm:$0xff] %v1473_v29  ;;  %v377_v6 = vunpack.c.h.bf16 %v131_v25 }
  0xfc   :  { %v1475_v41 = vmax.f32 %v1219_v2, 0.0  ;;  %v1220_v17 = vadd.f32 %v1885_v45, %v796_v13  ;;  %v798_v20 = vmul.f32 %v1924_v63, %v374_v52  ;;  %v799_v3 = vmul.f32 %v4008_v5, %v375_v16  ;;  %v4013_v13 = vld [vmem:[#allocation9_spill] sm:$0xff]  ;;  %v136_v16 = vld [vmem:[%s3762_s0 + $0x3d0] sm:$0xff] }
  0xfd   :  { %1730 = vst [vmem:[%s3765_s3 + $0x720] sm:$0xff] %v1474_v33  ;;  %v1221_v22 = vadd.f32 %v1939_v4, %v797_v49  ;;  %v800_v46 = vmul.f32 %v4009_v61, %v376_v37  ;;  %v378_v10 = vunpack.c.l.bf16 %v132_v30  ;;  %v801_v26 = vmul.f32 %v1973_v34, %v377_v6  ;;  %v4012_v34 = vld [vmem:[#allocation8_spill] sm:$0xff]  ;;  %v4016_v61 = vld [vmem:[#allocation13_spill] sm:$0xff] }
  0xfe   :  { %1731 = vst [vmem:[%s3765_s3 + $0x728] sm:$0xff] %v1475_v41  ;;  %v1476_v45 = vmax.f32 %v1220_v17, 0.0  ;;  %v1222_v63 = vadd.f32 %v1928_v0, %v798_v20  ;;  %v379_v9 = vunpack.c.h.bf16 %v132_v30  ;;  %v1223_v58 = vadd.f32 %v1951_v7, %v799_v3  ;;  %v135_v7 = vld [vmem:[%s3762_s0 + $0x3c8] sm:$0xff]  ;;  %v4014_v30 = vld [vmem:[#allocation10_spill] sm:$0xff]  ;;  %v4015_v37 = vld [vmem:[#allocation12_spill] sm:$0xff] }
  0xff   :  { %v1477_v4 = vmax.f32 %v1221_v22, 0.0  ;;  %v1224_v23 = vadd.f32 %v4010_v53, %v800_v46  ;;  %v802_v1 = vmul.f32 %v4011_v28, %v378_v10  ;;  %v1225_v0 = vadd.f32 %v3991_v42, %v801_v26  ;;  %v4017_v10 = vld [vmem:[#allocation16_spill] sm:$0xff]  ;;  %v4019_v28 = vld [vmem:[#allocation19_spill] sm:$0xff] }
 0x100   :  { %1732 = vst [vmem:[%s3765_s3 + $0x730] sm:$0xff] %v1476_v45  ;;  %v1478_v25 = vmax.f32 %v1222_v63, 0.0  ;;  %v803_v27 = vmul.f32 %v4012_v34, %v379_v9  ;;  %v380_v32 = vunpack.c.l.bf16 %v133_v24  ;;  %v1479_v14 = vmax.f32 %v1223_v58, 0.0  ;;  %v4018_v45 = vld [vmem:[#allocation18_spill] sm:$0xff]  ;;  %v137_v9 = vld [vmem:[%s3762_s0 + $0x3d8] sm:$0xff] }
 0x101   :  { %1733 = vst [vmem:[%s3765_s3 + $0x738] sm:$0xff] %v1477_v4  ;;  %v1480_v54 = vmax.f32 %v1224_v23, 0.0  ;;  %v1226_v29 = vadd.f32 %v1989_v47, %v802_v1  ;;  %v381_v2 = vunpack.c.h.bf16 %v133_v24  ;;  %v1481_v42 = vmax.f32 %v1225_v0, 0.0  ;;  %v138_v0 = vld [vmem:[%s3762_s0 + $0x3e0] sm:$0xff] }
 0x102   :  { %1734 = vst [vmem:[%s3765_s3 + $0x740] sm:$0xff] %v1478_v25  ;;  %v1227_v52 = vadd.f32 %v4013_v13, %v803_v27  ;;  %v804_v33 = vmul.f32 %v4014_v30, %v380_v32  ;;  %v382_v49 = vunpack.c.l.bf16 %v134_v21  ;;  %1735 = vst [vmem:[%s3765_s3 + $0x748] sm:$0xff] %v1479_v14  ;;  %v383_v17 = vunpack.c.h.bf16 %v134_v21  ;;  %v4020_v21 = vld [vmem:[#allocation22_spill] sm:$0xff] }
 0x103   :  { %1736 = vst [vmem:[%s3765_s3 + $0x750] sm:$0xff] %v1480_v54  ;;  %v1482_v47 = vmax.f32 %v1226_v29, 0.0  ;;  %v805_v41 = vmul.f32 %v4015_v37, %v381_v2  ;;  %v384_v20 = vunpack.c.l.bf16 %v135_v7  ;;  %1737 = vst [vmem:[%s3765_s3 + $0x758] sm:$0xff] %v1481_v42  ;;  %v385_v3 = vunpack.c.h.bf16 %v135_v7  ;;  %v4022_v30 = vld [vmem:[#allocation26_spill] sm:$0xff] }
 0x104   :  { %v1483_v6 = vmax.f32 %v1227_v52, 0.0  ;;  %v1228_v22 = vadd.f32 %v3908_v31, %v804_v33  ;;  %v806_v5 = vmul.f32 %v3994_v57, %v382_v49  ;;  %v807_v24 = vmul.f32 %v4017_v10, %v383_v17  ;;  %v140_v52 = vld [vmem:[%s3762_s0 + $0x3f0] sm:$0xff]  ;;  %v4023_v17 = vld [vmem:[#allocation30_spill] sm:$0xff] }
 0x105   :  { %1738 = vst [vmem:[%s3765_s3 + $0x760] sm:$0xff] %v1482_v47  ;;  %v1229_v46 = vadd.f32 %v4016_v61, %v805_v41  ;;  %v808_v63 = vmul.f32 %v4018_v45, %v384_v20  ;;  %v386_v26 = vunpack.c.l.bf16 %v136_v16  ;;  %v809_v4 = vmul.f32 %v3890_v60, %v385_v3  ;;  %v4021_v60 = vld [vmem:[#allocation23_spill] sm:$0xff]  ;;  %v141_v3 = vld [vmem:[%s3762_s0 + $0x3f8] sm:$0xff] }
 0x106   :  { %1739 = vst [vmem:[%s3765_s3 + $0x768] sm:$0xff] %v1483_v6  ;;  %v1484_v31 = vmax.f32 %v1228_v22, 0.0  ;;  %v1230_v57 = vadd.f32 %v3889_v62, %v806_v5  ;;  %v387_v58 = vunpack.c.h.bf16 %v136_v16  ;;  %v1231_v23 = vadd.f32 %v3976_v39, %v807_v24  ;;  %v139_v39 = vld [vmem:[%s3762_s0 + $0x3e8] sm:$0xff]  ;;  %v4024_v6 = vld [vmem:[#allocation32_spill] sm:$0xff] }
 0x107   :  { %v1485_v53 = vmax.f32 %v1229_v46, 0.0  ;;  %v1232_v1 = vadd.f32 %v4019_v28, %v808_v63  ;;  %v810_v25 = vmul.f32 %v4020_v21, %v386_v26  ;;  %v1233_v62 = vadd.f32 %v4000_v55, %v809_v4  ;;  %v4025_v45 = vld [vmem:[#allocation35_spill] sm:$0xff] }
 0x108   :  { %1740 = vst [vmem:[%s3765_s3 + $0x770] sm:$0xff] %v1484_v31  ;;  %v1486_v34 = vmax.f32 %v1230_v57, 0.0  ;;  %v811_v27 = vmul.f32 %v4021_v60, %v387_v58  ;;  %v388_v32 = vunpack.c.l.bf16 %v137_v9  ;;  %v1487_v7 = vmax.f32 %v1231_v23, 0.0  ;;  %v4026_v31 = vld [vmem:[#allocation37_spill] sm:$0xff] }
 0x109   :  { %1741 = vst [vmem:[%s3765_s3 + $0x778] sm:$0xff] %v1485_v53  ;;  %v1488_v14 = vmax.f32 %v1232_v1, 0.0  ;;  %v1234_v54 = vadd.f32 %v2120_v56, %v810_v25  ;;  %v389_v29 = vunpack.c.h.bf16 %v137_v9  ;;  %v1489_v55 = vmax.f32 %v1233_v62, 0.0 }
 0x10a   :  { %1742 = vst [vmem:[%s3765_s3 + $0x780] sm:$0xff] %v1486_v34  ;;  %v1235_v2 = vadd.f32 %v3959_v18, %v811_v27  ;;  %v812_v42 = vmul.f32 %v3981_v43, %v388_v32  ;;  %v390_v13 = vunpack.c.l.bf16 %v138_v0  ;;  %1743 = vst [vmem:[%s3765_s3 + $0x788] sm:$0xff] %v1487_v7  ;;  %v391_v49 = vunpack.c.h.bf16 %v138_v0 }
 0x10b   :  { %1744 = vst [vmem:[%s3765_s3 + $0x790] sm:$0xff] %v1488_v14  ;;  %v1490_v56 = vmax.f32 %v1234_v54, 0.0  ;;  %v813_v33 = vmul.f32 %v4022_v30, %v389_v29  ;;  %v392_v18 = vunpack.c.l.bf16 %v139_v39  ;;  %1745 = vst [vmem:[%s3765_s3 + $0x798] sm:$0xff] %v1489_v55  ;;  %v393_v37 = vunpack.c.h.bf16 %v139_v39 }
 0x10c   :  { %v1491_v43 = vmax.f32 %v1235_v2, 0.0  ;;  %v1236_v16 = vadd.f32 %v2149_v48, %v812_v42  ;;  %v814_v47 = vmul.f32 %v3940_v35, %v390_v13  ;;  %v815_v20 = vmul.f32 %v4023_v17, %v391_v49 }
 0x10d   :  { %1746 = vst [vmem:[%s3765_s3 + $0x7a0] sm:$0xff] %v1490_v56  ;;  %v1237_v41 = vadd.f32 %v3962_v8, %v813_v33  ;;  %v816_v22 = vmul.f32 %v4024_v6, %v392_v18  ;;  %v394_v5 = vunpack.c.l.bf16 %v140_v52  ;;  %v817_v61 = vmul.f32 %v2222_v51, %v393_v37 }
 0x10e   :  { %1747 = vst [vmem:[%s3765_s3 + $0x7a8] sm:$0xff] %v1491_v43  ;;  %v1492_v48 = vmax.f32 %v1236_v16, 0.0  ;;  %v1238_v35 = vadd.f32 %v3900_v36, %v814_v47  ;;  %v395_v46 = vunpack.c.h.bf16 %v140_v52  ;;  %v1239_v10 = vadd.f32 %v3922_v15, %v815_v20 }
 0x10f   :  { %v1493_v8 = vmax.f32 %v1237_v41, 0.0  ;;  %v1240_v24 = vadd.f32 %v3944_v38, %v816_v22  ;;  %v818_v63 = vmul.f32 %v4025_v45, %v394_v5  ;;  %v1241_v9 = vadd.f32 %v3925_v12, %v817_v61 }
 0x110   :  { %1748 = vst [vmem:[%s3765_s3 + $0x7b0] sm:$0xff] %v1492_v48  ;;  %v1494_v26 = vmax.f32 %v1238_v35, 0.0  ;;  %v819_v57 = vmul.f32 %v4026_v31, %v395_v46  ;;  %v396_v36 = vunpack.c.l.bf16 %v141_v3  ;;  %v1495_v51 = vmax.f32 %v1239_v10, 0.0 }
 0x111   :  { %1749 = vst [vmem:[%s3765_s3 + $0x7b8] sm:$0xff] %v1493_v8  ;;  %v1496_v15 = vmax.f32 %v1240_v24, 0.0  ;;  %v1242_v38 = vadd.f32 %v3904_v59, %v818_v63  ;;  %v397_v4 = vunpack.c.h.bf16 %v141_v3  ;;  %v1497_v58 = vmax.f32 %v1241_v9, 0.0 }
 0x112   :  { %1750 = vst [vmem:[%s3765_s3 + $0x7c0] sm:$0xff] %v1494_v26  ;;  %v1243_v53 = vadd.f32 %v3905_v40, %v819_v57  ;;  %v820_v12 = vmul.f32 %v3906_v44, %v396_v36  ;;  %1751 = vst [vmem:[%s3765_s3 + $0x7c8] sm:$0xff] %v1495_v51 }
 0x113   :  { %1752 = vst [vmem:[%s3765_s3 + $0x7d0] sm:$0xff] %v1496_v15  ;;  %v1498_v23 = vmax.f32 %v1242_v38, 0.0  ;;  %v821_v59 = vmul.f32 %v2283_v11, %v397_v4  ;;  %1753 = vst [vmem:[%s3765_s3 + $0x7d8] sm:$0xff] %v1497_v58 }
 0x114   :  { %v1499_v28 = vmax.f32 %v1243_v53, 0.0  ;;  %v1244_v40 = vadd.f32 %v2275_v19, %v820_v12 }
 0x115   :  { %1754 = vst [vmem:[%s3765_s3 + $0x7e0] sm:$0xff] %v1498_v23  ;;  %v1245_v44 = vadd.f32 %v2292_v50, %v821_v59 }
 0x116   :  { %1755 = vst [vmem:[%s3765_s3 + $0x7e8] sm:$0xff] %v1499_v28  ;;  %v1500_v1 = vmax.f32 %v1244_v40, 0.0 }
 0x117   :  { %v1501_v21 = vmax.f32 %v1245_v44, 0.0 }
 0x118   :  { %1756 = vst [vmem:[%s3765_s3 + $0x7f0] sm:$0xff] %v1500_v1 }
 0x119   :  { %1757 = vst [vmem:[%s3765_s3 + $0x7f8] sm:$0xff] %v1501_v21 }

// kernel: up_block2d_forward.2
= control target key start
LH: loop header
LB: loop body
LE: loop exit
PB: predicated region body
PF: predicated region fallthrough
CT: control target
= control target key end

     0   :  { %s6013_s12 = smov 0   ;;  %s6015_s13 = smov 0   ;;  %s7155_s0 = inlined_call_operand.vmem [shape: bf16[2,18,18,128], index: 0, kind: input, shape index: {}]   ;;  %s7156_s1 = inlined_call_operand.vmem [shape: bf16[4,512,128], index: 1, kind: input, shape index: {}]   ;;  %s7157_s2 = inlined_call_operand.vmem [shape: bf16[2,16,2,16,256], index: 2, kind: output, shape index: {0}]   ;;  %s7158_s3 = inlined_call_operand.vmem [shape: f32[2,2,2,128], index: 3, kind: output, shape index: {1}]  }
   0x1   :  { %s6017_s14 = smov 0   ;;  %s6019_s15 = smov 0  }
   0x2   :  { %s6021_s16 = smov 0   ;;  %s6023_s17 = smov 0  }
   0x3   :  { %s6025_s18 = smov 0  }
   0x4 LB: > { %s23_s19 = sadd.s32 1, %s5983_s16  ;;  %s26_s20 = sadd.s32 1, %s5987_s17  ;;  %s5991_s18 = sphi %s6025_s18, %s14_s18   ;;  %s5987_s17 = sphi %s6023_s17, %s7171_s17   ;;  %s5983_s16 = sphi %s6021_s16, %s7170_s16   ;;  %s5979_s15 = sphi %s6019_s15, %s7169_s15   ;;  %s5975_s14 = sphi %s6017_s14, %s7168_s14   ;;  %s5971_s13 = sphi %s6015_s13, %s7167_s13   ;;  %s5967_s12 = sphi %s6013_s12, %s7166_s12  }
   0x5   : > { %p24_p0 = scmp.ge.s32.totalorder %s23_s19, 2  ;;  %s4659_s21 = sadd.s32 4294967295, %s5991_s18  }
   0x6   : > { %p97_p1 = scmp.ne.s32.totalorder %s5971_s13, %s5967_s12  ;;  %p98_p2 = scmp.eq.s32.totalorder %s4659_s21, 3 }
   0x7   : > { %s7173_s19 = smov (%p24_p0, %s23_s19), 0  ;;  %s7175_s20 = smov (!%p24_p0, %s26_s20), %s5987_s17 }
   0x8   : > { %s83_s22 = ssub.s32 %s5983_s16, %s7173_s19  ;;  %p28_p3 = scmp.ge.s32.totalorder %s7175_s20, 2 }
   0x9   : > { %p4663_p4 = scmp.ge.s32.totalorder %s5991_s18, 1  ;;  %p6059_p5 = por %p98_p2, %p97_p1 }
   0xa   : > { %p168_p6 = scmp.lt.s32.totalorder %s5991_s18, 5  ;;  %s7177_s20 = smov (%p28_p3, %s7175_s20), 0 }
   0xb   : > { %s82_s24 = ssub.s32 %s5987_s17, %s7177_s20  ;;  %s87_s26 = sadd.s32 1, %s5971_s13 }
   0xc   : > { %p169_p7 = pnand %p4663_p4, %p168_p6  ;;  %s84_s25 = sor.u32 %s83_s22, %s82_s24 }
   0xd   : > { %p85_p8 = scmp.eq.s32.totalorder %s84_s25, 0 }
   0xe   : > { %172 = sbr.rel (%p169_p7) target bundleno = 593 (0x251), region = 28 }
   0xf   : > { %s6070_s27 = scalar_select %p85_p8, %s5971_s13, %s87_s26  }
  0x15   : > { %s4666_s28 = sshll.u32 %s5975_s14, 1  ;;  %p205_p10 = scmp.lt.s32.totalorder %s5979_s15, 1  ;;  %vm473_vm0 = vsmask.f32 7424  ;;  %vm4359_vm1 = vcmask 1040384  }
  0x16   : > { %p211_p9 = scmp.lt.s32.totalorder %s4666_s28, 3  ;;  %s5143_s8 = smul.u32 12, %s5975_s14 }
  0x17   : > { %s6100_s6 = scalar_select %p205_p10, %s5979_s15, 1 }
  0x18   : > { %s7179_s28 = smov (!%p211_p9, %s4666_s28), 3  ;;  %s192_s22 = sand.u32 1, %s5967_s12  }
  0x19   : > { %s5142_s29 = sshll.u32 %s7179_s28, 8  ;;  %s5656_s7 = smul.u32 216, %s6100_s6 }
  0x1a   : > { %s6076_s5 = scalar_lea.vmem %s7156_s1, %s5142_s29  ;;  %s6577_s12 = sshll.u32 %s192_s22, 8 }
  0x1b   : > { %v5713_v0 = vld [vmem:[%s6076_s5 + $0x40] sm:$0xff]   ;;  %v5717_v4 = vld [vmem:[%s6076_s5 + $0x48] sm:$0xff]   ;;  %v5721_v8 = vld [vmem:[%s6076_s5 + $0x50] sm:$0xff]   ;;  %s209_s11 = scalar_lea.vmem %s7155_s0, %s5656_s7  ;;  %s6604_s24 = scalar_lea.vmem [#allocation2], %s6577_s12 }
  0x1c   : > { %v5714_v1 = vld [vmem:[%s6076_s5 + $0xc0] sm:$0xff]   ;;  %5208 = vmatprep.subr.bf16.mxu0 %v5713_v0  ;;  %v5718_v5 = vld [vmem:[%s6076_s5 + $0xc8] sm:$0xff]   ;;  %v5722_v9 = vld [vmem:[%s6076_s5 + $0xd0] sm:$0xff]   ;;  %s6118_s21 = scalar_lea.vmem %s209_s11, %s5143_s8  ;;  %p219_p11 = scmp.lt.s32.totalorder %s5975_s14, 1 }
  0x1d   : > { %v5715_v2 = vld [vmem:[%s6076_s5] sm:$0xff]   ;;  %5320 = vmatprep.subr.bf16.mxu1 %v5714_v1  ;;  %v5719_v6 = vld [vmem:[%s6076_s5 + $0x8] sm:$0xff]   ;;  %v5723_v10 = vld [vmem:[%s6076_s5 + $0x10] sm:$0xff]   ;;  %s4669_s26 = sshll.u32 %s6100_s6, 1  ;;  %s5137_s6 = sshll.u32 (%p6059_p5), %s5975_s14, 2 }
  0x1e   : > { %v5716_v3 = vld [vmem:[%s6076_s5 + $0x80] sm:$0xff]   ;;  %5209 = vmatpush3.bf16.msra.mxu0 %v5715_v2  ;;  %v5720_v7 = vld [vmem:[%s6076_s5 + $0x88] sm:$0xff]   ;;  %v5724_v11 = vld [vmem:[%s6076_s5 + $0x90] sm:$0xff]   ;;  %s220_s25 = scalar_select %p219_p11, %s5975_s14, 1 }
  0x1f   : > { %5321 = vmatpush3.bf16.msra.mxu1 %v5716_v3  ;;  %5210 = vmatprep.subr.bf16.mxu0 %v5717_v4  ;;  %v5725_v12 = vld [vmem:[%s6076_s5 + $0x58] sm:$0xff]   ;;  %v5729_v16 = vld [vmem:[%s6076_s5 + $0x60] sm:$0xff]   ;;  %v5733_v20 = vld [vmem:[%s6076_s5 + $0x68] sm:$0xff]   ;;  %s5138_s7 = sshll.u32 (%p6059_p5), %s5979_s15, 7 }
  0x20   : > { %5322 = vmatprep.subr.bf16.mxu1 %v5718_v5  ;;  %v5726_v13 = vld [vmem:[%s6076_s5 + $0xd8] sm:$0xff]   ;;  %v5730_v17 = vld [vmem:[%s6076_s5 + $0xe0] sm:$0xff]   ;;  %v5734_v21 = vld [vmem:[%s6076_s5 + $0xe8] sm:$0xff]   ;;  %s222_s28 = sadd.s32 %s4669_s26, %s220_s25  ;;  %s4379_s23 = sadd.s32 (%p6059_p5), %s5138_s7, %s5137_s6 }
  0x21   : > { %v5727_v14 = vld [vmem:[%s6076_s5 + $0x18] sm:$0xff]   ;;  %v5731_v18 = vld [vmem:[%s6076_s5 + $0x20] sm:$0xff]   ;;  %v5735_v22 = vld [vmem:[%s6076_s5 + $0x28] sm:$0xff]   ;;  %s4670_s29 = sshll.u32 %s222_s28, 1  ;;  %s5139_s8 = sshll.u32 (%p6059_p5), %s4379_s23, 2 }
  0x22   : > { %5211 = vmatpush3.bf16.msra.mxu0 %v5719_v6  ;;  %v5728_v15 = vld [vmem:[%s6076_s5 + $0x98] sm:$0xff]   ;;  %v5732_v19 = vld [vmem:[%s6076_s5 + $0xa0] sm:$0xff]   ;;  %v5736_v23 = vld [vmem:[%s6076_s5 + $0xa8] sm:$0xff]   ;;  %s7077_s11 = scalar_lea.vmem (%p6059_p5), %s7157_s2, %s5139_s8 }
  0x23   : > { %5323 = vmatpush3.bf16.msra.mxu1 %v5720_v7  ;;  %5212 = vmatprep.subr.bf16.mxu0 %v5721_v8  ;;  %v5737_v24 = vld [vmem:[%s6076_s5 + $0x70] sm:$0xff]   ;;  %v5741_v28 = vld [vmem:[%s6076_s5 + $0x78] sm:$0xff]   ;;  %v5745_v32 = vld [vmem:[%s6118_s21] sm:$0xff]  }
  0x24   : > { %5324 = vmatprep.subr.bf16.mxu1 %v5722_v9  ;;  %v5738_v25 = vld [vmem:[%s6076_s5 + $0xf0] sm:$0xff]   ;;  %v5742_v29 = vld [vmem:[%s6076_s5 + $0xf8] sm:$0xff]   ;;  %v5746_v33 = vld [vmem:[%s6118_s21 + $0x8] ss:$0 sps:$4 sm:$0x11]   ;;  %v475_v35 = vshrl.u32 %v5745_v32, 16 }
  0x25   : > { %v5739_v26 = vld [vmem:[%s6076_s5 + $0x30] sm:$0xff]   ;;  %v5743_v30 = vld [vmem:[%s6076_s5 + $0x38] sm:$0xff]   ;;  %v477_v36 = vshll.u32 %v5745_v32, 16  ;;  %v482_v37 = vshll.u32 %v5746_v33, 16  ;;  %v5749_v44 = vld [vmem:[%s6076_s5 + $0x140] sm:$0xff]  }
  0x26   : > { %5213 = vmatpush3.bf16.msra.mxu0 %v5723_v10  ;;  %v5740_v27 = vld [vmem:[%s6076_s5 + $0xb0] sm:$0xff]   ;;  %v5744_v31 = vld [vmem:[%s6076_s5 + $0xb8] sm:$0xff]   ;;  %v5750_v46 = vld [vmem:[%s6076_s5 + $0x1c0] sm:$0xff]  }
  0x27   : > { %5325 = vmatpush3.bf16.msra.mxu1 %v5724_v11  ;;  %5214 = vmatprep.subr.bf16.mxu0 %v5725_v12  ;;  %v5747_v34 = vld [vmem:[%s6118_s21 + $0xc] sm:$0xff]   ;;  %v5748_v38 = vld [vmem:[%s6118_s21 + $0x14] ss:$0 sps:$4 sm:$0x11]   ;;  %v479_v41 = vrot.slane %v477_v36, 1  ;;  %v484_v42 = vrot.slane %v482_v37, 1 }
  0x28   : > { %5326 = vmatprep.subr.bf16.mxu1 %v5726_v13  ;;  %v827_v39 = vshrl.u32 %v5747_v34, 16  ;;  %v829_v40 = vshll.u32 %v5747_v34, 16  ;;  %v834_v43 = vshll.u32 %v5748_v38, 16  ;;  %v5751_v49 = vld [vmem:[%s6076_s5 + $0x100] sm:$0xff]   ;;  %v5753_v53 = vld [vmem:[%s6118_s21 + $0xc] sm:$0xff]   ;;  %v5755_v56 = vld [vmem:[%s6118_s21 + $0x18] sm:$0xff]  }
  0x29   : > { %v480_v47 = vor.u32 %v479_v41, %v475_v35  ;;  %v5752_v51 = vld [vmem:[%s6076_s5 + $0x180] sm:$0xff]   ;;  %v5754_v55 = vld [vmem:[%s6118_s21 + $0x14] ss:$0 sps:$4 sm:$0x11]   ;;  %v487_v57 = vshrl.u32 %v5753_v53, 16  ;;  %v489_v58 = vshll.u32 %v5753_v53, 16 }
  0x2a   : > { %5215 = vmatpush3.bf16.msra.mxu0 %v5727_v14  ;;  %v831_v45 = vrot.slane %v829_v40, 1  ;;  %v836_v48 = vrot.slane %v834_v43, 1  ;;  %v494_v59 = vshll.u32 %v5754_v55, 16  ;;  %v5756_v60 = vld [vmem:[%s6118_s21 + $0x20] ss:$0 sps:$4 sm:$0x11]  }
  0x2b   : > { %5327 = vmatpush3.bf16.msra.mxu1 %v5728_v15  ;;  %5216 = vmatprep.subr.bf16.mxu0 %v5729_v16  ;;  %v485_v52 = vsel %vm473_vm0, %v480_v47, %v484_v42  ;;  %v839_v61 = vshrl.u32 %v5755_v56, 16  ;;  %v841_v62 = vshll.u32 %v5755_v56, 16  ;;  %v491_v63 = vrot.slane %v489_v58, 1  ;;  %v5757_v0 = vld [vmem:[%s6118_s21 + $0x18] sm:$0xff]   ;;  %v5759_v4 = vld [vmem:[%s6118_s21 + $0x24] sm:$0xff]   ;;  %v5769_v40 = vld [vmem:[%s6118_s21 + $0x30] sm:$0xff]  }
  0x2c   : > { %5328 = vmatprep.subr.bf16.mxu1 %v5730_v17  ;;  %v832_v50 = vor.u32 %v831_v45, %v827_v39  ;;  %1322 = vmatprep.mubr.bf16.mxu0 %v485_v52  ;;  %v496_v1 = vrot.slane %v494_v59, 1  ;;  %v846_v3 = vshll.u32 %v5756_v60, 16  ;;  %v5758_v6 = vld [vmem:[%s6118_s21 + $0x20] ss:$0 sps:$4 sm:$0x11]   ;;  %v499_v7 = vshrl.u32 %v5757_v0, 16 }
  0x2d   : > { %v843_v2 = vrot.slane %v841_v62, 1  ;;  %v492_v5 = vor.u32 %v491_v63, %v487_v57  ;;  %v501_v8 = vshll.u32 %v5757_v0, 16  ;;  %v5761_v9 = vld [vmem:[%s6076_s5 + $0x148] sm:$0xff]   ;;  %v851_v12 = vshrl.u32 %v5759_v4, 16  ;;  %v5773_v57 = vld [vmem:[%s6076_s5 + $0x150] sm:$0xff]  }
  0x2e   : > { %5217 = vmatpush3.bf16.msra.mxu0 %v5731_v18  ;;  %v837_v54 = vsel %vm473_vm0, %v832_v50, %v836_v48  ;;  %v848_v11 = vrot.slane %v846_v3, 1  ;;  %v506_v15 = vshll.u32 %v5758_v6, 16  ;;  %v853_v16 = vshll.u32 %v5759_v4, 16  ;;  %v5762_v17 = vld [vmem:[%s6076_s5 + $0x1c8] sm:$0xff]  }
  0x2f   : > { %5329 = vmatpush3.bf16.msra.mxu1 %v5732_v19  ;;  %5218 = vmatprep.subr.bf16.mxu0 %v5733_v20  ;;  %v844_v10 = vor.u32 %v843_v2, %v839_v61  ;;  %v497_v13 = vsel %vm473_vm0, %v492_v5, %v496_v1  ;;  %v503_v14 = vrot.slane %v501_v8, 1  ;;  %v5760_v19 = vld [vmem:[%s6118_s21 + $0x2c] ss:$0 sps:$4 sm:$0x11]   ;;  %v525_v47 = vshll.u32 %v5769_v40, 16  ;;  %v5774_v61 = vld [vmem:[%s6076_s5 + $0x1d0] sm:$0xff]  }
  0x30   : > { %5330 = vmatprep.subr.bf16.mxu1 %v5734_v21  ;;  %1483 = vmatprep.mubr.bf16.mxu1 %v837_v54  ;;  %v5763_v20 = vld [vmem:[%s6076_s5 + $0x108] sm:$0xff]   ;;  %v5768_v36 = vld [vmem:[%s6118_s21 + $0x38] ss:$0 sps:$4 sm:$0x11]   ;;  %v5775_v1 = vld [vmem:[%s6076_s5 + $0x110] sm:$0xff]  }
  0x31   : > { %v849_v18 = vsel %vm473_vm0, %v844_v10, %v848_v11  ;;  %v504_v21 = vor.u32 %v503_v14, %v499_v7  ;;  %v870_v42 = vshll.u32 %v5768_v36, 16  ;;  %v5770_v45 = vld [vmem:[%s6118_s21 + $0x38] ss:$0 sps:$4 sm:$0x11]   ;;  %v527_v52 = vrot.slane %v525_v47, 1  ;;  %v5777_v5 = vld [vmem:[%s6118_s21 + $0x3c] sm:$0xff]  }
  0x32   : > { %5219 = vmatpush3.bf16.msra.mxu0 %v5735_v22  ;;  %v508_v22 = vrot.slane %v506_v15, 1  ;;  %v5772_v54 = vld [vmem:[%s6118_s21 + $0x44] ss:$0 sps:$4 sm:$0x11]   ;;  %v5779_v8 = vld [vmem:[%s6118_s21 + $0x48] sm:$0xff]   ;;  %v537_v10 = vshll.u32 %v5777_v5, 16 }
  0x33   : > { %5331 = vmatpush3.bf16.msra.mxu1 %v5736_v23  ;;  %5220 = vmatprep.subr.bf16.mxu0 %v5737_v24  ;;  %v855_v23 = vrot.slane %v853_v16, 1  ;;  %v858_v24 = vshll.u32 %v5760_v19, 16  ;;  %v872_v48 = vrot.slane %v870_v42, 1  ;;  %v882_v63 = vshll.u32 %v5772_v54, 16  ;;  %v6168_v16 = vld [vmem:[%s6118_s21 + $0x48] sm:$0xff]   ;;  %v5787_v36 = vld [vmem:[%s6076_s5 + $0x118] sm:$0xff]  }
  0x34   : > { %5332 = vmatprep.subr.bf16.mxu1 %v5738_v25  ;;  %v5764_v25 = vld [vmem:[%s6076_s5 + $0x188] sm:$0xff]   ;;  %v5778_v7 = vld [vmem:[%s6118_s21 + $0x44] ss:$0 sps:$4 sm:$0x11]   ;;  %v889_v14 = vshll.u32 %v5779_v8, 16  ;;  %v539_v15 = vrot.slane %v537_v10, 1 }
  0x35   : > { %v884_v3 = vrot.slane %v882_v63, 1  ;;  %v542_v11 = vshll.u32 %v5778_v7, 16  ;;  %v5791_v47 = vld [vmem:[%s6118_s21 + $0x60] sm:$0xff]  }
  0x36   : > { %5221 = vmatpush3.bf16.msra.mxu0 %v5739_v26  ;;  %v509_v26 = vsel %vm473_vm0, %v504_v21, %v508_v22  ;;  %v5782_v22 = vld [vmem:[%s6118_s21 + $0x50] ss:$0 sps:$4 sm:$0x11]   ;;  %v911_v54 = vshrl.u32 %v5791_v47, 16 }
  0x37   : > { %5333 = vmatpush3.bf16.msra.mxu1 %v5740_v27  ;;  %5222 = vmatprep.subr.bf16.mxu0 %v5741_v28  ;;  %v856_v27 = vor.u32 %v855_v23, %v851_v12  ;;  %v860_v28 = vrot.slane %v858_v24, 1  ;;  %v5780_v12 = vld [vmem:[%s6118_s21 + $0x50] ss:$0 sps:$4 sm:$0x11]   ;;  %v547_v23 = vshrl.u32 %v6168_v16, 16  ;;  %v549_v24 = vshll.u32 %v6168_v16, 16 }
  0x38   : > { %5334 = vmatprep.subr.bf16.mxu1 %v5742_v29  ;;  %v5765_v29 = vld [vmem:[%s6118_s21 + $0x24] sm:$0xff]   ;;  %v894_v19 = vshll.u32 %v5780_v12, 16 }
  0x39   : > { %v511_v33 = vshrl.u32 %v5765_v29, 16 }
  0x3a   : > { %5223 = vmatpush3.bf16.msra.mxu0 %v5743_v30  ;;  %v5766_v30 = vld [vmem:[%s6118_s21 + $0x2c] ss:$0 sps:$4 sm:$0x11]  }
  0x3b   : > { %5335 = vmatpush3.bf16.msra.mxu1 %v5744_v31  ;;  %5432 = vmatprep.subr.bf16.mxu0 %v5749_v44  ;;  %v5767_v31 = vld [vmem:[%s6118_s21 + $0x30] sm:$0xff]   ;;  %v518_v35 = vshll.u32 %v5766_v30, 16  ;;  %v551_v30 = vrot.slane %v549_v24, 1 }
  0x3c   : > { %5544 = vmatprep.subr.bf16.mxu1 %v5750_v46  ;;  %v863_v38 = vshrl.u32 %v5767_v31, 16  ;;  %v865_v39 = vshll.u32 %v5767_v31, 16  ;;  %v523_v46 = vshrl.u32 %v5769_v40, 16 }
  0x3d   : > { %1323 = vmatmul.mubr.bf16.vlgmr.msra.gmra.mrb[0].mxu0 %v5745_v32  ;;  %v861_v32 = vsel %vm473_vm0, %v856_v27, %v860_v28  ;;  %v520_v41 = vrot.slane %v518_v35, 1  ;;  %v896_v27 = vrot.slane %v894_v19, 1  ;;  %v5784_v35 = vld [vmem:[%s6118_s21 + $0x5c] ss:$0 sps:$4 sm:$0x11]  }
  0x3e   : > { %1484 = vmatmul.mubr.bf16.vlgmr.msra.gmra.mrb[0].mxu1 %v5747_v34  ;;  %5433 = vmatpush3.bf16.msra.mxu0 %v5751_v49  ;;  %v513_v34 = vshll.u32 %v5765_v29, 16  ;;  %v867_v44 = vrot.slane %v865_v39, 1  ;;  %v5771_v49 = vld [vmem:[%s6118_s21 + $0x3c] sm:$0xff]   ;;  %v528_v59 = vor.u32 %v527_v52, %v523_v46  ;;  %v5792_v52 = vld [vmem:[%s6118_s21 + $0x68] ss:$0 sps:$4 sm:$0x11]  }
  0x3f   : > { %5545 = vmatpush3.bf16.msra.mxu1 %v5752_v51  ;;  %5434 = vmatprep.subr.bf16.mxu0 %v5761_v9  ;;  %v875_v55 = vshrl.u32 %v5771_v49, 16  ;;  %v535_v9 = vshrl.u32 %v5777_v5, 16  ;;  %v5790_v46 = vld [vmem:[%s6118_s21 + $0x5c] ss:$0 sps:$4 sm:$0x11]  }
  0x40   : > { %1330 = vmatprep.mubr.bf16.mxu0 %v497_v13  ;;  %1491 = vmatprep.mubr.bf16.mxu1 %v849_v18  ;;  %v515_v37 = vrot.slane %v513_v34, 1  ;;  %v868_v51 = vor.u32 %v867_v44, %v863_v38  ;;  %v887_v13 = vshrl.u32 %v5779_v8, 16  ;;  %v891_v18 = vrot.slane %v889_v14, 1 }
  0x41   : > { %5546 = vmatprep.subr.bf16.mxu1 %v5762_v17  ;;  %v544_v17 = vrot.slane %v542_v11, 1  ;;  %v540_v21 = vor.u32 %v539_v15, %v535_v9  ;;  %v5797_v9 = vld [vmem:[%s6076_s5 + $0x160] sm:$0xff]  }
  0x42   : > { %5435 = vmatpush3.bf16.msra.mxu0 %v5763_v20  ;;  %v516_v43 = vor.u32 %v515_v37, %v511_v33  ;;  %v873_v58 = vsel %vm473_vm0, %v868_v51, %v872_v48  ;;  %v6171_v20 = vld [vmem:[%s6118_s21 + $0x54] sm:$0xff]   ;;  %v552_v37 = vor.u32 %v551_v30, %v547_v23  ;;  %v566_v51 = vshll.u32 %v5790_v46, 16  ;;  %v5798_v11 = vld [vmem:[%s6076_s5 + $0x1e0] sm:$0xff]  }
  0x43   : > { %5547 = vmatpush3.bf16.msra.mxu1 %v5764_v25  ;;  %5436 = vmatprep.subr.bf16.mxu0 %v5773_v57  ;;  %v5785_v25 = vld [vmem:[%s6076_s5 + $0x158] sm:$0xff]   ;;  %v899_v28 = vshrl.u32 %v6171_v20, 16 }
  0x44   : > { %v521_v50 = vsel %vm473_vm0, %v516_v43, %v520_v41  ;;  %5548 = vmatprep.subr.bf16.mxu1 %v5774_v61  ;;  %v5786_v33 = vld [vmem:[%s6076_s5 + $0x1d8] sm:$0xff]   ;;  %v568_v57 = vrot.slane %v566_v51, 1  ;;  %v5794_v61 = vld [vmem:[%s6118_s21 + $0x68] ss:$0 sps:$4 sm:$0x11]  }
  0x45   : > { %1331 = vmatmul.mubr.bf16.gmra.mrb[4].mxu0 %v5753_v53  ;;  %v530_v53 = vshll.u32 %v5770_v45, 16  ;;  %v5788_v41 = vld [vmem:[%s6076_s5 + $0x198] sm:$0xff]  }
  0x46   : > { %1492 = vmatmul.mubr.bf16.gmra.mrb[4].mxu1 %v5755_v56  ;;  %1338 = vmatprep.mubr.bf16.mxu0 %v509_v26  ;;  %v877_v56 = vshll.u32 %v5771_v49, 16  ;;  %v892_v26 = vor.u32 %v891_v18, %v887_v13  ;;  %v5789_v45 = vld [vmem:[%s6118_s21 + $0x54] sm:$0xff]  }
  0x47   : > { %1499 = vmatprep.mubr.bf16.mxu1 %v861_v32  ;;  %v532_v60 = vrot.slane %v530_v53, 1  ;;  %5437 = vmatpush3.bf16.msra.mxu0 %v5775_v1  ;;  %v901_v32 = vshll.u32 %v6171_v20, 16  ;;  %v6198_v1 = vld [vmem:[%s6118_s21 + $0x6c] sm:$0xff]  }
  0x48   : > { %v879_v62 = vrot.slane %v877_v56, 1  ;;  %5438 = vmatprep.subr.bf16.mxu0 %v5785_v25  ;;  %v897_v34 = vsel %vm473_vm0, %v892_v26, %v896_v27  ;;  %v6192_v56 = vld [vmem:[%s6118_s21 + $0x60] sm:$0xff]   ;;  %v923_v7 = vshrl.u32 %v6198_v1, 16 }
  0x49   : > { %v903_v39 = vrot.slane %v901_v32, 1  ;;  %v573_v63 = vshll.u32 %v6192_v56, 16  ;;  %v6226_v32 = vld [vmem:[%s6118_s21 + $0x78] sm:$0xff]  }
  0x4a   : > { %v880_v2 = vor.u32 %v879_v62, %v875_v55  ;;  %v913_v55 = vshll.u32 %v5791_v47, 16  ;;  %v571_v62 = vshrl.u32 %v6192_v56, 16 }
  0x4b   : > { %5439 = vmatpush3.bf16.msra.mxu0 %v5787_v36  ;;  %v904_v42 = vor.u32 %v903_v39, %v899_v28  ;;  %v5804_v28 = vld [vmem:[%s6118_s21 + $0x80] ss:$0 sps:$4 sm:$0x11]   ;;  %v597_v39 = vshll.u32 %v6226_v32, 16 }
  0x4c   : > { %v885_v6 = vsel %vm473_vm0, %v880_v2, %v884_v3  ;;  %5440 = vmatprep.subr.bf16.mxu0 %v5797_v9 }
  0x4d   : > { %1339 = vmatmul.mubr.bf16.gmra.mrb[8].mxu0 %v5757_v0  ;;  %v533_v0 = vsel %vm473_vm0, %v528_v59, %v532_v60  ;;  %v915_v60 = vrot.slane %v913_v55, 1  ;;  %v599_v51 = vrot.slane %v597_v39, 1  ;;  %v5812_v55 = vld [vmem:[%s6076_s5 + $0x1a8] sm:$0xff]  }
  0x4e   : > { %1500 = vmatmul.mubr.bf16.gmra.mrb[8].mxu1 %v5759_v4  ;;  %1346 = vmatprep.mubr.bf16.mxu0 %v521_v50  ;;  %v5776_v4 = vld [vmem:[%s6076_s5 + $0x190] sm:$0xff]   ;;  %v561_v50 = vshll.u32 %v5789_v45, 16 }
  0x4f   : > { %1507 = vmatprep.mubr.bf16.mxu1 %v873_v58  ;;  %5549 = vmatpush3.bf16.msra.mxu1 %v5776_v4  ;;  %v918_v58 = vshll.u32 %v5792_v52, 16  ;;  %v916_v3 = vor.u32 %v915_v60, %v911_v54  ;;  %v575_v4 = vrot.slane %v573_v63, 1  ;;  %v5814_v60 = vld [vmem:[%s6118_s21 + $0x8c] ss:$0 sps:$4 sm:$0x11]  }
  0x50   : > { %5550 = vmatprep.subr.bf16.mxu1 %v5786_v33  ;;  %v563_v53 = vrot.slane %v561_v50, 1 }
  0x51   : > { %v576_v14 = vor.u32 %v575_v4, %v571_v62  ;;  %v6257_v4 = vld [vmem:[%s6118_s21 + $0x90] sm:$0xff]  }
  0x53   : > { %5551 = vmatpush3.bf16.msra.mxu1 %v5788_v41 }
  0x54   : > { %5552 = vmatprep.subr.bf16.mxu1 %v5798_v11  ;;  %v5818_v11 = vld [vmem:[%s6118_s21 + $0x98] ss:$0 sps:$4 sm:$0x11]  }
  0x55   : > { %1347 = vmatmul.mubr.bf16.gmra.mrb[12].mxu0 %v5765_v29  ;;  %v545_v29 = vsel %vm473_vm0, %v540_v21, %v544_v17  ;;  %v5799_v17 = vld [vmem:[%s6076_s5 + $0x120] sm:$0xff]   ;;  %v6212_v21 = vld [vmem:[%s6118_s21 + $0x6c] sm:$0xff]  }
  0x56   : > { %1508 = vmatmul.mubr.bf16.gmra.mrb[12].mxu1 %v5767_v31  ;;  %1354 = vmatprep.mubr.bf16.mxu0 %v533_v0  ;;  %v554_v31 = vshll.u32 %v5782_v22, 16  ;;  %v920_v0 = vrot.slane %v918_v58, 1  ;;  %v6216_v22 = vld [vmem:[%s6118_s21 + $0x78] sm:$0xff]   ;;  %v583_v24 = vshrl.u32 %v6212_v21, 16  ;;  %v585_v25 = vshll.u32 %v6212_v21, 16  ;;  %v6246_v58 = vld [vmem:[%s6118_s21 + $0x84] sm:$0xff]  }
  0x57   : > { %1515 = vmatprep.mubr.bf16.mxu1 %v885_v6  ;;  %v5796_v6 = vld [vmem:[%s6118_s21 + $0x74] ss:$0 sps:$4 sm:$0x11]   ;;  %5441 = vmatpush3.bf16.msra.mxu0 %v5799_v17  ;;  %v937_v30 = vshll.u32 %v6216_v22, 16 }
  0x58   : > { %v556_v38 = vrot.slane %v554_v31, 1  ;;  %v921_v10 = vsel %vm473_vm0, %v916_v3, %v920_v0  ;;  %v930_v13 = vshll.u32 %v5796_v6, 16  ;;  %v587_v31 = vrot.slane %v585_v25, 1 }
  0x59   : > { %v939_v33 = vrot.slane %v937_v30, 1  ;;  %v609_v0 = vshll.u32 %v6246_v58, 16  ;;  %v5824_v30 = vld [vmem:[%s6076_s5 + $0x1b0] sm:$0xff]  }
  0x5a   : > { %v557_v43 = vsel %vm473_vm0, %v552_v37, %v556_v38  ;;  %v932_v19 = vrot.slane %v930_v13, 1  ;;  %v588_v36 = vor.u32 %v587_v31, %v583_v24  ;;  %v5806_v38 = vld [vmem:[%s6118_s21 + $0x80] ss:$0 sps:$4 sm:$0x11]   ;;  %v5822_v24 = vld [vmem:[%s6076_s5 + $0x1f0] sm:$0xff]  }
  0x5b   : > { %v611_v6 = vrot.slane %v609_v0, 1  ;;  %v6266_v13 = vld [vmem:[%s6118_s21 + $0x9c] sm:$0xff]  }
  0x5c   : > { %v5834_v0 = vld [vmem:[%s6076_s5 + $0x1f8] sm:$0xff]  }
  0x5d   : > { %1355 = vmatmul.mubr.bf16.gmra.mrb[16].mxu0 %v5769_v40  ;;  %v906_v40 = vshll.u32 %v5784_v35, 16  ;;  %v6229_v35 = vld [vmem:[%s6118_s21 + $0x84] sm:$0xff]  }
  0x5e   : > { %1516 = vmatmul.mubr.bf16.gmra.mrb[16].mxu1 %v5771_v49  ;;  %1362 = vmatprep.mubr.bf16.mxu0 %v545_v29  ;;  %v559_v49 = vshrl.u32 %v5789_v45, 16  ;;  %v935_v29 = vshrl.u32 %v6216_v22, 16  ;;  %v949_v46 = vshll.u32 %v6229_v35, 16 }
  0x5f   : > { %1523 = vmatprep.mubr.bf16.mxu1 %v897_v34  ;;  %v908_v44 = vrot.slane %v906_v40, 1  ;;  %v942_v34 = vshll.u32 %v5804_v28, 16  ;;  %v5809_v40 = vld [vmem:[%s6076_s5 + $0x168] sm:$0xff]  }
  0x60   : > { %v564_v59 = vor.u32 %v563_v53, %v559_v49  ;;  %v940_v41 = vor.u32 %v939_v33, %v935_v29  ;;  %5442 = vmatprep.subr.bf16.mxu0 %v5809_v40  ;;  %v5811_v49 = vld [vmem:[%s6076_s5 + $0x128] sm:$0xff]   ;;  %v951_v52 = vrot.slane %v949_v46, 1 }
  0x61   : > { %v909_v48 = vsel %vm473_vm0, %v904_v42, %v908_v44  ;;  %v944_v42 = vrot.slane %v942_v34, 1  ;;  %v602_v44 = vshll.u32 %v5806_v38, 16  ;;  %5443 = vmatpush3.bf16.msra.mxu0 %v5811_v49  ;;  %v6280_v34 = vld [vmem:[%s6118_s21 + $0x9c] sm:$0xff]   ;;  %v6294_v46 = vld [vmem:[%s6118_s21 + $0xa8] sm:$0xff]   ;;  %v6297_v49 = vld [vmem:[%s6118_s21 + $0xb4] sm:$0xff]  }
  0x62   : > { %v569_v2 = vsel %vm473_vm0, %v564_v59, %v568_v57  ;;  %v633_v39 = vshll.u32 %v6280_v34, 16 }
  0x63   : > { %v945_v53 = vsel %vm473_vm0, %v940_v41, %v944_v42  ;;  %v604_v57 = vrot.slane %v602_v44, 1  ;;  %v631_v41 = vshrl.u32 %v6280_v34, 16 }
  0x65   : > { %1363 = vmatmul.mubr.bf16.gmra.mrb[20].mxu0 %v5777_v5  ;;  %v578_v5 = vshll.u32 %v5794_v61, 16  ;;  %v6250_v61 = vld [vmem:[%s6118_s21 + $0x90] sm:$0xff]  }
  0x66   : > { %1524 = vmatmul.mubr.bf16.gmra.mrb[20].mxu1 %v5779_v8  ;;  %1370 = vmatprep.mubr.bf16.mxu0 %v557_v43  ;;  %v925_v8 = vshll.u32 %v6198_v1, 16  ;;  %v595_v43 = vshrl.u32 %v6226_v32, 16  ;;  %v961_v3 = vshll.u32 %v6250_v61, 16  ;;  %v959_v9 = vshrl.u32 %v6250_v61, 16 }
  0x67   : > { %1531 = vmatprep.mubr.bf16.mxu1 %v909_v48  ;;  %v580_v15 = vrot.slane %v578_v5, 1  ;;  %v5808_v48 = vld [vmem:[%s6118_s21 + $0x8c] ss:$0 sps:$4 sm:$0x11]  }
  0x68   : > { %v927_v12 = vrot.slane %v925_v8, 1  ;;  %v954_v54 = vshll.u32 %v5808_v48, 16  ;;  %v600_v59 = vor.u32 %v599_v51, %v595_v43  ;;  %v5830_v51 = vld [vmem:[%s6118_s21 + $0xb0] ss:$0 sps:$4 sm:$0x11]  }
  0x69   : > { %v581_v23 = vsel %vm473_vm0, %v576_v14, %v580_v15  ;;  %v619_v15 = vshrl.u32 %v6257_v4, 16 }
  0x6a   : > { %v928_v18 = vor.u32 %v927_v12, %v923_v7  ;;  %v956_v63 = vrot.slane %v954_v54, 1  ;;  %v605_v5 = vsel %vm473_vm0, %v600_v59, %v604_v57  ;;  %v621_v12 = vshll.u32 %v6257_v4, 16 }
  0x6b   : > { %v643_v57 = vshrl.u32 %v6294_v46, 16 }
  0x6c   : > { %v933_v26 = vsel %vm473_vm0, %v928_v18, %v932_v19  ;;  %v626_v19 = vshll.u32 %v5818_v11, 16  ;;  %v623_v25 = vrot.slane %v621_v12, 1  ;;  %v6318_v11 = vld [vmem:[%s6118_s21 + $0xc0] sm:$0xff]  }
  0x6d   : > { %1371 = vmatmul.mubr.bf16.gmra.mrb[24].mxu0 %v6168_v16  ;;  %v5800_v16 = vld [vmem:[%s6076_s5 + $0x1a0] sm:$0xff]  }
  0x6e   : > { %1532 = vmatmul.mubr.bf16.gmra.mrb[24].mxu1 %v6171_v20  ;;  %1378 = vmatprep.mubr.bf16.mxu0 %v569_v2  ;;  %v5802_v20 = vld [vmem:[%s6118_s21 + $0x74] ss:$0 sps:$4 sm:$0x11]   ;;  %v614_v2 = vshll.u32 %v5814_v60, 16  ;;  %v628_v29 = vrot.slane %v626_v19, 1  ;;  %v624_v40 = vor.u32 %v623_v25, %v619_v15  ;;  %v650_v60 = vshll.u32 %v5830_v51, 16 }
  0x6f   : > { %1539 = vmatprep.mubr.bf16.mxu1 %v921_v10  ;;  %5553 = vmatpush3.bf16.msra.mxu1 %v5800_v16  ;;  %v590_v27 = vshll.u32 %v5802_v20, 16  ;;  %v963_v10 = vrot.slane %v961_v3, 1  ;;  %v5820_v16 = vld [vmem:[%s6118_s21 + $0xa4] ss:$0 sps:$4 sm:$0x11]   ;;  %v5821_v20 = vld [vmem:[%s6076_s5 + $0x170] sm:$0xff]  }
  0x70   : > { %v616_v14 = vrot.slane %v614_v2, 1  ;;  %5444 = vmatprep.subr.bf16.mxu0 %v5821_v20  ;;  %v629_v54 = vsel %vm473_vm0, %v624_v40, %v628_v29  ;;  %v652_v3 = vrot.slane %v650_v60, 1  ;;  %v1881_v25 = vld [vmem:[%s6118_s21 + $0x4] sm:$0xf] }
  0x71   : > { %v592_v37 = vrot.slane %v590_v27, 1  ;;  %v5823_v27 = vld [vmem:[%s6076_s5 + $0x130] sm:$0xff]  }
  0x72   : > { %5445 = vmatpush3.bf16.msra.mxu0 %v5823_v27  ;;  %v1928_v27 = vld [vmem:[%s6118_s21] sm:$0xe] }
  0x73   : > { %v593_v50 = vsel %vm473_vm0, %v588_v36, %v592_v37  ;;  %v5826_v36 = vld [vmem:[%s6118_s21 + $0xa4] ss:$0 sps:$4 sm:$0x11]   ;;  %v6285_v37 = vld [vmem:[%s6118_s21 + $0xa8] sm:$0xff]  }
  0x74   : > { %v638_v42 = vshll.u32 %v5826_v36, 16  ;;  %v985_v43 = vshll.u32 %v6285_v37, 16 }
  0x75   : > { %1379 = vmatmul.mubr.bf16.gmra.mrb[28].mxu0 %v5789_v45  ;;  %v947_v45 = vshrl.u32 %v6229_v35, 16 }
  0x76   : > { %1540 = vmatmul.mubr.bf16.gmra.mrb[28].mxu1 %v5791_v47  ;;  %1386 = vmatprep.mubr.bf16.mxu0 %v581_v23  ;;  %v5810_v47 = vld [vmem:[%s6076_s5 + $0x1e8] sm:$0xff]   ;;  %v973_v23 = vshll.u32 %v6266_v13, 16 }
  0x77   : > { %1547 = vmatprep.mubr.bf16.mxu1 %v933_v26  ;;  %5554 = vmatprep.subr.bf16.mxu1 %v5810_v47  ;;  %v952_v62 = vor.u32 %v951_v52, %v947_v45  ;;  %v978_v26 = vshll.u32 %v5820_v16, 16  ;;  %v983_v45 = vshrl.u32 %v6285_v37, 16  ;;  %v640_v47 = vrot.slane %v638_v42, 1  ;;  %v5840_v16 = vld [vmem:[%s6118_s21 + $0xc8] ss:$0 sps:$4 sm:$0x11]  }
  0x78   : > { %5555 = vmatpush3.bf16.msra.mxu1 %v5812_v55  ;;  %v975_v33 = vrot.slane %v973_v23, 1  ;;  %v645_v52 = vshll.u32 %v6294_v46, 16  ;;  %v1007_v23 = vshrl.u32 %v6318_v11, 16  ;;  %v5843_v42 = vld [vmem:[%s6118_s21 + $0x14] ss:$0 sps:$4 sm:$0x11]  }
  0x79   : > { %v957_v8 = vsel %vm473_vm0, %v952_v62, %v956_v63  ;;  %5556 = vmatprep.subr.bf16.mxu1 %v5822_v24  ;;  %v980_v38 = vrot.slane %v978_v26, 1  ;;  %v995_v62 = vshrl.u32 %v6297_v49, 16  ;;  %v997_v63 = vshll.u32 %v6297_v49, 16 }
  0x7a   : > { %v647_v2 = vrot.slane %v645_v52, 1  ;;  %v1009_v24 = vshll.u32 %v6318_v11, 16  ;;  %v1014_v26 = vshll.u32 %v5840_v16, 16  ;;  %v2592_v51 = vshll.u32 %v5843_v42, 16  ;;  %v4897_v16 = vld [vmem:[%s6118_s21 + $0x18] sm:$0xe] }
  0x7b   : > { %v2596_v52 = vshrl.u32 %v5843_v42, 16 }
  0x7c   : > { %5557 = vmatpush3.bf16.msra.mxu1 %v5824_v30  ;;  %v1011_v29 = vrot.slane %v1009_v24, 1  ;;  %v4944_v30 = vcombine.low %v1928_v27, %v1881_v25  ;;  %v1016_v36 = vrot.slane %v1014_v26, 1 }
  0x7d   : > { %1387 = vmatmul.mubr.bf16.gmra.mrb[32].mxu0 %v6192_v56  ;;  %v5816_v56 = vld [vmem:[%s6118_s21 + $0x98] ss:$0 sps:$4 sm:$0x11]   ;;  %5558 = vmatprep.subr.bf16.mxu1 %v5834_v0 }
  0x7e   : > { %1548 = vmatmul.mubr.bf16.gmra.mrb[32].mxu1 %v6198_v1  ;;  %1394 = vmatprep.mubr.bf16.mxu0 %v593_v50  ;;  %v607_v1 = vshrl.u32 %v6246_v58, 16  ;;  %v966_v7 = vshll.u32 %v5816_v56, 16  ;;  %v987_v50 = vrot.slane %v985_v43, 1  ;;  %v5832_v56 = vld [vmem:[%s6118_s21 + $0xbc] ss:$0 sps:$4 sm:$0x11]  }
  0x7f   : > { %1555 = vmatprep.mubr.bf16.mxu1 %v945_v53  ;;  %v5833_v53 = vld [vmem:[%s6076_s5 + $0x178] sm:$0xff]   ;;  %v2185_v40 = vshrl.u32 %v4944_v30, 16 }
  0x80   : > { %v612_v17 = vor.u32 %v611_v6, %v607_v1  ;;  %v968_v18 = vrot.slane %v966_v7, 1  ;;  %5446 = vmatprep.subr.bf16.mxu0 %v5833_v53  ;;  %v5835_v1 = vld [vmem:[%s6076_s5 + $0x138] sm:$0xff]   ;;  %v999_v6 = vrot.slane %v997_v63, 1  ;;  %v6342_v53 = vld [vmem:[%s6118_s21 + $0x10] sm:$0xf]  ;;  %v6345_v63 = vshll.u32 %v2596_v52, 16 }
  0x81   : > { %v5836_v7 = vld [vmem:[%s6076_s5 + $0x1b8] sm:$0xff]   ;;  %5447 = vmatpush3.bf16.msra.mxu0 %v5835_v1  ;;  %s224_s5 = scalar_lea.vmem %s7158_s3, %s4670_s29 }
  0x82   : > { %v617_v28 = vsel %vm473_vm0, %v612_v17, %v616_v14  ;;  %5559 = vmatpush3.bf16.msra.mxu1 %v5836_v7  ;;  %v648_v17 = vor.u32 %v647_v2, %v643_v57  ;;  %v2846_v7 = vrot.slane %v6345_v63, 1 }
  0x85   : > { %1395 = vmatmul.mubr.bf16.gmra.mrb[36].mxu0 %v6212_v21  ;;  %v964_v21 = vor.u32 %v963_v10, %v959_v9  ;;  %v1002_v9 = vshll.u32 %v5832_v56, 16  ;;  %v5838_v10 = vld [vmem:[%s6118_s21 + $0xbc] ss:$0 sps:$4 sm:$0x11]   ;;  %v1929_v56 = vld [vmem:[%s6118_s21 + $0xc] sm:$0xe] }
  0x86   : > { %1556 = vmatmul.mubr.bf16.gmra.mrb[36].mxu1 %v6216_v22  ;;  %1402 = vmatprep.mubr.bf16.mxu0 %v605_v5  ;;  %v971_v22 = vshrl.u32 %v6266_v13, 16  ;;  %v662_v19 = vshll.u32 %v5838_v10, 16 }
  0x87   : > { %1563 = vmatprep.mubr.bf16.mxu1 %v957_v8  ;;  %v969_v31 = vsel %vm473_vm0, %v964_v21, %v968_v18  ;;  %v988_v8 = vor.u32 %v987_v50, %v983_v45  ;;  %v1000_v18 = vor.u32 %v999_v6, %v995_v62  ;;  %v1004_v20 = vrot.slane %v1002_v9, 1 }
  0x88   : > { %v976_v44 = vor.u32 %v975_v33, %v971_v22  ;;  %v664_v22 = vrot.slane %v662_v19, 1  ;;  %v653_v33 = vsel %vm473_vm0, %v648_v17, %v652_v3  ;;  %v2594_v62 = vrot.slane %v2592_v51, 1 }
  0x89   : > { %v4945_v6 = vcombine.low %v1929_v56, %v6342_v53 }
  0x8a   : > { %v981_v59 = vsel %vm473_vm0, %v976_v44, %v980_v38  ;;  %v4896_v38 = vld [vmem:[%s6118_s21 + $0xc] sm:$0xe] }
  0x8b   : > { %v2201_v19 = vshll.u32 %v4945_v6, 16 }
  0x8d   : > { %1403 = vmatmul.mubr.bf16.gmra.mrb[40].mxu0 %v6226_v32  ;;  %v5828_v32 = vld [vmem:[%s6118_s21 + $0xb0] ss:$0 sps:$4 sm:$0x11]  }
  0x8e   : > { %1564 = vmatmul.mubr.bf16.gmra.mrb[40].mxu1 %v6229_v35  ;;  %1410 = vmatprep.mubr.bf16.mxu0 %v617_v28  ;;  %v635_v35 = vrot.slane %v633_v39, 1  ;;  %v990_v48 = vshll.u32 %v5828_v32, 16  ;;  %v1012_v39 = vor.u32 %v1011_v29, %v1007_v23 }
  0x8f   : > { %1571 = vmatprep.mubr.bf16.mxu1 %v969_v31  ;;  %v4849_v31 = vld [vmem:[%s6118_s21 + $0x10] sm:$0xf] }
  0x90   : > { %v992_v55 = vrot.slane %v990_v48, 1  ;;  %v636_v5 = vor.u32 %v635_v35, %v631_v41  ;;  %v2187_v41 = vshll.u32 %v4944_v30, 16  ;;  %v4992_v45 = vcombine.low %v4896_v38, %v4849_v31  ;;  %v1880_v35 = vld [vmem:[%s6118_s21] sm:$0xf] }
  0x91   : > { %v1017_v48 = vsel %vm473_vm0, %v1012_v39, %v1016_v36  ;;  %v4912_v0 = vcombine.low %v1880_v35, %v1881_v25  ;;  %v5849_v25 = vld [vmem:[%s6118_s21 + $0x20] ss:$0 sps:$4 sm:$0x11]   ;;  %v1883_v39 = vld [vmem:[%s6118_s21 + $0xc] sm:$0xf] }
  0x92   : > { %v993_v15 = vsel %vm473_vm0, %v988_v8, %v992_v55  ;;  %v2189_v50 = vrot.slane %v2187_v41, 1  ;;  %v2585_v57 = vshrl.u32 %v4992_v45, 16  ;;  %v2610_v51 = vshrl.u32 %v5849_v25, 16 }
  0x93   : > { %v2809_v8 = vshrl.u32 %v4912_v0, 16  ;;  %v2811_v9 = vshll.u32 %v4912_v0, 16  ;;  %v4914_v52 = vcombine.low %v1883_v39, %v6342_v53  ;;  %v4855_v53 = vld [vmem:[%s6118_s21 + $0x28] sm:$0xf] }
  0x94   : > { %v2190_v60 = vor.u32 %v2189_v50, %v2185_v40  ;;  %v4851_v50 = vld [vmem:[%s6118_s21 + $0x18] sm:$0xf] }
  0x95   : > { %1411 = vmatmul.mubr.bf16.gmra.mrb[44].mxu0 %v6246_v58  ;;  %v6314_v58 = vld [vmem:[%s6118_s21 + $0xb4] sm:$0xff]   ;;  %v2849_v63 = vshrl.u32 %v4914_v52, 16  ;;  %v2851_v0 = vshll.u32 %v4914_v52, 16 }
  0x96   : > { %1572 = vmatmul.mubr.bf16.gmra.mrb[44].mxu1 %v6250_v61  ;;  %1418 = vmatprep.mubr.bf16.mxu0 %v629_v54  ;;  %v641_v61 = vsel %vm473_vm0, %v636_v5, %v640_v47  ;;  %v655_v12 = vshrl.u32 %v6314_v58, 16  ;;  %v657_v14 = vshll.u32 %v6314_v58, 16  ;;  %v4848_v47 = vld [vmem:[%s6118_s21 + $0xc] sm:$0xf] }
  0x97   : > { %1579 = vmatprep.mubr.bf16.mxu1 %v981_v59  ;;  %v2587_v59 = vshll.u32 %v4992_v45, 16  ;;  %v4960_v3 = vcombine.low %v4848_v47, %v4849_v31  ;;  %v5847_v5 = vld [vmem:[%s6118_s21 + $0x14] ss:$0 sps:$4 sm:$0x11]  }
  0x98   : > { %v659_v21 = vrot.slane %v657_v14, 1  ;;  %v4852_v14 = vld [vmem:[%s6118_s21 + $0x1c] sm:$0xf]  ;;  %v2206_v23 = vshll.u32 %v5847_v5, 16  ;;  %v2210_v24 = vshrl.u32 %v5847_v5, 16 }
  0x99   : > { %v2589_v2 = vrot.slane %v2587_v59, 1  ;;  %v2831_v17 = vshll.u32 %v4960_v3, 16  ;;  %v4962_v56 = vcombine.low %v4851_v50, %v4852_v14 }
  0x9a   : > { %v660_v28 = vor.u32 %v659_v21, %v655_v12  ;;  %v2829_v12 = vshrl.u32 %v4960_v3, 16  ;;  %v6357_v30 = vrot.slane %v2206_v23, 1  ;;  %v2864_v31 = vshll.u32 %v2210_v24, 16 }
  0x9c   : > { %v665_v32 = vsel %vm473_vm0, %v660_v28, %v664_v22  ;;  %v2833_v28 = vrot.slane %v2831_v17, 1  ;;  %v2866_v42 = vrot.slane %v2864_v31, 1 }
  0x9d   : > { %1419 = vmatmul.mubr.bf16.gmra.mrb[48].mxu0 %v6257_v4  ;;  %v5841_v4 = vld [vmem:[%s6118_s21 + $0x8] ss:$0 sps:$4 sm:$0x11]  }
  0x9e   : > { %1580 = vmatmul.mubr.bf16.gmra.mrb[48].mxu1 %v6266_v13  ;;  %1426 = vmatprep.mubr.bf16.mxu0 %v641_v61  ;;  %v1005_v13 = vsel %vm473_vm0, %v1000_v18, %v1004_v20  ;;  %v2192_v43 = vshll.u32 %v5841_v4, 16  ;;  %v2196_v44 = vshrl.u32 %v5841_v4, 16  ;;  %v2199_v18 = vshrl.u32 %v4945_v6, 16 }
  0x9f   : > { %1587 = vmatprep.mubr.bf16.mxu1 %v993_v15  ;;  %v2813_v15 = vrot.slane %v2811_v9, 1  ;;  %v2203_v4 = vrot.slane %v2201_v19, 1  ;;  %v2834_v38 = vor.u32 %v2833_v28, %v2829_v12  ;;  %v2871_v9 = vshll.u32 %v4962_v56, 16 }
  0xa0   : > { %v2194_v54 = vrot.slane %v2192_v43, 1  ;;  %v2824_v55 = vshll.u32 %v2196_v44, 16  ;;  %v2606_v43 = vshll.u32 %v5849_v25, 16  ;;  %v5853_v44 = vld [vmem:[%s6118_s21 + $0x20] ss:$0 sps:$4 sm:$0x11]  }
  0xa1   : > { %v2814_v27 = vor.u32 %v2813_v15, %v2809_v8  ;;  %v2204_v41 = vor.u32 %v2203_v4, %v2199_v18  ;;  %v6368_v45 = vsel %vm473_vm0, %v2834_v38, %v2594_v62  ;;  %v2220_v5 = vshll.u32 %v5853_v44, 16 }
  0xa2   : > { %v2826_v1 = vrot.slane %v2824_v55, 1  ;;  %v1930_v55 = vld [vmem:[%s6118_s21 + $0x18] sm:$0xe]  ;;  %v2869_v8 = vshrl.u32 %v4962_v56, 16  ;;  %v2873_v19 = vrot.slane %v2871_v9, 1 }
  0xa3   : > { %v6361_v36 = vsel %vm473_vm0, %v2814_v27, %v2194_v54  ;;  %v6396_v27 = vld [vmem:[%s6118_s21 + $0x28] sm:$0xf]  ;;  %v4899_v56 = vld [vmem:[%s6118_s21 + $0x30] sm:$0xe] }
  0xa4   : > { %v2874_v24 = vor.u32 %v2873_v19, %v2869_v8 }
  0xa5   : > { %1427 = vmatmul.mubr.bf16.gmra.mrb[52].mxu0 %v6280_v34  ;;  %v2195_v34 = vsel %vm473_vm0, %v2190_v60, %v2194_v54  ;;  %v6375_v54 = vld [vmem:[%s6118_s21 + $0x1c] sm:$0xf] }
  0xa6   : > { %1588 = vmatmul.mubr.bf16.gmra.mrb[52].mxu1 %v6285_v37  ;;  %1434 = vmatprep.mubr.bf16.mxu0 %v653_v33  ;;  %v2817_v10 = vshrl.u32 %v2195_v34, 16  ;;  %v2819_v61 = vshll.u32 %v2195_v34, 16  ;;  %v2590_v37 = vor.u32 %v2589_v2, %v2585_v57  ;;  %v4946_v3 = vcombine.low %v1930_v55, %v6375_v54 }
  0xa7   : > { %1595 = vmatprep.mubr.bf16.mxu1 %v1005_v13  ;;  %v4993_v13 = vcombine.low %v4897_v16, %v4852_v14  ;;  %v2853_v34 = vrot.slane %v2851_v0, 1  ;;  %v5855_v14 = vld [vmem:[%s6118_s21 + $0x2c] ss:$0 sps:$4 sm:$0x11]  }
  0xa8   : > { %v2821_v20 = vrot.slane %v2819_v61, 1  ;;  %v2595_v21 = vsel %vm473_vm0, %v2590_v37, %v2594_v62  ;;  %v2884_v62 = vshll.u32 %v2610_v51, 16  ;;  %v2213_v37 = vshrl.u32 %v4946_v3, 16 }
  0xa9   : > { %v2837_v22 = vshrl.u32 %v2595_v21, 16  ;;  %v2839_v26 = vshll.u32 %v2595_v21, 16  ;;  %v2599_v35 = vshrl.u32 %v4993_v13, 16  ;;  %v2601_v47 = vshll.u32 %v4993_v13, 16 }
  0xaa   : > { %v2822_v29 = vor.u32 %v2821_v20, %v2817_v10  ;;  %v2886_v6 = vrot.slane %v2884_v62, 1  ;;  %v2215_v12 = vshll.u32 %v4946_v3, 16  ;;  %v2854_v18 = vor.u32 %v2853_v34, %v2849_v63  ;;  %v5861_v3 = vld [vmem:[%s6118_s21 + $0x38] ss:$0 sps:$4 sm:$0x11]  }
  0xab   : > { %v2841_v33 = vrot.slane %v2839_v26, 1  ;;  %v2603_v60 = vrot.slane %v2601_v47, 1  ;;  %v6387_v20 = vrot.slane %v2220_v5, 1  ;;  %v2224_v21 = vshrl.u32 %v5853_v44, 16  ;;  %v4854_v26 = vld [vmem:[%s6118_s21 + $0x24] sm:$0xf] }
  0xac   : > { %v2827_v40 = vsel %vm473_vm0, %v2822_v29, %v2826_v1  ;;  %v2217_v16 = vrot.slane %v2215_v12, 1  ;;  %v2620_v4 = vshll.u32 %v5855_v14, 16  ;;  %v2624_v31 = vshrl.u32 %v5855_v14, 16 }
  0xad   : > { %1435 = vmatmul.mubr.bf16.gmra.mrb[56].mxu0 %v6294_v46  ;;  %v2842_v46 = vor.u32 %v2841_v33, %v2837_v22  ;;  %v2604_v2 = vor.u32 %v2603_v60, %v2599_v35  ;;  %v1886_v22 = vld [vmem:[%s6118_s21 + $0x18] sm:$0xf]  ;;  %v2904_v29 = vshll.u32 %v2224_v21, 16  ;;  %v1931_v33 = vld [vmem:[%s6118_s21 + $0x24] sm:$0xe]  ;;  %v4964_v51 = vcombine.low %v4854_v26, %v4855_v53 }
  0xae   : > { %1596 = vmatmul.mubr.bf16.gmra.mrb[56].mxu1 %v6297_v49  ;;  %1442 = vmatprep.mubr.bf16.mxu0 %v665_v32  ;;  %v2209_v49 = vsel %vm473_vm0, %v2204_v41, %v6357_v30  ;;  %v2608_v32 = vrot.slane %v2606_v43, 1  ;;  %v2218_v28 = vor.u32 %v2217_v16, %v2213_v37  ;;  %v5859_v41 = vld [vmem:[%s6118_s21 + $0x2c] ss:$0 sps:$4 sm:$0x11]   ;;  %v2622_v43 = vrot.slane %v2620_v4, 1 }
  0xaf   : > { %1603 = vmatprep.mubr.bf16.mxu1 %v1017_v48  ;;  %v2847_v48 = vsel %vm473_vm0, %v2842_v46, %v2846_v7  ;;  %v2857_v57 = vshrl.u32 %v2209_v49, 16  ;;  %v2859_v59 = vshll.u32 %v2209_v49, 16  ;;  %v4898_v7 = vld [vmem:[%s6118_s21 + $0x24] sm:$0xe]  ;;  %v2924_v44 = vshll.u32 %v2624_v31, 16 }
  0xb0   : > { %v2609_v61 = vsel %vm473_vm0, %v2604_v2, %v2608_v32  ;;  %v4994_v25 = vcombine.low %v4898_v7, %v4855_v53  ;;  %v2875_v13 = vsel %vm473_vm0, %v2874_v24, %v2608_v32  ;;  %v4916_v32 = vcombine.low %v1886_v22, %v6375_v54  ;;  %v4858_v60 = vld [vmem:[%s6118_s21 + $0x34] sm:$0xf]  ;;  %v1932_v26 = vld [vmem:[%s6118_s21 + $0x30] sm:$0xe] }
  0xb1   : > { %v2861_v1 = vrot.slane %v2859_v59, 1  ;;  %v2877_v15 = vshrl.u32 %v2609_v61, 16  ;;  %v2879_v17 = vshll.u32 %v2609_v61, 16  ;;  %v2926_v49 = vrot.slane %v2924_v44, 1  ;;  %v1889_v61 = vld [vmem:[%s6118_s21 + $0x24] sm:$0xf] }
  0xb2   : > { %v2613_v39 = vshrl.u32 %v4994_v25, 16  ;;  %v4947_v52 = vcombine.low %v1931_v33, %v6396_v27  ;;  %v2238_v59 = vshrl.u32 %v5859_v41, 16  ;;  %v2889_v62 = vshrl.u32 %v4916_v32, 16  ;;  %v6418_v21 = vld [vmem:[%s6118_s21 + $0x34] sm:$0xf] }
  0xb3   : > { %v2862_v10 = vor.u32 %v2861_v1, %v2857_v57  ;;  %v2881_v23 = vrot.slane %v2879_v17, 1  ;;  %v2234_v57 = vshll.u32 %v5859_v41, 16  ;;  %v2891_v63 = vshll.u32 %v4916_v32, 16  ;;  %v4857_v17 = vld [vmem:[%s6118_s21 + $0x30] sm:$0xf] }
  0xb4   : > { %v2911_v0 = vshll.u32 %v4964_v51, 16  ;;  %v2227_v2 = vshrl.u32 %v4947_v52, 16  ;;  %v2638_v16 = vshrl.u32 %v5861_v3, 16  ;;  %v4966_v41 = vcombine.low %v4857_v17, %v4858_v60 }
  0xb5   : > { %1443 = vmatmul.mubr.bf16.gmra.mrb[60].mxu0 %v6314_v58  ;;  %v2867_v58 = vsel %vm473_vm0, %v2862_v10, %v2866_v42  ;;  %v2882_v38 = vor.u32 %v2881_v23, %v2877_v15  ;;  %v2906_v42 = vrot.slane %v2904_v29, 1  ;;  %v6413_v7 = vrot.slane %v2234_v57, 1 }
  0xb6   : > { %1604 = vmatmul.mubr.bf16.gmra.mrb[60].mxu1 %v6318_v11  ;;  %3801 = vmatprep.mubr.bf16.mxu0 %v2827_v40  ;;  %v6391_v11 = vsel %vm473_vm0, %v2854_v18, %v6357_v30  ;;  %v2615_v40 = vshll.u32 %v4994_v25, 16  ;;  %v2223_v30 = vsel %vm473_vm0, %v2218_v28, %v6387_v20  ;;  %v2913_v34 = vrot.slane %v2911_v0, 1  ;;  %v5865_v28 = vld [vmem:[%s6118_s21 + $0x38] ss:$0 sps:$4 sm:$0x11]  }
  0xb7   : > { %3962 = vmatprep.mubr.bf16.mxu1 %v2847_v48  ;;  %v2887_v46 = vsel %vm473_vm0, %v2882_v38, %v2886_v6  ;;  %v2897_v35 = vshrl.u32 %v2223_v30, 16  ;;  %v2899_v47 = vshll.u32 %v2223_v30, 16  ;;  %v2893_v6 = vrot.slane %v2891_v63, 1 }
  0xb8   : > { %v2617_v50 = vrot.slane %v2615_v40, 1  ;;  %v2944_v10 = vshll.u32 %v2238_v59, 16  ;;  %v4995_v15 = vcombine.low %v4899_v56, %v4858_v60  ;;  %v6428_v33 = vshll.u32 %v2638_v16, 16 }
  0xb9   : > { %v2901_v55 = vrot.slane %v2899_v47, 1  ;;  %v2894_v12 = vor.u32 %v2893_v6, %v2889_v62  ;;  %v4948_v30 = vcombine.low %v1932_v26, %v6418_v21  ;;  %v4900_v47 = vld [vmem:[%s6118_s21 + $0x3c] sm:$0xe]  ;;  %v2951_v32 = vshll.u32 %v4966_v41, 16 }
  0xba   : > { %v2618_v48 = vor.u32 %v2617_v50, %v2613_v39  ;;  %v2946_v19 = vrot.slane %v2944_v10, 1  ;;  %v2627_v22 = vshrl.u32 %v4995_v15, 16  ;;  %v2629_v4 = vshll.u32 %v4995_v15, 16 }
  0xbb   : > { %v2902_v54 = vor.u32 %v2901_v55, %v2897_v35  ;;  %v2895_v24 = vsel %vm473_vm0, %v2894_v12, %v6387_v20  ;;  %v4918_v39 = vcombine.low %v1889_v61, %v6396_v27  ;;  %v2248_v35 = vshll.u32 %v5865_v28, 16  ;;  %v5867_v27 = vld [vmem:[%s6118_s21 + $0x44] ss:$0 sps:$4 sm:$0x11]   ;;  %v1933_v61 = vld [vmem:[%s6118_s21 + $0x3c] sm:$0xe] }
  0xbc   : > { %v2623_v1 = vsel %vm473_vm0, %v2618_v48, %v2622_v43  ;;  %v2631_v40 = vrot.slane %v2629_v4, 1  ;;  %v2243_v48 = vshll.u32 %v4948_v30, 16  ;;  %v2953_v60 = vrot.slane %v2951_v32, 1  ;;  %v4864_v4 = vld [vmem:[%s6118_s21 + $0x4c] sm:$0xf] }
  0xbd   : > { %3802 = vmatmul.mubr.bf16.vlgmr.msra.gmra.mrb[64].mxu0 %v6361_v36  ;;  %v2909_v36 = vshrl.u32 %v4964_v51, 16  ;;  %v2917_v5 = vshrl.u32 %v2623_v1, 16  ;;  %v2919_v53 = vshll.u32 %v2623_v1, 16  ;;  %v2907_v8 = vsel %vm473_vm0, %v2902_v54, %v2906_v42  ;;  %v4861_v42 = vld [vmem:[%s6118_s21 + $0x40] sm:$0xf] }
  0xbe   : > { %3963 = vmatmul.mubr.bf16.vlgmr.msra.gmra.mrb[64].mxu1 %v6368_v45  ;;  %3809 = vmatprep.mubr.bf16.mxu0 %v2867_v58  ;;  %v2229_v45 = vshll.u32 %v4947_v52, 16  ;;  %v2634_v58 = vshll.u32 %v5861_v3, 16  ;;  %v2929_v44 = vshrl.u32 %v4918_v39, 16  ;;  %v2632_v50 = vor.u32 %v2631_v40, %v2627_v22 }
  0xbf   : > { %3970 = vmatprep.mubr.bf16.mxu1 %v2887_v46  ;;  %v2921_v37 = vrot.slane %v2919_v53, 1  ;;  %v2914_v14 = vor.u32 %v2913_v34, %v2909_v36  ;;  %v2931_v46 = vshll.u32 %v4918_v39, 16  ;;  %v2241_v51 = vshrl.u32 %v4948_v30, 16  ;;  %v1892_v36 = vld [vmem:[%s6118_s21 + $0x30] sm:$0xf] }
  0xc0   : > { %v2231_v9 = vrot.slane %v2229_v45, 1  ;;  %v2636_v31 = vrot.slane %v2634_v58, 1  ;;  %v6437_v57 = vrot.slane %v2248_v35, 1  ;;  %v2252_v62 = vshrl.u32 %v5865_v28, 16  ;;  %v6444_v45 = vld [vmem:[%s6118_s21 + $0x40] sm:$0xf] }
  0xc1   : > { %v2922_v23 = vor.u32 %v2921_v37, %v2917_v5  ;;  %v2915_v25 = vsel %vm473_vm0, %v2914_v14, %v2622_v43  ;;  %v2933_v55 = vrot.slane %v2931_v46, 1  ;;  %v4996_v63 = vcombine.low %v4900_v47, %v4861_v42 }
  0xc2   : > { %v2232_v18 = vor.u32 %v2231_v9, %v2227_v2  ;;  %v2637_v59 = vsel %vm473_vm0, %v2632_v50, %v2636_v31  ;;  %v4860_v2 = vld [vmem:[%s6118_s21 + $0x3c] sm:$0xf]  ;;  %v2245_v5 = vrot.slane %v2243_v48, 1  ;;  %v2984_v53 = vshll.u32 %v2252_v62, 16 }
  0xc3   : > { %v2957_v56 = vshrl.u32 %v2637_v59, 16  ;;  %v2959_v54 = vshll.u32 %v2637_v59, 16  ;;  %v2934_v1 = vor.u32 %v2933_v55, %v2929_v44  ;;  %v2641_v6 = vshrl.u32 %v4996_v63, 16  ;;  %v5873_v50 = vld [vmem:[%s6118_s21 + $0x50] ss:$0 sps:$4 sm:$0x11]  }
  0xc4   : > { %v2237_v29 = vsel %vm473_vm0, %v2232_v18, %v6413_v7  ;;  %v2643_v9 = vshll.u32 %v4996_v63, 16  ;;  %v2648_v10 = vshll.u32 %v5867_v27, 16  ;;  %v2246_v12 = vor.u32 %v2245_v5, %v2241_v51 }
  0xc5   : > { %3810 = vmatmul.mubr.bf16.gmra.mrb[68].mxu0 %v6391_v11  ;;  %v2927_v11 = vsel %vm473_vm0, %v2922_v23, %v2926_v49  ;;  %v2937_v38 = vshrl.u32 %v2237_v29, 16  ;;  %v2939_v20 = vshll.u32 %v2237_v29, 16  ;;  %v2949_v49 = vshrl.u32 %v4966_v41, 16  ;;  %v4901_v41 = vld [vmem:[%s6118_s21 + $0x48] sm:$0xe] }
  0xc6   : > { %3971 = vmatmul.mubr.bf16.gmra.mrb[68].mxu1 %v2875_v13  ;;  %3817 = vmatprep.mubr.bf16.mxu0 %v2907_v8  ;;  %v2966_v13 = vrot.slane %v6428_v33, 1  ;;  %v2961_v34 = vrot.slane %v2959_v54, 1  ;;  %v2935_v8 = vsel %vm473_vm0, %v2934_v1, %v6413_v7  ;;  %v2986_v14 = vrot.slane %v2984_v53, 1  ;;  %v5871_v7 = vld [vmem:[%s6118_s21 + $0x44] ss:$0 sps:$4 sm:$0x11]  }
  0xc7   : > { %3978 = vmatprep.mubr.bf16.mxu1 %v2927_v11  ;;  %v2941_v43 = vrot.slane %v2939_v20, 1  ;;  %v2954_v3 = vor.u32 %v2953_v60, %v2949_v49  ;;  %v2652_v15 = vshrl.u32 %v5867_v27, 16  ;;  %v2645_v18 = vrot.slane %v2643_v9, 1  ;;  %v1895_v60 = vld [vmem:[%s6118_s21 + $0x3c] sm:$0xf] }
  0xc8   : > { %v2962_v17 = vor.u32 %v2961_v34, %v2957_v56  ;;  %v4920_v58 = vcombine.low %v1892_v36, %v6418_v21  ;;  %v2251_v16 = vsel %vm473_vm0, %v2246_v12, %v6437_v57  ;;  %v2262_v35 = vshll.u32 %v5871_v7, 16  ;;  %v4863_v56 = vld [vmem:[%s6118_s21 + $0x48] sm:$0xf]  ;;  %v6466_v54 = vld [vmem:[%s6118_s21 + $0x4c] sm:$0xf] }
  0xc9   : > { %v2942_v52 = vor.u32 %v2941_v43, %v2937_v38  ;;  %v2955_v37 = vsel %vm473_vm0, %v2954_v3, %v2636_v31  ;;  %v3004_v23 = vshll.u32 %v2652_v15, 16  ;;  %v2977_v26 = vshrl.u32 %v2251_v16, 16  ;;  %v5877_v53 = vld [vmem:[%s6118_s21 + $0x50] ss:$0 sps:$4 sm:$0x11]  }
  0xca   : > { %v2967_v22 = vsel %vm473_vm0, %v2962_v17, %v2966_v13  ;;  %v2979_v28 = vshll.u32 %v2251_v16, 16  ;;  %v2646_v29 = vor.u32 %v2645_v18, %v2641_v6  ;;  %v2969_v33 = vshrl.u32 %v4920_v58, 16 }
  0xcb   : > { %v2947_v0 = vsel %vm473_vm0, %v2942_v52, %v2946_v19  ;;  %v2650_v19 = vrot.slane %v2648_v10, 1  ;;  %v3006_v31 = vrot.slane %v3004_v23, 1  ;;  %v2971_v11 = vshll.u32 %v4920_v58, 16  ;;  %v1934_v10 = vld [vmem:[%s6118_s21 + $0x48] sm:$0xe] }
  0xcc   : > { %v2981_v38 = vrot.slane %v2979_v28, 1  ;;  %v2266_v47 = vshrl.u32 %v5871_v7, 16  ;;  %v4997_v27 = vcombine.low %v4901_v41, %v4864_v4  ;;  %v2264_v48 = vrot.slane %v2262_v35, 1  ;;  %v4867_v23 = vld [vmem:[%s6118_s21 + $0x58] sm:$0xf] }
  0xcd   : > { %3818 = vmatmul.mubr.bf16.gmra.mrb[72].mxu0 %v2895_v24  ;;  %v4968_v24 = vcombine.low %v4860_v2, %v4861_v42  ;;  %v2651_v20 = vsel %vm473_vm0, %v2646_v29, %v2650_v19  ;;  %v2973_v42 = vrot.slane %v2971_v11, 1  ;;  %v2662_v5 = vshll.u32 %v5873_v50, 16  ;;  %v5879_v11 = vld [vmem:[%s6118_s21 + $0x5c] ss:$0 sps:$4 sm:$0x11]  }
  0xce   : > { %3979 = vmatmul.mubr.bf16.gmra.mrb[72].mxu1 %v2915_v25  ;;  %3825 = vmatprep.mubr.bf16.mxu0 %v2947_v0  ;;  %v4949_v25 = vcombine.low %v1933_v61, %v6444_v45  ;;  %v2997_v30 = vshrl.u32 %v2651_v20, 16  ;;  %v2999_v13 = vshll.u32 %v2651_v20, 16  ;;  %v2982_v44 = vor.u32 %v2981_v38, %v2977_v26  ;;  %v4866_v35 = vld [vmem:[%s6118_s21 + $0x54] sm:$0xf] }
  0xcf   : > { %3986 = vmatprep.mubr.bf16.mxu1 %v2967_v22  ;;  %v2989_v21 = vshrl.u32 %v4968_v24, 16  ;;  %v2991_v39 = vshll.u32 %v4968_v24, 16  ;;  %v2974_v32 = vor.u32 %v2973_v42, %v2969_v33  ;;  %v3024_v59 = vshll.u32 %v2266_v47, 16  ;;  %v4902_v24 = vld [vmem:[%s6118_s21 + $0x54] sm:$0xe] }
  0xd0   : > { %v2255_v40 = vshrl.u32 %v4949_v25, 16  ;;  %v2257_v43 = vshll.u32 %v4949_v25, 16  ;;  %v3001_v49 = vrot.slane %v2999_v13, 1  ;;  %v2987_v52 = vsel %vm473_vm0, %v2982_v44, %v2986_v14  ;;  %v6486_v47 = vld [vmem:[%s6118_s21 + $0x58] sm:$0xf] }
  0xd1   : > { %v2993_v46 = vrot.slane %v2991_v39, 1  ;;  %v2975_v63 = vsel %vm473_vm0, %v2974_v32, %v6437_v57  ;;  %v2655_v0 = vshrl.u32 %v4997_v27, 16  ;;  %v3026_v2 = vrot.slane %v3024_v59, 1 }
  0xd2   : > { %v2259_v51 = vrot.slane %v2257_v43, 1  ;;  %v3002_v62 = vor.u32 %v3001_v49, %v2997_v30  ;;  %v2657_v3 = vshll.u32 %v4997_v27, 16  ;;  %v4922_v9 = vcombine.low %v1895_v60, %v6444_v45  ;;  %v1935_v27 = vld [vmem:[%s6118_s21 + $0x54] sm:$0xe] }
  0xd3   : > { %v2994_v55 = vor.u32 %v2993_v46, %v2989_v21  ;;  %v2664_v12 = vrot.slane %v2662_v5, 1  ;;  %v4970_v18 = vcombine.low %v4863_v56, %v4864_v4  ;;  %v4950_v16 = vcombine.low %v1934_v10, %v6466_v54  ;;  %v1898_v46 = vld [vmem:[%s6118_s21 + $0x48] sm:$0xf] }
  0xd4   : > { %v2260_v36 = vor.u32 %v2259_v51, %v2255_v40  ;;  %v3007_v6 = vsel %vm473_vm0, %v3002_v62, %v3006_v31  ;;  %v3009_v15 = vshrl.u32 %v4922_v9, 16  ;;  %v3011_v17 = vshll.u32 %v4922_v9, 16  ;;  %v5883_v62 = vld [vmem:[%s6118_s21 + $0x5c] ss:$0 sps:$4 sm:$0x11]  }
  0xd5   : > { %3826 = vmatmul.mubr.bf16.gmra.mrb[76].mxu0 %v2935_v8  ;;  %v2995_v1 = vsel %vm473_vm0, %v2994_v55, %v2650_v19  ;;  %v2666_v8 = vshrl.u32 %v5873_v50, 16  ;;  %v2276_v45 = vshll.u32 %v5877_v53, 16  ;;  %v3029_v22 = vshrl.u32 %v4970_v18, 16 }
  0xd6   : > { %3987 = vmatmul.mubr.bf16.gmra.mrb[76].mxu1 %v2955_v37  ;;  %3833 = vmatprep.mubr.bf16.mxu0 %v2987_v52  ;;  %v2265_v34 = vsel %vm473_vm0, %v2260_v36, %v2264_v48  ;;  %v2659_v37 = vrot.slane %v2657_v3, 1  ;;  %v3013_v25 = vrot.slane %v3011_v17, 1  ;;  %v3031_v26 = vshll.u32 %v4970_v18, 16  ;;  %v4903_v17 = vld [vmem:[%s6118_s21 + $0x60] sm:$0xe] }
  0xd7   : > { %3994 = vmatprep.mubr.bf16.mxu1 %v3007_v6  ;;  %v3017_v57 = vshrl.u32 %v2265_v34, 16  ;;  %v3019_v61 = vshll.u32 %v2265_v34, 16  ;;  %v3044_v14 = vshll.u32 %v2666_v8, 16  ;;  %v2269_v31 = vshrl.u32 %v4950_v16, 16 }
  0xd8   : > { %v2660_v58 = vor.u32 %v2659_v37, %v2655_v0  ;;  %v2271_v33 = vshll.u32 %v4950_v16, 16  ;;  %v3014_v38 = vor.u32 %v3013_v25, %v3009_v15  ;;  %v3033_v20 = vrot.slane %v3031_v26, 1  ;;  %v5885_v16 = vld [vmem:[%s6118_s21 + $0x68] ss:$0 sps:$4 sm:$0x11]  }
  0xd9   : > { %v3021_v19 = vrot.slane %v3019_v61, 1  ;;  %v3046_v7 = vrot.slane %v3044_v14, 1  ;;  %v6480_v41 = vrot.slane %v2276_v45, 1  ;;  %v2280_v30 = vshrl.u32 %v5877_v53, 16  ;;  %v4870_v61 = vld [vmem:[%s6118_s21 + $0x64] sm:$0xf] }
  0xda   : > { %v2665_v29 = vsel %vm473_vm0, %v2660_v58, %v2664_v12  ;;  %v2273_v40 = vrot.slane %v2271_v33, 1  ;;  %v3015_v42 = vsel %vm473_vm0, %v3014_v38, %v2264_v48  ;;  %v3034_v43 = vor.u32 %v3033_v20, %v3029_v22 }
  0xdb   : > { %v3022_v28 = vor.u32 %v3021_v19, %v3017_v57  ;;  %v3037_v4 = vshrl.u32 %v2665_v29, 16  ;;  %v3039_v21 = vshll.u32 %v2665_v29, 16  ;;  %v4998_v44 = vcombine.low %v4902_v24, %v4867_v23  ;;  %v1901_v29 = vld [vmem:[%s6118_s21 + $0x54] sm:$0xf] }
  0xdc   : > { %v2274_v50 = vor.u32 %v2273_v40, %v2269_v31  ;;  %v3064_v49 = vshll.u32 %v2280_v30, 16  ;;  %v2676_v32 = vshll.u32 %v5879_v11, 16  ;;  %v2680_v51 = vshrl.u32 %v5879_v11, 16  ;;  %v6506_v30 = vld [vmem:[%s6118_s21 + $0x64] sm:$0xf] }
  0xdd   : > { %3834 = vmatmul.mubr.bf16.gmra.mrb[80].mxu0 %v2975_v63  ;;  %v3027_v39 = vsel %vm473_vm0, %v3022_v28, %v3026_v2  ;;  %v3041_v13 = vrot.slane %v3039_v21, 1  ;;  %v3035_v55 = vsel %vm473_vm0, %v3034_v43, %v2664_v12  ;;  %v2669_v59 = vshrl.u32 %v4998_v44, 16  ;;  %v4869_v21 = vld [vmem:[%s6118_s21 + $0x60] sm:$0xf] }
  0xde   : > { %3995 = vmatmul.mubr.bf16.gmra.mrb[80].mxu1 %v2995_v1  ;;  %3841 = vmatprep.mubr.bf16.mxu0 %v3027_v39  ;;  %v2671_v60 = vshll.u32 %v4998_v44, 16  ;;  %v2279_v48 = vsel %vm473_vm0, %v2274_v50, %v6480_v41  ;;  %v3066_v63 = vrot.slane %v3064_v49, 1  ;;  %v2678_v36 = vrot.slane %v2676_v32, 1 }
  0xdf   : > { %v3042_v52 = vor.u32 %v3041_v13, %v3037_v4  ;;  %v3084_v0 = vshll.u32 %v2680_v51, 16  ;;  %v3057_v1 = vshrl.u32 %v2279_v48, 16  ;;  %v3059_v2 = vshll.u32 %v2279_v48, 16 }
  0xe0   : > { %v2673_v3 = vrot.slane %v2671_v60, 1  ;;  %v4924_v53 = vcombine.low %v1898_v46, %v6466_v54  ;;  %v4972_v6 = vcombine.low %v4866_v35, %v4867_v23  ;;  %v4951_v34 = vcombine.low %v1935_v27, %v6486_v47  ;;  %v1936_v46 = vld [vmem:[%s6118_s21 + $0x60] sm:$0xe]  ;;  %v5889_v35 = vld [vmem:[%s6118_s21 + $0x68] ss:$0 sps:$4 sm:$0x11]  }
  0xe1   : > { %v3047_v56 = vsel %vm473_vm0, %v3042_v52, %v3046_v7  ;;  %v3086_v5 = vrot.slane %v3084_v0, 1  ;;  %v3061_v8 = vrot.slane %v3059_v2, 1  ;;  %v2290_v10 = vshll.u32 %v5883_v62, 16  ;;  %v4904_v2 = vld [vmem:[%s6118_s21 + $0x6c] sm:$0xe] }
  0xe2   : > { %4002 = vmatprep.mubr.bf16.mxu1 %v3047_v56  ;;  %v2674_v9 = vor.u32 %v2673_v3, %v2669_v59  ;;  %v2294_v57 = vshrl.u32 %v5883_v62, 16  ;;  %v3049_v37 = vshrl.u32 %v4924_v53, 16  ;;  %v3051_v12 = vshll.u32 %v4924_v53, 16 }
  0xe3   : > { %v3069_v14 = vshrl.u32 %v4972_v6, 16  ;;  %v3071_v15 = vshll.u32 %v4972_v6, 16  ;;  %v3062_v18 = vor.u32 %v3061_v8, %v3057_v1  ;;  %v2283_v54 = vshrl.u32 %v4951_v34, 16  ;;  %v5891_v6 = vld [vmem:[%s6118_s21 + $0x74] ss:$0 sps:$4 sm:$0x11]  }
  0xe4   : > { %v2679_v19 = vsel %vm473_vm0, %v2674_v9, %v2678_v36  ;;  %v2285_v58 = vshll.u32 %v4951_v34, 16  ;;  %v3053_v24 = vrot.slane %v3051_v12, 1  ;;  %v6501_v26 = vrot.slane %v2290_v10, 1 }
  0xe5   : > { %3842 = vmatmul.mubr.bf16.gmra.mrb[84].mxu0 %v3015_v42  ;;  %v3077_v45 = vshrl.u32 %v2679_v19, 16  ;;  %v3079_v23 = vshll.u32 %v2679_v19, 16  ;;  %v3073_v7 = vrot.slane %v3071_v15, 1  ;;  %v3067_v25 = vsel %vm473_vm0, %v3062_v18, %v3066_v63  ;;  %v4873_v63 = vld [vmem:[%s6118_s21 + $0x70] sm:$0xf] }
  0xe6   : > { %4003 = vmatmul.mubr.bf16.gmra.mrb[84].mxu1 %v3035_v55  ;;  %v2287_v22 = vrot.slane %v2285_v58, 1  ;;  %v3104_v28 = vshll.u32 %v2294_v57, 16  ;;  %3849 = vmatprep.mubr.bf16.mxu0 %v3067_v25  ;;  %v3054_v33 = vor.u32 %v3053_v24, %v3049_v37  ;;  %v4999_v4 = vcombine.low %v4903_v17, %v4870_v61  ;;  %v6528_v58 = vld [vmem:[%s6118_s21 + $0x70] sm:$0xf] }
  0xe7   : > { %v3081_v31 = vrot.slane %v3079_v23, 1  ;;  %v3074_v11 = vor.u32 %v3073_v7, %v3069_v14  ;;  %v2690_v39 = vshll.u32 %v5885_v16, 16  ;;  %v2694_v40 = vshrl.u32 %v5885_v16, 16  ;;  %v1904_v14 = vld [vmem:[%s6118_s21 + $0x60] sm:$0xf] }
  0xe8   : > { %v2288_v38 = vor.u32 %v2287_v22, %v2283_v54  ;;  %v3106_v20 = vrot.slane %v3104_v28, 1  ;;  %v3055_v42 = vsel %vm473_vm0, %v3054_v33, %v6480_v41  ;;  %v2683_v44 = vshrl.u32 %v4999_v4, 16  ;;  %v4872_v54 = vld [vmem:[%s6118_s21 + $0x6c] sm:$0xf] }
  0xe9   : > { %v3082_v13 = vor.u32 %v3081_v31, %v3077_v45  ;;  %v3075_v43 = vsel %vm473_vm0, %v3074_v11, %v2678_v36  ;;  %v2685_v49 = vshll.u32 %v4999_v4, 16  ;;  %v2692_v32 = vrot.slane %v2690_v39, 1 }
  0xea   : > { %v2293_v50 = vsel %vm473_vm0, %v2288_v38, %v6501_v26  ;;  %v3124_v51 = vshll.u32 %v2694_v40, 16  ;;  %v4926_v41 = vcombine.low %v1901_v29, %v6486_v47  ;;  %v4974_v62 = vcombine.low %v4869_v21, %v4870_v61  ;;  %v1937_v29 = vld [vmem:[%s6118_s21 + $0x6c] sm:$0xe] }
  0xeb   : > { %v3087_v27 = vsel %vm473_vm0, %v3082_v13, %v3086_v5  ;;  %v3097_v52 = vshrl.u32 %v2293_v50, 16  ;;  %v3099_v55 = vshll.u32 %v2293_v50, 16  ;;  %v2687_v59 = vrot.slane %v2685_v49, 1  ;;  %v5895_v50 = vld [vmem:[%s6118_s21 + $0x74] ss:$0 sps:$4 sm:$0x11]  }
  0xec   : > { %4010 = vmatprep.mubr.bf16.mxu1 %v3087_v27  ;;  %v3126_v60 = vrot.slane %v3124_v51, 1  ;;  %v4952_v48 = vcombine.low %v1936_v46, %v6506_v30  ;;  %v3089_v0 = vshrl.u32 %v4926_v41, 16  ;;  %v3091_v56 = vshll.u32 %v4926_v41, 16  ;;  %v4876_v49 = vld [vmem:[%s6118_s21 + $0x7c] sm:$0xf] }
  0xed   : > { %3850 = vmatmul.mubr.bf16.gmra.mrb[88].mxu0 %v3055_v42  ;;  %v3101_v36 = vrot.slane %v3099_v55, 1  ;;  %v2304_v1 = vshll.u32 %v5889_v35, 16  ;;  %v2688_v3 = vor.u32 %v2687_v59, %v2683_v44  ;;  %v3109_v5 = vshrl.u32 %v4974_v62, 16 }
  0xee   : > { %4011 = vmatmul.mubr.bf16.gmra.mrb[88].mxu1 %v3075_v43  ;;  %v3111_v53 = vshll.u32 %v4974_v62, 16  ;;  %v2297_v47 = vshrl.u32 %v4952_v48, 16  ;;  %v3093_v8 = vrot.slane %v3091_v56, 1  ;;  %v2299_v9 = vshll.u32 %v4952_v48, 16  ;;  %v4905_v62 = vld [vmem:[%s6118_s21 + $0x78] sm:$0xe] }
  0xef   : > { %v3102_v34 = vor.u32 %v3101_v36, %v3097_v52  ;;  %v6521_v10 = vrot.slane %v2304_v1, 1  ;;  %v2693_v57 = vsel %vm473_vm0, %v2688_v3, %v2692_v32  ;;  %v2308_v37 = vshrl.u32 %v5889_v35, 16  ;;  %v5897_v3 = vld [vmem:[%s6118_s21 + $0x80] ss:$0 sps:$4 sm:$0x11]  }
  0xf0   : > { %v3113_v61 = vrot.slane %v3111_v53, 1  ;;  %v5000_v12 = vcombine.low %v4904_v2, %v4873_v63  ;;  %v3117_v17 = vshrl.u32 %v2693_v57, 16  ;;  %v3119_v18 = vshll.u32 %v2693_v57, 16 }
  0xf1   : > { %v3107_v15 = vsel %vm473_vm0, %v3102_v34, %v3106_v20  ;;  %v3094_v19 = vor.u32 %v3093_v8, %v3089_v0  ;;  %v2301_v45 = vrot.slane %v2299_v9, 1  ;;  %v3144_v23 = vshll.u32 %v2308_v37, 16 }
  0xf2   : > { %3857 = vmatprep.mubr.bf16.mxu0 %v3107_v15  ;;  %v3114_v16 = vor.u32 %v3113_v61, %v3109_v5  ;;  %v2697_v24 = vshrl.u32 %v5000_v12, 16  ;;  %v3121_v7 = vrot.slane %v3119_v18, 1  ;;  %v2699_v22 = vshll.u32 %v5000_v12, 16  ;;  %v1907_v61 = vld [vmem:[%s6118_s21 + $0x6c] sm:$0xf] }
  0xf3   : > { %v3095_v25 = vsel %vm473_vm0, %v3094_v19, %v6501_v26  ;;  %v2704_v28 = vshll.u32 %v5891_v6, 16  ;;  %v2302_v33 = vor.u32 %v2301_v45, %v2297_v47  ;;  %v3146_v11 = vrot.slane %v3144_v23, 1  ;;  %v6550_v18 = vld [vmem:[%s6118_s21 + $0x7c] sm:$0xf] }
  0xf4   : > { %v3115_v31 = vsel %vm473_vm0, %v3114_v16, %v2692_v32  ;;  %v2708_v4 = vshrl.u32 %v5891_v6, 16  ;;  %v3122_v21 = vor.u32 %v3121_v7, %v3117_v17  ;;  %v2701_v38 = vrot.slane %v2699_v22, 1  ;;  %v4875_v17 = vld [vmem:[%s6118_s21 + $0x78] sm:$0xf] }
  0xf5   : > { %3858 = vmatmul.mubr.bf16.gmra.mrb[92].mxu0 %v3095_v25  ;;  %v2706_v20 = vrot.slane %v2704_v28, 1  ;;  %v4928_v39 = vcombine.low %v1904_v14, %v6506_v30  ;;  %v2307_v40 = vsel %vm473_vm0, %v2302_v33, %v6521_v10  ;;  %v4976_v13 = vcombine.low %v4872_v54, %v4873_v63  ;;  %v5901_v23 = vld [vmem:[%s6118_s21 + $0x80] ss:$0 sps:$4 sm:$0x11]  }
  0xf6   : > { %v3164_v26 = vshll.u32 %v2708_v4, 16  ;;  %v4953_v42 = vcombine.low %v1937_v29, %v6528_v58  ;;  %v3127_v43 = vsel %vm473_vm0, %v3122_v21, %v3126_v60  ;;  %v3137_v44 = vshrl.u32 %v2307_v40, 16 }
  0xf7   : > { %v3139_v46 = vshll.u32 %v2307_v40, 16  ;;  %v2702_v35 = vor.u32 %v2701_v38, %v2697_v24  ;;  %4018 = vmatprep.mubr.bf16.mxu1 %v3127_v43  ;;  %v3129_v51 = vshrl.u32 %v4928_v39, 16  ;;  %v3131_v27 = vshll.u32 %v4928_v39, 16 }
  0xf8   : > { %v3166_v32 = vrot.slane %v3164_v26, 1  ;;  %v3149_v30 = vshrl.u32 %v4976_v13, 16  ;;  %4019 = vmatmul.mubr.bf16.gmra.mrb[92].mxu1 %v3115_v31  ;;  %v3151_v41 = vshll.u32 %v4976_v13, 16  ;;  %v2311_v59 = vshrl.u32 %v4953_v42, 16  ;;  %v4906_v13 = vld [vmem:[%s6118_s21 + $0x84] sm:$0xe] }
  0xf9   : > { %v3141_v52 = vrot.slane %v3139_v46, 1  ;;  %v2707_v55 = vsel %vm473_vm0, %v2702_v35, %v2706_v20  ;;  %v3133_v63 = vrot.slane %v3131_v27, 1  ;;  %v2313_v36 = vshll.u32 %v4953_v42, 16  ;;  %v5903_v27 = vld [vmem:[%s6118_s21 + $0x8c] ss:$0 sps:$4 sm:$0x11]  }
  0xfa   : > { %v3157_v60 = vshrl.u32 %v2707_v55, 16  ;;  %v3159_v48 = vshll.u32 %v2707_v55, 16  ;;  %v3153_v56 = vrot.slane %v3151_v41, 1  ;;  %v2318_v1 = vshll.u32 %v5895_v50, 16 }
  0xfb   : > { %v3142_v0 = vor.u32 %v3141_v52, %v3137_v44  ;;  %v2322_v2 = vshrl.u32 %v5895_v50, 16  ;;  %v3134_v53 = vor.u32 %v3133_v63, %v3129_v51  ;;  %v2315_v47 = vrot.slane %v2313_v36, 1 }
  0xfc   : > { %v3161_v5 = vrot.slane %v3159_v48, 1  ;;  %v5001_v6 = vcombine.low %v4905_v62, %v4876_v49  ;;  %v3154_v8 = vor.u32 %v3153_v56, %v3149_v30  ;;  %v2320_v9 = vrot.slane %v2318_v1, 1  ;;  %v1910_v56 = vld [vmem:[%s6118_s21 + $0x78] sm:$0xf] }
  0xfd   : > { %v3147_v34 = vsel %vm473_vm0, %v3142_v0, %v3146_v11  ;;  %v3184_v57 = vshll.u32 %v2322_v2, 16  ;;  %v3135_v12 = vsel %vm473_vm0, %v3134_v53, %v6521_v10  ;;  %v2316_v14 = vor.u32 %v2315_v47, %v2311_v59  ;;  %v1938_v10 = vld [vmem:[%s6118_s21 + $0x78] sm:$0xe] }
  0xfe   : > { %3865 = vmatprep.mubr.bf16.mxu0 %v3147_v34  ;;  %v3162_v37 = vor.u32 %v3161_v5, %v3157_v60  ;;  %v2711_v15 = vshrl.u32 %v5001_v6, 16  ;;  %v3155_v19 = vsel %vm473_vm0, %v3154_v8, %v2706_v20  ;;  %v2713_v16 = vshll.u32 %v5001_v6, 16 }
  0xff   : > { %3866 = vmatmul.mubr.bf16.gmra.mrb[96].mxu0 %v3135_v12  ;;  %v3186_v54 = vrot.slane %v3184_v57, 1  ;;  %v2718_v45 = vshll.u32 %v5897_v3, 16  ;;  %v2321_v7 = vsel %vm473_vm0, %v2316_v14, %v2320_v9  ;;  %v2722_v25 = vshrl.u32 %v5897_v3, 16 }
 0x100   : > { %v3167_v24 = vsel %vm473_vm0, %v3162_v37, %v3166_v32  ;;  %v4930_v22 = vcombine.low %v1907_v61, %v6528_v58  ;;  %v3177_v28 = vshrl.u32 %v2321_v7, 16  ;;  %v3179_v29 = vshll.u32 %v2321_v7, 16  ;;  %v4879_v58 = vld [vmem:[%s6118_s21 + $0x88] sm:$0xf]  ;;  %v4878_v37 = vld [vmem:[%s6118_s21 + $0x84] sm:$0xf] }
 0x101   : > { %4026 = vmatprep.mubr.bf16.mxu1 %v3167_v24  ;;  %v2715_v31 = vrot.slane %v2713_v16, 1  ;;  %v2720_v33 = vrot.slane %v2718_v45, 1  ;;  %v3204_v11 = vshll.u32 %v2722_v25, 16  ;;  %v4978_v38 = vcombine.low %v4875_v17, %v4876_v49 }
 0x102   : > { %4027 = vmatmul.mubr.bf16.gmra.mrb[96].mxu1 %v3155_v19  ;;  %v3169_v4 = vshrl.u32 %v4930_v22, 16  ;;  %v3171_v21 = vshll.u32 %v4930_v22, 16  ;;  %v3181_v20 = vrot.slane %v3179_v29, 1  ;;  %v4954_v40 = vcombine.low %v1938_v10, %v6550_v18 }
 0x103   : > { %v2716_v39 = vor.u32 %v2715_v31, %v2711_v15  ;;  %v2332_v26 = vshll.u32 %v5901_v23, 16  ;;  %v3206_v42 = vrot.slane %v3204_v11, 1  ;;  %v3189_v44 = vshrl.u32 %v4978_v38, 16 }
 0x104   : > { %v3173_v43 = vrot.slane %v3171_v21, 1  ;;  %v3191_v46 = vshll.u32 %v4978_v38, 16  ;;  %v3182_v35 = vor.u32 %v3181_v20, %v3177_v28  ;;  %v2325_v32 = vshrl.u32 %v4954_v40, 16 }
 0x105   : > { %v2721_v50 = vsel %vm473_vm0, %v2716_v39, %v2720_v33  ;;  %v2327_v51 = vshll.u32 %v4954_v40, 16  ;;  %v6564_v62 = vrot.slane %v2332_v26, 1  ;;  %v2336_v60 = vshrl.u32 %v5901_v23, 16  ;;  %v1914_v40 = vld [vmem:[%s6118_s21 + $0x88] sm:$0xf] }
 0x106   : > { %v3197_v49 = vshrl.u32 %v2721_v50, 16  ;;  %v3199_v30 = vshll.u32 %v2721_v50, 16  ;;  %v3174_v52 = vor.u32 %v3173_v43, %v3169_v4  ;;  %v3193_v55 = vrot.slane %v3191_v46, 1  ;;  %v5907_v43 = vld [vmem:[%s6118_s21 + $0x8c] ss:$0 sps:$4 sm:$0x11]  }
 0x107   : > { %v3187_v41 = vsel %vm473_vm0, %v3182_v35, %v3186_v54  ;;  %v2329_v59 = vrot.slane %v2327_v51, 1  ;;  %v5002_v0 = vcombine.low %v4906_v13, %v4879_v58  ;;  %v3224_v3 = vshll.u32 %v2336_v60, 16 }
 0x108   : > { %3873 = vmatprep.mubr.bf16.mxu0 %v3187_v41  ;;  %v3201_v48 = vrot.slane %v3199_v30, 1  ;;  %v3175_v63 = vsel %vm473_vm0, %v3174_v52, %v2320_v9  ;;  %v3194_v36 = vor.u32 %v3193_v55, %v3189_v44  ;;  %v2732_v5 = vshll.u32 %v5903_v27, 16 }
 0x109   : > { %3874 = vmatmul.mubr.bf16.gmra.mrb[100].mxu0 %v3175_v63  ;;  %v2330_v2 = vor.u32 %v2329_v59, %v2325_v32  ;;  %v2736_v53 = vshrl.u32 %v5903_v27, 16  ;;  %v2725_v57 = vshrl.u32 %v5002_v0, 16  ;;  %v2727_v61 = vshll.u32 %v5002_v0, 16  ;;  %v5909_v0 = vld [vmem:[%s6118_s21 + $0x98] ss:$0 sps:$4 sm:$0x11]  }
 0x10a   : > { %v3202_v34 = vor.u32 %v3201_v48, %v3197_v49  ;;  %v3195_v8 = vsel %vm473_vm0, %v3194_v36, %v2720_v33  ;;  %v3226_v15 = vrot.slane %v3224_v3, 1  ;;  %v6573_v17 = vrot.slane %v2732_v5, 1 }
 0x10b   : > { %v2335_v14 = vsel %vm473_vm0, %v2330_v2, %v6564_v62  ;;  %v6575_v19 = vshll.u32 %v2736_v53, 16  ;;  %v2729_v7 = vrot.slane %v2727_v61, 1  ;;  %v4932_v10 = vcombine.low %v1910_v56, %v6550_v18 }
 0x10c   : > { %v3207_v45 = vsel %vm473_vm0, %v3202_v34, %v3206_v42  ;;  %v3217_v23 = vshrl.u32 %v2335_v14, 16  ;;  %v3219_v24 = vshll.u32 %v2335_v14, 16  ;;  %v4980_v28 = vcombine.low %v4878_v37, %v4879_v58  ;;  %v1939_v58 = vld [vmem:[%s6118_s21 + $0x84] sm:$0xe] }
 0x10d   : > { %4034 = vmatprep.mubr.bf16.mxu1 %v3207_v45  ;;  %v3246_v22 = vrot.slane %v6575_v19, 1  ;;  %v2730_v33 = vor.u32 %v2729_v7, %v2725_v57  ;;  %v3209_v21 = vshrl.u32 %v4932_v10, 16  ;;  %v3211_v38 = vshll.u32 %v4932_v10, 16 }
 0x10e   : > { %4035 = vmatmul.mubr.bf16.gmra.mrb[100].mxu1 %v3195_v8  ;;  %v3221_v31 = vrot.slane %v3219_v24, 1  ;;  %v3229_v20 = vshrl.u32 %v4980_v28, 16  ;;  %v3231_v39 = vshll.u32 %v4980_v28, 16  ;;  %v4955_v36 = vcombine.low %v1939_v58, %v1914_v40 }
 0x10f   : > { %v2735_v13 = vsel %vm473_vm0, %v2730_v33, %v6573_v17  ;;  %v3213_v50 = vrot.slane %v3211_v38, 1  ;;  %v2346_v53 = vshll.u32 %v5907_v43, 16  ;;  %v2746_v24 = vshll.u32 %v5909_v0, 16 }
 0x110   : > { %v5224_v1 = vpop.f32.mrb[0].mxu0  ;;  %v3222_v26 = vor.u32 %v3221_v31, %v3217_v23  ;;  %v3237_v46 = vshrl.u32 %v2735_v13, 16  ;;  %v3239_v35 = vshll.u32 %v2735_v13, 16  ;;  %v3233_v32 = vrot.slane %v3231_v39, 1 }
 0x111   : > { %v5336_v47 = vpop.f32.mrb[0].mxu1  ;;  %v5225_v6 = vpop.f32.mrb[1].mxu0  ;;  %v3214_v48 = vor.u32 %v3213_v50, %v3209_v21  ;;  %v2339_v37 = vshrl.u32 %v4955_v36, 16  ;;  %v2748_v33 = vrot.slane %v2746_v24, 1 }
 0x112   : > { %v5337_v9 = vpop.f32.mrb[1].mxu1  ;;  %v5227_v12 = vpop.f32.mrb[2].mxu0  ;;  %v5226_v29 = vadd.f32 %v5225_v6, %v5224_v1  ;;  %v3227_v49 = vsel %vm473_vm0, %v3222_v26, %v3226_v15  ;;  %v3241_v60 = vrot.slane %v3239_v35, 1  ;;  %v3234_v63 = vor.u32 %v3233_v32, %v3229_v20  ;;  %v4907_v6 = vld [vmem:[%s6118_s21 + $0x90] sm:$0xe] }
 0x113   : > { %v5339_v54 = vpop.f32.mrb[2].mxu1  ;;  %v5228_v16 = vpop.f32.mrb[3].mxu0  ;;  %v5338_v11 = vadd.f32 %v5337_v9, %v5336_v47  ;;  %3881 = vmatprep.mubr.bf16.mxu0 %v3227_v49  ;;  %v4882_v47 = vld [vmem:[%s6118_s21 + $0x94] sm:$0xf]  ;;  %v3215_v57 = vsel %vm473_vm0, %v3214_v48, %v6564_v62  ;;  %v1913_v9 = vld [vmem:[%s6118_s21 + $0x84] sm:$0xf] }
 0x114   : > { %v5340_v25 = vpop.f32.mrb[3].mxu1  ;;  %v5229_v4 = vadd.f32 %v5228_v16, %v5227_v12  ;;  %v3242_v8 = vor.u32 %v3241_v60, %v3237_v46  ;;  %v3235_v61 = vsel %vm473_vm0, %v3234_v63, %v6573_v17  ;;  %v4881_v12 = vld [vmem:[%s6118_s21 + $0x90] sm:$0xf]  ;;  %3882 = vmatmul.mubr.bf16.gmra.mrb[104].mxu0 %v3215_v57  ;;  %v2341_v15 = vshll.u32 %v4955_v36, 16  ;;  %v6649_v49 = vld [vmem:[%s6118_s21 + $0x94] sm:$0xf] }
 0x115   : > { %v1486_v42 = vadd.f32 %v5338_v11, %v5226_v29  ;;  %v5341_v18 = vadd.f32 %v5340_v25, %v5339_v54  ;;  %v2348_v54 = vrot.slane %v2346_v53, 1  ;;  %v2350_v16 = vshrl.u32 %v5907_v43, 16 }
 0x116   : > { %v3247_v45 = vsel %vm473_vm0, %v3242_v8, %v3246_v22  ;;  %v5003_v23 = vcombine.low %v4907_v6, %v4882_v47  ;;  %v2750_v62 = vshrl.u32 %v5909_v0, 16  ;;  %v2343_v7 = vrot.slane %v2341_v15, 1 }
 0x117   : > { %v5144_v30 = vpack.c.bf16 %v1486_v42, %v1486_v42  ;;  %v1810_v52 = vmul.f32 %v1486_v42, %v1486_v42  ;;  %v1489_v55 = vadd.f32 %v5341_v18, %v5229_v4  ;;  %4042 = vmatprep.mubr.bf16.mxu1 %v3247_v45  ;;  %v6623_v17 = vshll.u32 %v2350_v16, 16 }
 0x118   : > { %v6587_v44 = vpop.f32.mrb[4].mxu0  ;;  %v4934_v25 = vcombine.low %v1913_v9, %v1914_v40  ;;  %v4982_v10 = vcombine.low %v4881_v12, %v4882_v47  ;;  %4043 = vmatmul.mubr.bf16.gmra.mrb[104].mxu1 %v3235_v61  ;;  %v2739_v29 = vshrl.u32 %v5003_v23, 16  ;;  %v2741_v31 = vshll.u32 %v5003_v23, 16  ;;  %v4885_v61 = vld [vmem:[%s6118_s21 + $0xa0] sm:$0xf] }
 0x119   : > { %v6589_v51 = vpop.f32.mrb[4].mxu1  ;;  %v6591_v27 = vpop.f32.mrb[5].mxu0  ;;  %1740 = vst [vmem:[%s6604_s24] sm:$0xf] %v5144_v30  ;;  %v5145_v2 = vpack.c.bf16 %v1489_v55, %v1489_v55  ;;  %v6607_v3 = vadd.f32 %v1489_v55, %v1486_v42  ;;  %v1811_v5 = vmul.f32 %v1489_v55, %v1489_v55  ;;  %v6627_v11 = vshll.u32 %v2750_v62, 16  ;;  %v1940_v30 = vld [vmem:[%s6118_s21 + $0x90] sm:$0xe] }
 0x11a   : > { %v6594_v41 = vpop.f32.mrb[5].mxu1  ;;  %v6596_v59 = vpop.f32.mrb[6].mxu0  ;;  %v2344_v4 = vor.u32 %v2343_v7, %v2339_v37  ;;  %v3266_v21 = vrot.slane %v6623_v17, 1  ;;  %v3249_v38 = vshrl.u32 %v4934_v25, 16  ;;  %v3251_v20 = vshll.u32 %v4934_v25, 16 }
 0x11b   : > { %v6599_v56 = vpop.f32.mrb[6].mxu1  ;;  %v6601_v1 = vpop.f32.mrb[7].mxu0  ;;  %1741 = vst [vmem:[%s6604_s24 + $0x8] sm:$0xf] %v5145_v2  ;;  %v6618_v14 = vadd.f32 %v1811_v5, %v1810_v52  ;;  %v2743_v26 = vrot.slane %v2741_v31, 1  ;;  %v3286_v13 = vrot.slane %v6627_v11, 1  ;;  %v5232_v50 = vadd.f32 %v6591_v27, %v6587_v44 }
 0x11c   : > { %v5346_v34 = vpop.f32.mrb[7].mxu1  ;;  %v3269_v42 = vshrl.u32 %v4982_v10, 16  ;;  %v3271_v18 = vshll.u32 %v4982_v10, 16  ;;  %v2349_v46 = vsel %vm473_vm0, %v2344_v4, %v2348_v54  ;;  %v3253_v35 = vrot.slane %v3251_v20, 1  ;;  %v4908_v37 = vld [vmem:[%s6118_s21 + $0x9c] sm:$0xe] }
 0x11d   : > { %v5344_v32 = vadd.f32 %v6594_v41, %v6589_v51  ;;  %v3257_v55 = vshrl.u32 %v2349_v46, 16  ;;  %v3259_v60 = vshll.u32 %v2349_v46, 16  ;;  %v2744_v48 = vor.u32 %v2743_v26, %v2739_v29  ;;  %v5913_v5 = vld [vmem:[%s6118_s21 + $0x98] ss:$0 sps:$4 sm:$0x11]  }
 0x11e   : > { %v3273_v63 = vrot.slane %v3271_v18, 1  ;;  %v3254_v36 = vor.u32 %v3253_v35, %v3249_v38  ;;  %v5235_v44 = vadd.f32 %v6601_v1, %v6596_v59  ;;  %v5347_v27 = vadd.f32 %v5346_v34, %v6599_v56  ;;  %v5915_v12 = vld [vmem:[%s6118_s21 + $0xa4] ss:$0 sps:$4 sm:$0x11]   ;;  %v1916_v26 = vld [vmem:[%s6118_s21 + $0x90] sm:$0xf] }
 0x11f   : > { %v1494_v0 = vadd.f32 %v5344_v32, %v5232_v50  ;;  %v3261_v2 = vrot.slane %v3259_v60, 1  ;;  %v2749_v51 = vsel %vm473_vm0, %v2744_v48, %v2748_v33  ;;  %v4956_v53 = vcombine.low %v1940_v30, %v6649_v49  ;;  %v4884_v35 = vld [vmem:[%s6118_s21 + $0x9c] sm:$0xf] }
 0x120   : > { %v6625_v28 = vpop.f32.mrb[8].mxu0  ;;  %v3274_v41 = vor.u32 %v3273_v63, %v3269_v42  ;;  %v3277_v47 = vshrl.u32 %v2749_v51, 16  ;;  %v3279_v6 = vshll.u32 %v2749_v51, 16  ;;  %v3255_v8 = vsel %vm473_vm0, %v3254_v36, %v2348_v54 }
 0x121   : > { %v6629_v19 = vpop.f32.mrb[8].mxu1  ;;  %v6631_v22 = vpop.f32.mrb[9].mxu0  ;;  %v5146_v57 = vpack.c.bf16 %v1494_v0, %v1494_v0  ;;  %v3262_v59 = vor.u32 %v3261_v2, %v3257_v55  ;;  %v1773_v1 = vadd.f32 %v6607_v3, %v1494_v0  ;;  %v1812_v34 = vmul.f32 %v1494_v0, %v1494_v0  ;;  %v6699_v2 = vld [vmem:[%s6118_s21 + $0xa0] sm:$0xf] }
 0x122   : > { %v6634_v39 = vpop.f32.mrb[9].mxu1  ;;  %v6636_v40 = vpop.f32.mrb[10].mxu0  ;;  %v3275_v56 = vsel %vm473_vm0, %v3274_v41, %v2748_v33  ;;  %v3281_v45 = vrot.slane %v3279_v6, 1  ;;  %v1497_v23 = vadd.f32 %v5347_v27, %v5235_v44  ;;  %v2353_v54 = vshrl.u32 %v4956_v53, 16 }
 0x123   : > { %v6639_v58 = vpop.f32.mrb[10].mxu1  ;;  %v6641_v43 = vpop.f32.mrb[11].mxu0  ;;  %1742 = vst [vmem:[%s6604_s24 + $0x10] sm:$0xf] %v5146_v57  ;;  %v2355_v24 = vshll.u32 %v4956_v53, 16  ;;  %v3267_v17 = vsel %vm473_vm0, %v3262_v59, %v3266_v21  ;;  %v1843_v3 = vadd.f32 %v6618_v14, %v1812_v34  ;;  %v2360_v25 = vshll.u32 %v5913_v5, 16 }
 0x124   : > { %v6652_v52 = vpop.f32.mrb[11].mxu1  ;;  %v2364_v10 = vshrl.u32 %v5913_v5, 16  ;;  %3889 = vmatprep.mubr.bf16.mxu0 %v3267_v17  ;;  %v3282_v33 = vor.u32 %v3281_v45, %v3277_v47  ;;  %v5147_v4 = vpack.c.bf16 %v1497_v23, %v1497_v23  ;;  %v1774_v38 = vadd.f32 %v1773_v1, %v1497_v23  ;;  %v1941_v47 = vld [vmem:[%s6118_s21 + $0x9c] sm:$0xe] }
 0x125   : > { %v1813_v20 = vmul.f32 %v1497_v23, %v1497_v23  ;;  %3890 = vmatmul.mubr.bf16.gmra.mrb[108].mxu0 %v3255_v8  ;;  %v2357_v21 = vrot.slane %v2355_v24, 1  ;;  %v6686_v18 = vrot.slane %v2360_v25, 1  ;;  %v5004_v46 = vcombine.low %v4908_v37, %v4885_v61 }
 0x126   : > { %v3304_v14 = vshll.u32 %v2364_v10, 16  ;;  %v3287_v50 = vsel %vm473_vm0, %v3282_v33, %v3286_v13  ;;  %1743 = vst [vmem:[%s6604_s24 + $0x18] sm:$0xf] %v5147_v4  ;;  %v2760_v30 = vshll.u32 %v5915_v12, 16  ;;  %v2764_v55 = vshrl.u32 %v5915_v12, 16 }
 0x127   : > { %v6693_v32 = vadd.f32 %v1843_v3, %v1813_v20  ;;  %4050 = vmatprep.mubr.bf16.mxu1 %v3287_v50  ;;  %v2358_v60 = vor.u32 %v2357_v21, %v2353_v54  ;;  %v2753_v63 = vshrl.u32 %v5004_v46, 16  ;;  %v2755_v36 = vshll.u32 %v5004_v46, 16  ;;  %v4909_v46 = vld [vmem:[%s6118_s21 + $0xa8] sm:$0xe] }
 0x128   : > { %v6663_v9 = vpop.f32.mrb[12].mxu0  ;;  %v3306_v48 = vrot.slane %v3304_v14, 1  ;;  %4051 = vmatmul.mubr.bf16.gmra.mrb[108].mxu1 %v3275_v56  ;;  %v2762_v0 = vrot.slane %v2760_v30, 1  ;;  %v6695_v44 = vshll.u32 %v2764_v55, 16  ;;  %v4936_v11 = vcombine.low %v1916_v26, %v6649_v49 }
 0x129   : > { %v6668_v15 = vpop.f32.mrb[12].mxu1  ;;  %v6670_v16 = vpop.f32.mrb[13].mxu0  ;;  %v4984_v27 = vcombine.low %v4884_v35, %v4885_v61  ;;  %v2363_v51 = vsel %vm473_vm0, %v2358_v60, %v6686_v18  ;;  %v2757_v41 = vrot.slane %v2755_v36, 1  ;;  %v5238_v5 = vadd.f32 %v6631_v22, %v6625_v28  ;;  %v5921_v60 = vld [vmem:[%s6118_s21 + $0xb0] ss:$0 sps:$4 sm:$0x11]  }
 0x12a   : > { %v6673_v62 = vpop.f32.mrb[13].mxu1  ;;  %v6675_v7 = vpop.f32.mrb[14].mxu0  ;;  %v5350_v53 = vadd.f32 %v6634_v39, %v6629_v19  ;;  %v3297_v49 = vshrl.u32 %v2363_v51, 16  ;;  %v3299_v57 = vshll.u32 %v2363_v51, 16  ;;  %v3326_v61 = vrot.slane %v6695_v44, 1 }
 0x12b   : > { %v6679_v29 = vpop.f32.mrb[14].mxu1  ;;  %v6681_v31 = vpop.f32.mrb[15].mxu0  ;;  %v3289_v37 = vshrl.u32 %v4936_v11, 16  ;;  %v2758_v1 = vor.u32 %v2757_v41, %v2753_v63  ;;  %v3291_v34 = vshll.u32 %v4936_v11, 16  ;;  %v3309_v28 = vshrl.u32 %v4984_v27, 16 }
 0x12c   : > { %v6684_v42 = vpop.f32.mrb[15].mxu1  ;;  %v3311_v22 = vshll.u32 %v4984_v27, 16  ;;  %v3301_v12 = vrot.slane %v3299_v57, 1  ;;  %v1502_v45 = vadd.f32 %v5350_v53, %v5238_v5  ;;  %v5241_v23 = vadd.f32 %v6641_v43, %v6636_v40  ;;  %v4888_v40 = vld [vmem:[%s6118_s21 + $0xac] sm:$0xf] }
 0x12d   : > { %v5353_v54 = vadd.f32 %v6652_v52, %v6639_v58  ;;  %v2763_v17 = vsel %vm473_vm0, %v2758_v1, %v2762_v0  ;;  %v3293_v3 = vrot.slane %v3291_v34, 1  ;;  %v4957_v10 = vcombine.low %v1941_v47, %v6699_v2  ;;  %v5919_v52 = vld [vmem:[%s6118_s21 + $0xa4] ss:$0 sps:$4 sm:$0x11]   ;;  %v1919_v47 = vld [vmem:[%s6118_s21 + $0x9c] sm:$0xf] }
 0x12e   : > { %v3313_v25 = vrot.slane %v3311_v22, 1  ;;  %v3302_v33 = vor.u32 %v3301_v12, %v3297_v49  ;;  %v3317_v4 = vshrl.u32 %v2763_v17, 16  ;;  %v3319_v20 = vshll.u32 %v2763_v17, 16 }
 0x12f   : > { %v5148_v26 = vpack.c.bf16 %v1502_v45, %v1502_v45  ;;  %v3294_v43 = vor.u32 %v3293_v3, %v3289_v37  ;;  %v1775_v14 = vadd.f32 %v1774_v38, %v1502_v45  ;;  %v1814_v58 = vmul.f32 %v1502_v45, %v1502_v45 }
 0x130   : > { %v6701_v13 = vpop.f32.mrb[16].mxu0  ;;  %v3314_v21 = vor.u32 %v3313_v25, %v3309_v28  ;;  %v3307_v35 = vsel %vm473_vm0, %v3302_v33, %v3306_v48  ;;  %v3321_v50 = vrot.slane %v3319_v20, 1  ;;  %v1505_v30 = vadd.f32 %v5353_v54, %v5241_v23  ;;  %v4887_v23 = vld [vmem:[%s6118_s21 + $0xa8] sm:$0xf] }
 0x131   : > { %v6710_v6 = vpop.f32.mrb[16].mxu1  ;;  %v6712_v8 = vpop.f32.mrb[17].mxu0  ;;  %1744 = vst [vmem:[%s6604_s24 + $0x20] sm:$0xf] %v5148_v26  ;;  %v2367_v55 = vshrl.u32 %v4957_v10, 16  ;;  %3897 = vmatprep.mubr.bf16.mxu0 %v3307_v35  ;;  %v3295_v36 = vsel %vm473_vm0, %v3294_v43, %v6686_v18  ;;  %v1845_v38 = vadd.f32 %v6693_v32, %v1814_v58  ;;  %v2369_v11 = vshll.u32 %v4957_v10, 16 }
 0x132   : > { %v6715_v59 = vpop.f32.mrb[17].mxu1  ;;  %v6717_v56 = vpop.f32.mrb[18].mxu0  ;;  %v3315_v44 = vsel %vm473_vm0, %v3314_v21, %v2762_v0  ;;  %v3322_v51 = vor.u32 %v3321_v50, %v3317_v4  ;;  %3898 = vmatmul.mubr.bf16.gmra.mrb[112].mxu0 %v3295_v36  ;;  %v5149_v41 = vpack.c.bf16 %v1505_v30, %v1505_v30  ;;  %v6747_v5 = vadd.f32 %v1775_v14, %v1505_v30  ;;  %v6769_v26 = vld [vmem:[%s6118_s21 + $0xac] sm:$0xf] }
 0x133   : > { %v6719_v19 = vpop.f32.mrb[18].mxu1  ;;  %v6721_v39 = vpop.f32.mrb[19].mxu0  ;;  %v1815_v53 = vmul.f32 %v1505_v30, %v1505_v30  ;;  %v2371_v0 = vrot.slane %v2369_v11, 1  ;;  %v2374_v32 = vshll.u32 %v5919_v52, 16  ;;  %v2378_v57 = vshrl.u32 %v5919_v52, 16 }
 0x134   : > { %v6727_v24 = vpop.f32.mrb[19].mxu1  ;;  %v5005_v37 = vcombine.low %v4909_v46, %v4888_v40  ;;  %v3327_v28 = vsel %vm473_vm0, %v3322_v51, %v3326_v61  ;;  %1745 = vst [vmem:[%s6604_s24 + $0x28] sm:$0xf] %v5149_v41  ;;  %v2774_v12 = vshll.u32 %v5921_v60, 16  ;;  %v2778_v45 = vshrl.u32 %v5921_v60, 16 }
 0x135   : > { %v6760_v22 = vadd.f32 %v1845_v38, %v1815_v53  ;;  %4058 = vmatprep.mubr.bf16.mxu1 %v3327_v28  ;;  %v2372_v17 = vor.u32 %v2371_v0, %v2367_v55  ;;  %v2376_v3 = vrot.slane %v2374_v32, 1  ;;  %v3344_v25 = vshll.u32 %v2378_v57, 16  ;;  %v1942_v52 = vld [vmem:[%s6118_s21 + $0xa8] sm:$0xe] }
 0x136   : > { %v2767_v10 = vshrl.u32 %v5005_v37, 16  ;;  %4059 = vmatmul.mubr.bf16.gmra.mrb[112].mxu1 %v3315_v44  ;;  %v2769_v33 = vshll.u32 %v5005_v37, 16  ;;  %v2776_v4 = vrot.slane %v2774_v12, 1  ;;  %v6765_v61 = vshll.u32 %v2778_v45, 16 }
 0x137   : > { %v4938_v20 = vcombine.low %v1919_v47, %v6699_v2  ;;  %v2377_v43 = vsel %vm473_vm0, %v2372_v17, %v2376_v3  ;;  %v3346_v21 = vrot.slane %v3344_v25, 1  ;;  %v4986_v14 = vcombine.low %v4887_v23, %v4888_v40  ;;  %v6776_v46 = vld [vmem:[%s6118_s21 + $0xb0] ss:$0 sps:$4 sm:$0x11]  }
 0x138   : > { %v6737_v63 = vpop.f32.mrb[20].mxu0  ;;  %v5244_v58 = vadd.f32 %v6670_v16, %v6663_v9  ;;  %v3337_v35 = vshrl.u32 %v2377_v43, 16  ;;  %v3339_v50 = vshll.u32 %v2377_v43, 16  ;;  %v2771_v30 = vrot.slane %v2769_v33, 1 }
 0x139   : > { %v6743_v27 = vpop.f32.mrb[20].mxu1  ;;  %v6745_v48 = vpop.f32.mrb[21].mxu0  ;;  %v3366_v55 = vrot.slane %v6765_v61, 1  ;;  %v3329_v2 = vshrl.u32 %v4938_v20, 16  ;;  %v3331_v36 = vshll.u32 %v4938_v20, 16  ;;  %v3349_v44 = vshrl.u32 %v4986_v14, 16 }
 0x13a   : > { %v6750_v49 = vpop.f32.mrb[21].mxu1  ;;  %v6752_v18 = vpop.f32.mrb[22].mxu0  ;;  %v3351_v38 = vshll.u32 %v4986_v14, 16  ;;  %v3341_v51 = vrot.slane %v3339_v50, 1  ;;  %v2772_v9 = vor.u32 %v2771_v30, %v2767_v10  ;;  %v5356_v16 = vadd.f32 %v6673_v62, %v6668_v15  ;;  %v4910_v50 = vld [vmem:[%s6118_s21 + $0xb4] sm:$0xe] }
 0x13b   : > { %v6754_v1 = vpop.f32.mrb[22].mxu1  ;;  %v6756_v34 = vpop.f32.mrb[23].mxu0  ;;  %v5247_v41 = vadd.f32 %v6681_v31, %v6675_v7  ;;  %v3333_v0 = vrot.slane %v3331_v36, 1  ;;  %v5359_v57 = vadd.f32 %v6684_v42, %v6679_v29  ;;  %v4958_v37 = vcombine.low %v1942_v52, %v6769_v26  ;;  %v5927_v20 = vld [vmem:[%s6118_s21 + $0xbc] ss:$0 sps:$4 sm:$0x11]  }
 0x13c   : > { %v6763_v54 = vpop.f32.mrb[23].mxu1  ;;  %v3353_v32 = vrot.slane %v3351_v38, 1  ;;  %v3342_v15 = vor.u32 %v3341_v51, %v3337_v35  ;;  %v2777_v62 = vsel %vm473_vm0, %v2772_v9, %v2776_v4  ;;  %v1510_v7 = vadd.f32 %v5356_v16, %v5244_v58  ;;  %v4891_v35 = vld [vmem:[%s6118_s21 + $0xb8] sm:$0xf] }
 0x13d   : > { %v2388_v31 = vshll.u32 %v6776_v46, 16  ;;  %v3357_v23 = vshrl.u32 %v2777_v62, 16  ;;  %v3359_v17 = vshll.u32 %v2777_v62, 16  ;;  %v3334_v29 = vor.u32 %v3333_v0, %v3329_v2 }
 0x13e   : > { %v3354_v42 = vor.u32 %v3353_v32, %v3349_v44  ;;  %v3347_v25 = vsel %vm473_vm0, %v3342_v15, %v3346_v21  ;;  %v5150_v10 = vpack.c.bf16 %v1510_v7, %v1510_v7  ;;  %v1777_v33 = vadd.f32 %v6747_v5, %v1510_v7  ;;  %v1922_v5 = vld [vmem:[%s6118_s21 + $0xa8] sm:$0xf] }
 0x13f   : > { %v1816_v61 = vmul.f32 %v1510_v7, %v1510_v7  ;;  %3905 = vmatprep.mubr.bf16.mxu0 %v3347_v25  ;;  %v3361_v43 = vrot.slane %v3359_v17, 1  ;;  %v3335_v14 = vsel %vm473_vm0, %v3334_v29, %v2376_v3  ;;  %v1513_v52 = vadd.f32 %v5359_v57, %v5247_v41 }
 0x140   : > { %v6779_v60 = vpop.f32.mrb[24].mxu0  ;;  %v3355_v58 = vsel %vm473_vm0, %v3354_v42, %v2776_v4  ;;  %3906 = vmatmul.mubr.bf16.gmra.mrb[116].mxu0 %v3335_v14  ;;  %1746 = vst [vmem:[%s6604_s24 + $0x30] sm:$0xf] %v5150_v10  ;;  %v2381_v21 = vshrl.u32 %v4958_v37, 16  ;;  %v2383_v2 = vshll.u32 %v4958_v37, 16  ;;  %v6813_v36 = vrot.slane %v2388_v31, 1 }
 0x141   : > { %v6781_v11 = vpop.f32.mrb[24].mxu1  ;;  %v6783_v40 = vpop.f32.mrb[25].mxu0  ;;  %v1847_v30 = vadd.f32 %v6760_v22, %v1816_v61  ;;  %v3362_v38 = vor.u32 %v3361_v43, %v3357_v23  ;;  %v5151_v51 = vpack.c.bf16 %v1513_v52, %v1513_v52  ;;  %v6818_v3 = vadd.f32 %v1777_v33, %v1513_v52  ;;  %v4890_v23 = vld [vmem:[%s6118_s21 + $0xb4] sm:$0xf] }
 0x142   : > { %v6789_v53 = vpop.f32.mrb[25].mxu1  ;;  %v6791_v47 = vpop.f32.mrb[26].mxu0  ;;  %v1817_v4 = vmul.f32 %v1513_v52, %v1513_v52  ;;  %v2385_v41 = vrot.slane %v2383_v2, 1  ;;  %v2392_v22 = vshrl.u32 %v6776_v46, 16  ;;  %v5006_v0 = vcombine.low %v4910_v50, %v4891_v35 }
 0x143   : > { %v6796_v28 = vpop.f32.mrb[26].mxu1  ;;  %v6798_v12 = vpop.f32.mrb[27].mxu0  ;;  %v2788_v32 = vshll.u32 %v5927_v20, 16  ;;  %v3367_v15 = vsel %vm473_vm0, %v3362_v38, %v3366_v55  ;;  %1747 = vst [vmem:[%s6604_s24 + $0x38] sm:$0xf] %v5151_v51  ;;  %v2792_v7 = vshrl.u32 %v5927_v20, 16  ;;  %v4940_v31 = vcombine.low %v1922_v5, %v6769_v26 }
 0x144   : > { %v6802_v45 = vpop.f32.mrb[27].mxu1  ;;  %v6831_v62 = vadd.f32 %v1847_v30, %v1817_v4  ;;  %4066 = vmatprep.mubr.bf16.mxu1 %v3367_v15  ;;  %v2386_v46 = vor.u32 %v2385_v41, %v2381_v21  ;;  %v3384_v42 = vshll.u32 %v2392_v22, 16  ;;  %v2781_v25 = vshrl.u32 %v5006_v0, 16  ;;  %v6846_v30 = vld [vmem:[%s6118_s21 + $0xb8] sm:$0xf] }
 0x145   : > { %v2783_v10 = vshll.u32 %v5006_v0, 16  ;;  %4067 = vmatmul.mubr.bf16.gmra.mrb[116].mxu1 %v3355_v58  ;;  %v2790_v55 = vrot.slane %v2788_v32, 1  ;;  %v6841_v61 = vshll.u32 %v2792_v7, 16  ;;  %v3369_v20 = vshrl.u32 %v4940_v31, 16  ;;  %v1943_v58 = vld [vmem:[%s6118_s21 + $0xb4] sm:$0xe] }
 0x146   : > { %v3371_v26 = vshll.u32 %v4940_v31, 16  ;;  %v2391_v43 = vsel %vm473_vm0, %v2386_v46, %v6813_v36  ;;  %v3386_v14 = vrot.slane %v3384_v42, 1  ;;  %v4988_v50 = vcombine.low %v4890_v23, %v4891_v35  ;;  %v5931_v31 = vld [vmem:[%s6118_s21 + $0xbc] ss:$0 sps:$4 sm:$0x11]  }
 0x147   : > { %v2785_v52 = vrot.slane %v2783_v10, 1  ;;  %v3377_v21 = vshrl.u32 %v2391_v43, 16  ;;  %v3379_v2 = vshll.u32 %v2391_v43, 16  ;;  %v3406_v5 = vrot.slane %v6841_v61, 1 }
 0x148   : > { %v6816_v44 = vpop.f32.mrb[28].mxu0  ;;  %v3373_v38 = vrot.slane %v3371_v26, 1  ;;  %v3389_v4 = vshrl.u32 %v4988_v50, 16  ;;  %v3391_v41 = vshll.u32 %v4988_v50, 16  ;;  %v5250_v22 = vadd.f32 %v6712_v8, %v6701_v13 }
 0x149   : > { %v6820_v9 = vpop.f32.mrb[28].mxu1  ;;  %v6822_v16 = vpop.f32.mrb[29].mxu0  ;;  %v2786_v51 = vor.u32 %v2785_v52, %v2781_v25  ;;  %v3381_v32 = vrot.slane %v3379_v2, 1  ;;  %v5362_v35 = vadd.f32 %v6715_v59, %v6710_v6  ;;  %v5253_v7 = vadd.f32 %v6721_v39, %v6717_v56 }
 0x14a   : > { %v6825_v57 = vpop.f32.mrb[29].mxu1  ;;  %v6827_v37 = vpop.f32.mrb[30].mxu0  ;;  %v3374_v15 = vor.u32 %v3373_v38, %v3369_v20  ;;  %v3393_v25 = vrot.slane %v3391_v41, 1  ;;  %v5365_v13 = vadd.f32 %v6727_v24, %v6719_v19  ;;  %v4959_v8 = vcombine.low %v1943_v58, %v6846_v30 }
 0x14b   : > { %v6835_v17 = vpop.f32.mrb[30].mxu1  ;;  %v6837_v29 = vpop.f32.mrb[31].mxu0  ;;  %v2791_v42 = vsel %vm473_vm0, %v2786_v51, %v2790_v55  ;;  %v3382_v6 = vor.u32 %v3381_v32, %v3377_v21  ;;  %v1518_v19 = vadd.f32 %v5362_v35, %v5250_v22  ;;  %v2402_v58 = vshll.u32 %v5931_v31, 16  ;;  %v4894_v22 = vld [vmem:[%s6118_s21 + $0xc4] sm:$0xf] }
 0x14c   : > { %v6839_v33 = vpop.f32.mrb[31].mxu1  ;;  %v3397_v59 = vshrl.u32 %v2791_v42, 16  ;;  %v3399_v56 = vshll.u32 %v2791_v42, 16  ;;  %v3375_v39 = vsel %vm473_vm0, %v3374_v15, %v6813_v36  ;;  %v3394_v43 = vor.u32 %v3393_v25, %v3389_v4  ;;  %v5933_v36 = vld [vmem:[%s6118_s21 + $0xc8] ss:$0 sps:$4 sm:$0x11]  }
 0x14d   : > { %v1521_v24 = vadd.f32 %v5365_v13, %v5253_v7  ;;  %v2395_v52 = vshrl.u32 %v4959_v8, 16  ;;  %v3387_v2 = vsel %vm473_vm0, %v3382_v6, %v3386_v14  ;;  %v2397_v38 = vshll.u32 %v4959_v8, 16  ;;  %v4911_v15 = vld [vmem:[%s6118_s21 + $0xc0] sm:$0xe]  ;;  %v1925_v25 = vld [vmem:[%s6118_s21 + $0xb4] sm:$0xf] }
 0x14e   : > { %v3401_v21 = vrot.slane %v3399_v56, 1  ;;  %3913 = vmatprep.mubr.bf16.mxu0 %v3387_v2  ;;  %v3395_v51 = vsel %vm473_vm0, %v3394_v43, %v2790_v55  ;;  %v5152_v41 = vpack.c.bf16 %v1518_v19, %v1518_v19  ;;  %v1779_v4 = vadd.f32 %v6818_v3, %v1518_v19 }
 0x14f   : > { %v1818_v32 = vmul.f32 %v1518_v19, %v1518_v19  ;;  %3914 = vmatmul.mubr.bf16.gmra.mrb[120].mxu0 %v3375_v39  ;;  %v5153_v7 = vpack.c.bf16 %v1521_v24, %v1521_v24  ;;  %v1819_v14 = vmul.f32 %v1521_v24, %v1521_v24  ;;  %v2399_v42 = vrot.slane %v2397_v38, 1 }
 0x150   : > { %v6852_v0 = vpop.f32.mrb[32].mxu0  ;;  %v3402_v35 = vor.u32 %v3401_v21, %v3397_v59  ;;  %1748 = vst [vmem:[%s6604_s24 + $0x40] sm:$0xf] %v5152_v41  ;;  %v6888_v8 = vadd.f32 %v1779_v4, %v1521_v24  ;;  %v2404_v55 = vrot.slane %v2402_v58, 1  ;;  %v2406_v6 = vshrl.u32 %v5931_v31, 16 }
 0x151   : > { %v6859_v23 = vpop.f32.mrb[32].mxu1  ;;  %v6861_v46 = vpop.f32.mrb[33].mxu0  ;;  %v1849_v13 = vadd.f32 %v6831_v62, %v1818_v32  ;;  %1749 = vst [vmem:[%s6604_s24 + $0x48] sm:$0xf] %v5153_v7  ;;  %v2400_v43 = vor.u32 %v2399_v42, %v2395_v52  ;;  %v5007_v59 = vcombine.low %v4911_v15, %v4894_v22  ;;  %v2802_v39 = vshll.u32 %v5933_v36, 16 }
 0x152   : > { %v6867_v10 = vpop.f32.mrb[33].mxu1  ;;  %v6869_v61 = vpop.f32.mrb[34].mxu0  ;;  %v3407_v3 = vsel %vm473_vm0, %v3402_v35, %v3406_v5  ;;  %v3424_v62 = vshll.u32 %v2406_v6, 16  ;;  %v2806_v24 = vshrl.u32 %v5933_v36, 16  ;;  %v4942_v38 = vcombine.low %v1925_v25, %v6846_v30  ;;  %v4893_v31 = vld [vmem:[%s6118_s21 + $0xc0] sm:$0xf] }
 0x153   : > { %v6873_v20 = vpop.f32.mrb[34].mxu1  ;;  %v6875_v26 = vpop.f32.mrb[35].mxu0  ;;  %4074 = vmatprep.mubr.bf16.mxu1 %v3407_v3  ;;  %v6898_v21 = vadd.f32 %v1849_v13, %v1819_v14  ;;  %v2405_v5 = vsel %vm473_vm0, %v2400_v43, %v2404_v55  ;;  %v2795_v52 = vshrl.u32 %v5007_v59, 16  ;;  %v2797_v4 = vshll.u32 %v5007_v59, 16 }
 0x154   : > { %v6877_v50 = vpop.f32.mrb[35].mxu1  ;;  %4075 = vmatmul.mubr.bf16.gmra.mrb[120].mxu1 %v3395_v51  ;;  %v2804_v32 = vrot.slane %v2802_v39, 1  ;;  %v3417_v7 = vshrl.u32 %v2405_v5, 16  ;;  %v3419_v14 = vshll.u32 %v2405_v5, 16  ;;  %v3426_v36 = vrot.slane %v3424_v62, 1 }
 0x155   : > { %v3444_v42 = vshll.u32 %v2806_v24, 16  ;;  %v2799_v25 = vrot.slane %v2797_v4, 1  ;;  %v3409_v13 = vshrl.u32 %v4942_v38, 16  ;;  %v3411_v6 = vshll.u32 %v4942_v38, 16 }
 0x156   : > { %v4990_v3 = vcombine.low %v4893_v31, %v4894_v22  ;;  %v3421_v51 = vrot.slane %v3419_v14, 1  ;;  %v5256_v43 = vadd.f32 %v6745_v48, %v6737_v63  ;;  %v5368_v59 = vadd.f32 %v6750_v49, %v6743_v27 }
 0x157   : > { %v2800_v39 = vor.u32 %v2799_v25, %v2795_v52  ;;  %v5259_v4 = vadd.f32 %v6756_v34, %v6752_v18  ;;  %v5371_v22 = vadd.f32 %v6763_v54, %v6754_v1  ;;  %v5262_v27 = vadd.f32 %v6783_v40, %v6779_v60 }
 0x158   : > { %v6890_v56 = vpop.f32.mrb[36].mxu0  ;;  %v3431_v5 = vshll.u32 %v4990_v3, 16  ;;  %v3422_v62 = vor.u32 %v3421_v51, %v3417_v7  ;;  %v1526_v24 = vadd.f32 %v5368_v59, %v5256_v43  ;;  %v5265_v51 = vadd.f32 %v6798_v12, %v6791_v47 }
 0x159   : > { %v6894_v19 = vpop.f32.mrb[36].mxu1  ;;  %v6896_v2 = vpop.f32.mrb[37].mxu0  ;;  %v2805_v31 = vsel %vm473_vm0, %v2800_v39, %v2804_v32  ;;  %v5377_v43 = vadd.f32 %v6802_v45, %v6796_v28  ;;  %v5268_v59 = vadd.f32 %v6822_v16, %v6816_v44  ;;  %v5380_v47 = vadd.f32 %v6825_v57, %v6820_v9 }
 0x15a   : > { %v6902_v58 = vpop.f32.mrb[37].mxu1  ;;  %v6904_v41 = vpop.f32.mrb[38].mxu0  ;;  %v3433_v48 = vrot.slane %v3431_v5, 1  ;;  %v3427_v7 = vsel %vm473_vm0, %v3422_v62, %v3426_v36  ;;  %v3437_v18 = vshrl.u32 %v2805_v31, 16  ;;  %v3439_v34 = vshll.u32 %v2805_v31, 16 }
 0x15b   : > { %7160 = vst [vmem:[#allocation3_spill] sm:$0xff] %v6904_v41  ;;  %v6907_v15 = vpop.f32.mrb[38].mxu1  ;;  %v6909_v35 = vpop.f32.mrb[39].mxu0  ;;  %v3446_v41 = vrot.slane %v3444_v42, 1  ;;  %v5154_v14 = vpack.c.bf16 %v1526_v24, %v1526_v24  ;;  %3921 = vmatprep.mubr.bf16.mxu0 %v3427_v7  ;;  %v1781_v60 = vadd.f32 %v6888_v8, %v1526_v24  ;;  %v1820_v40 = vmul.f32 %v1526_v24, %v1526_v24 }
 0x15c   : > { %7161 = vst [vmem:[#allocation4_spill] sm:$0xff] %v6907_v15  ;;  %7162 = vst [vmem:[#allocation5_spill] sm:$0xff] %v6909_v35  ;;  %v6911_v30 = vpop.f32.mrb[39].mxu1  ;;  %v3413_v15 = vrot.slane %v3411_v6, 1  ;;  %v3429_v35 = vshrl.u32 %v4990_v3, 16  ;;  %v3441_v6 = vrot.slane %v3439_v34, 1  ;;  %v1529_v36 = vadd.f32 %v5371_v22, %v5259_v4 }
 0x15d   : > { %1750 = vst [vmem:[%s6604_s24 + $0x50] sm:$0xf] %v5154_v14  ;;  %v5374_v3 = vadd.f32 %v6789_v53, %v6781_v11  ;;  %v1537_v24 = vadd.f32 %v5377_v43, %v5265_v51  ;;  %v5271_v12 = vadd.f32 %v6837_v29, %v6827_v37  ;;  %v5383_v28 = vadd.f32 %v6839_v33, %v6835_v17 }
 0x15e   : > { %v3414_v63 = vor.u32 %v3413_v15, %v3409_v13  ;;  %v3434_v42 = vor.u32 %v3433_v48, %v3429_v35  ;;  %v1851_v35 = vadd.f32 %v6898_v21, %v1820_v40  ;;  %v3442_v39 = vor.u32 %v3441_v6, %v3437_v18 }
 0x15f   : > { %v5155_v5 = vpack.c.bf16 %v1529_v36, %v1529_v36  ;;  %v1782_v62 = vadd.f32 %v1781_v60, %v1529_v36  ;;  %v1821_v11 = vmul.f32 %v1529_v36, %v1529_v36  ;;  %v1534_v53 = vadd.f32 %v5374_v3, %v5262_v27 }
 0x160   : > { %v6921_v38 = vpop.f32.mrb[40].mxu0  ;;  %v3415_v15 = vsel %vm473_vm0, %v3414_v63, %v2404_v55  ;;  %v3435_v8 = vsel %vm473_vm0, %v3434_v42, %v2804_v32  ;;  %v3447_v21 = vsel %vm473_vm0, %v3442_v39, %v3446_v41  ;;  %v5274_v45 = vadd.f32 %v6861_v46, %v6852_v0 }
 0x161   : > { %v6926_v49 = vpop.f32.mrb[40].mxu1  ;;  %v6928_v52 = vpop.f32.mrb[41].mxu0  ;;  %3922 = vmatmul.mubr.bf16.gmra.mrb[124].mxu0 %v3415_v15  ;;  %1751 = vst [vmem:[%s6604_s24 + $0x58] sm:$0xf] %v5155_v5  ;;  %v1852_v32 = vadd.f32 %v1851_v35, %v1821_v11  ;;  %4082 = vmatprep.mubr.bf16.mxu1 %v3447_v21  ;;  %v5156_v16 = vpack.c.bf16 %v1534_v53, %v1534_v53 }
 0x162   : > { %v6931_v1 = vpop.f32.mrb[41].mxu1  ;;  %v6933_v54 = vpop.f32.mrb[42].mxu0  ;;  %v1783_v9 = vadd.f32 %v1782_v62, %v1534_v53  ;;  %v1822_v57 = vmul.f32 %v1534_v53, %v1534_v53  ;;  %v5157_v4 = vpack.c.bf16 %v1537_v24, %v1537_v24  ;;  %4083 = vmatmul.mubr.bf16.gmra.mrb[124].mxu1 %v3435_v8  ;;  %v1823_v41 = vmul.f32 %v1537_v24, %v1537_v24 }
 0x163   : > { %v6937_v25 = vpop.f32.mrb[42].mxu1  ;;  %v6939_v13 = vpop.f32.mrb[43].mxu0  ;;  %v1542_v22 = vadd.f32 %v5380_v47, %v5268_v59  ;;  %v1545_v17 = vadd.f32 %v5383_v28, %v5271_v12  ;;  %v5386_v33 = vadd.f32 %v6867_v10, %v6859_v23  ;;  %1752 = vst [vmem:[%s6604_s24 + $0x60] sm:$0xf] %v5156_v16  ;;  %v5277_v48 = vadd.f32 %v6875_v26, %v6869_v61  ;;  %v7163_v26 = vld [vmem:[#allocation3_spill] sm:$0xff]  ;;  %v7165_v3 = vld [vmem:[#allocation4_spill] sm:$0xff] }
 0x164   : > { %v6946_v55 = vpop.f32.mrb[43].mxu1  ;;  %v1853_v31 = vadd.f32 %v1852_v32, %v1822_v57  ;;  %1753 = vst [vmem:[%s6604_s24 + $0x68] sm:$0xf] %v5157_v4  ;;  %v1784_v63 = vadd.f32 %v1783_v9, %v1537_v24  ;;  %v5389_v27 = vadd.f32 %v6877_v50, %v6873_v20  ;;  %v5280_v61 = vadd.f32 %v6896_v2, %v6890_v56  ;;  %v7164_v50 = vld [vmem:[#allocation5_spill] sm:$0xff] }
 0x165   : > { %v5158_v34 = vpack.c.bf16 %v1542_v22, %v1542_v22  ;;  %v1824_v14 = vmul.f32 %v1542_v22, %v1542_v22  ;;  %v5159_v15 = vpack.c.bf16 %v1545_v17, %v1545_v17  ;;  %v1825_v23 = vmul.f32 %v1545_v17, %v1545_v17 }
 0x166   : > { %v1854_v42 = vadd.f32 %v1853_v31, %v1823_v41  ;;  %v1785_v60 = vadd.f32 %v1784_v63, %v1542_v22  ;;  %v1550_v40 = vadd.f32 %v5386_v33, %v5274_v45  ;;  %v1553_v6 = vadd.f32 %v5389_v27, %v5277_v48 }
 0x167   : > { %1754 = vst [vmem:[%s6604_s24 + $0x70] sm:$0xf] %v5158_v34  ;;  %1755 = vst [vmem:[%s6604_s24 + $0x78] sm:$0xf] %v5159_v15  ;;  %v5392_v20 = vadd.f32 %v6902_v58, %v6894_v19  ;;  %v5283_v36 = vadd.f32 %v7164_v50, %v7163_v26  ;;  %v5395_v51 = vadd.f32 %v6911_v30, %v7165_v3 }
 0x168   : > { %v6964_v44 = vpop.f32.mrb[44].mxu0  ;;  %v1855_v8 = vadd.f32 %v1854_v42, %v1824_v14  ;;  %v1786_v35 = vadd.f32 %v1785_v60, %v1545_v17  ;;  %v5160_v43 = vpack.c.bf16 %v1550_v40, %v1550_v40  ;;  %v1826_v59 = vmul.f32 %v1550_v40, %v1550_v40 }
 0x169   : > { %v6966_v37 = vpop.f32.mrb[44].mxu1  ;;  %v6968_v29 = vpop.f32.mrb[45].mxu0  ;;  %v5161_v39 = vpack.c.bf16 %v1553_v6, %v1553_v6  ;;  %v1827_v5 = vmul.f32 %v1553_v6, %v1553_v6  ;;  %v1558_v62 = vadd.f32 %v5392_v20, %v5280_v61  ;;  %v1561_v11 = vadd.f32 %v5395_v51, %v5283_v36 }
 0x16a   : > { %v5403_v0 = vpop.f32.mrb[45].mxu1  ;;  %v5293_v46 = vpop.f32.mrb[46].mxu0  ;;  %v1856_v56 = vadd.f32 %v1855_v8, %v1825_v23  ;;  %1756 = vst [vmem:[%s6604_s24 + $0x80] sm:$0xf] %v5160_v43  ;;  %v1787_v2 = vadd.f32 %v1786_v35, %v1550_v40  ;;  %v5286_v19 = vadd.f32 %v6928_v52, %v6921_v38  ;;  %v5398_v58 = vadd.f32 %v6931_v1, %v6926_v49 }
 0x16b   : > { %v5405_v7 = vpop.f32.mrb[46].mxu1  ;;  %v5294_v18 = vpop.f32.mrb[47].mxu0  ;;  %1757 = vst [vmem:[%s6604_s24 + $0x88] sm:$0xf] %v5161_v39  ;;  %v5162_v47 = vpack.c.bf16 %v1558_v62, %v1558_v62  ;;  %v1828_v12 = vmul.f32 %v1558_v62, %v1558_v62  ;;  %v5163_v21 = vpack.c.bf16 %v1561_v11, %v1561_v11  ;;  %v1829_v32 = vmul.f32 %v1561_v11, %v1561_v11 }
 0x16c   : > { %v5406_v10 = vpop.f32.mrb[47].mxu1  ;;  %v1857_v16 = vadd.f32 %v1856_v56, %v1826_v59  ;;  %v1788_v9 = vadd.f32 %v1787_v2, %v1553_v6  ;;  %v1566_v57 = vadd.f32 %v5398_v58, %v5286_v19  ;;  %v5289_v38 = vadd.f32 %v6939_v13, %v6933_v54 }
 0x16d   : > { %1758 = vst [vmem:[%s6604_s24 + $0x90] sm:$0xf] %v5162_v47  ;;  %1759 = vst [vmem:[%s6604_s24 + $0x98] sm:$0xf] %v5163_v21  ;;  %v5401_v49 = vadd.f32 %v6946_v55, %v6937_v25  ;;  %v5292_v1 = vadd.f32 %v6968_v29, %v6964_v44  ;;  %v5404_v41 = vadd.f32 %v5403_v0, %v6966_v37 }
 0x16e   : > { %v5295_v22 = vadd.f32 %v5294_v18, %v5293_v46  ;;  %v1858_v33 = vadd.f32 %v1857_v16, %v1827_v5  ;;  %v1789_v31 = vadd.f32 %v1788_v9, %v1558_v62  ;;  %v5164_v63 = vpack.c.bf16 %v1566_v57, %v1566_v57 }
 0x16f   : > { %v1830_v48 = vmul.f32 %v1566_v57, %v1566_v57  ;;  %v1569_v54 = vadd.f32 %v5401_v49, %v5289_v38  ;;  %v1574_v13 = vadd.f32 %v5404_v41, %v5292_v1  ;;  %v5407_v27 = vadd.f32 %v5406_v10, %v5405_v7 }
 0x170   : > { %v5296_v53 = vpop.f32.mrb[48].mxu0  ;;  %v1859_v14 = vadd.f32 %v1858_v33, %v1828_v12  ;;  %v1790_v15 = vadd.f32 %v1789_v31, %v1561_v11  ;;  %1760 = vst [vmem:[%s6604_s24 + $0xa0] sm:$0xf] %v5164_v63 }
 0x171   : > { %v5408_v30 = vpop.f32.mrb[48].mxu1  ;;  %v5297_v24 = vpop.f32.mrb[49].mxu0  ;;  %v5165_v44 = vpack.c.bf16 %v1569_v54, %v1569_v54  ;;  %v1831_v29 = vmul.f32 %v1569_v54, %v1569_v54  ;;  %v5166_v37 = vpack.c.bf16 %v1574_v13, %v1574_v13  ;;  %v1577_v23 = vadd.f32 %v5407_v27, %v5295_v22 }
 0x172   : > { %v5409_v28 = vpop.f32.mrb[49].mxu1  ;;  %v5299_v45 = vpop.f32.mrb[50].mxu0  ;;  %v5298_v34 = vadd.f32 %v5297_v24, %v5296_v53  ;;  %v1860_v46 = vadd.f32 %v1859_v14, %v1829_v32  ;;  %v1791_v18 = vadd.f32 %v1790_v15, %v1566_v57  ;;  %v1832_v50 = vmul.f32 %v1574_v13, %v1574_v13 }
 0x173   : > { %v5411_v52 = vpop.f32.mrb[50].mxu1  ;;  %v5300_v4 = vpop.f32.mrb[51].mxu0  ;;  %v5410_v25 = vadd.f32 %v5409_v28, %v5408_v30  ;;  %1761 = vst [vmem:[%s6604_s24 + $0xa8] sm:$0xf] %v5165_v44  ;;  %1762 = vst [vmem:[%s6604_s24 + $0xb0] sm:$0xf] %v5166_v37  ;;  %v5167_v36 = vpack.c.bf16 %v1577_v23, %v1577_v23  ;;  %v1833_v8 = vmul.f32 %v1577_v23, %v1577_v23 }
 0x174   : > { %v5412_v17 = vpop.f32.mrb[51].mxu1  ;;  %v5301_v55 = vadd.f32 %v5300_v4, %v5299_v45  ;;  %v1861_v20 = vadd.f32 %v1860_v46, %v1830_v48  ;;  %v1792_v26 = vadd.f32 %v1791_v18, %v1569_v54 }
 0x175   : > { %v1582_v42 = vadd.f32 %v5410_v25, %v5298_v34  ;;  %v5413_v7 = vadd.f32 %v5412_v17, %v5411_v52  ;;  %1763 = vst [vmem:[%s6604_s24 + $0xb8] sm:$0xf] %v5167_v36 }
 0x176   : > { %v1862_v5 = vadd.f32 %v1861_v20, %v1831_v29  ;;  %v1793_v62 = vadd.f32 %v1792_v26, %v1574_v13 }
 0x177   : > { %v5168_v35 = vpack.c.bf16 %v1582_v42, %v1582_v42  ;;  %v1585_v43 = vadd.f32 %v5413_v7, %v5301_v55  ;;  %v1834_v30 = vmul.f32 %v1582_v42, %v1582_v42 }
 0x178   : > { %v5302_v0 = vpop.f32.mrb[52].mxu0  ;;  %v1863_v19 = vadd.f32 %v1862_v5, %v1832_v50  ;;  %v1794_v58 = vadd.f32 %v1793_v62, %v1577_v23 }
 0x179   : > { %v5414_v60 = vpop.f32.mrb[52].mxu1  ;;  %v5303_v40 = vpop.f32.mrb[53].mxu0  ;;  %1764 = vst [vmem:[%s6604_s24 + $0xc0] sm:$0xf] %v5168_v35  ;;  %v5169_v56 = vpack.c.bf16 %v1585_v43, %v1585_v43  ;;  %v1835_v28 = vmul.f32 %v1585_v43, %v1585_v43 }
 0x17a   : > { %v5304_v10 = vadd.f32 %v5303_v40, %v5302_v0  ;;  %v5415_v6 = vpop.f32.mrb[53].mxu1  ;;  %v5305_v61 = vpop.f32.mrb[54].mxu0  ;;  %v1864_v21 = vadd.f32 %v1863_v19, %v1833_v8  ;;  %v1795_v32 = vadd.f32 %v1794_v58, %v1582_v42 }
 0x17b   : > { %v5417_v3 = vpop.f32.mrb[54].mxu1  ;;  %v5306_v51 = vpop.f32.mrb[55].mxu0  ;;  %v5416_v59 = vadd.f32 %v5415_v6, %v5414_v60  ;;  %1765 = vst [vmem:[%s6604_s24 + $0xc8] sm:$0xf] %v5169_v56 }
 0x17c   : > { %v5418_v39 = vpop.f32.mrb[55].mxu1  ;;  %v5307_v11 = vadd.f32 %v5306_v51, %v5305_v61  ;;  %v1865_v4 = vadd.f32 %v1864_v21, %v1834_v30  ;;  %v1796_v49 = vadd.f32 %v1795_v32, %v1585_v43 }
 0x17d   : > { %v5419_v53 = vadd.f32 %v5418_v39, %v5417_v3  ;;  %v1590_v2 = vadd.f32 %v5416_v59, %v5304_v10 }
 0x17e   : > { %v1866_v48 = vadd.f32 %v1865_v4, %v1835_v28 }
 0x17f   : > { %v1593_v24 = vadd.f32 %v5419_v53, %v5307_v11  ;;  %v5170_v47 = vpack.c.bf16 %v1590_v2, %v1590_v2  ;;  %v1836_v1 = vmul.f32 %v1590_v2, %v1590_v2  ;;  %v1797_v54 = vadd.f32 %v1796_v49, %v1590_v2 }
 0x180   : > { %v5308_v12 = vpop.f32.mrb[56].mxu0 }
 0x181   : > { %v5171_v45 = vpack.c.bf16 %v1593_v24, %v1593_v24  ;;  %v5420_v16 = vpop.f32.mrb[56].mxu1  ;;  %v5309_v9 = vpop.f32.mrb[57].mxu0  ;;  %1766 = vst [vmem:[%s6604_s24 + $0xd0] sm:$0xf] %v5170_v47  ;;  %v1837_v33 = vmul.f32 %v1593_v24, %v1593_v24  ;;  %v1867_v34 = vadd.f32 %v1866_v48, %v1836_v1  ;;  %v1798_v14 = vadd.f32 %v1797_v54, %v1593_v24 }
 0x182   : > { %v5310_v57 = vadd.f32 %v5309_v9, %v5308_v12  ;;  %v5421_v38 = vpop.f32.mrb[57].mxu1  ;;  %v5311_v52 = vpop.f32.mrb[58].mxu0 }
 0x183   : > { %1767 = vst [vmem:[%s6604_s24 + $0xd8] sm:$0xf] %v5171_v45  ;;  %v5422_v41 = vadd.f32 %v5421_v38, %v5420_v16  ;;  %v5423_v22 = vpop.f32.mrb[58].mxu1  ;;  %v5312_v17 = vpop.f32.mrb[59].mxu0  ;;  %v1868_v29 = vadd.f32 %v1867_v34, %v1837_v33 }
 0x184   : > { %v5313_v31 = vadd.f32 %v5312_v17, %v5311_v52  ;;  %v5424_v63 = vpop.f32.mrb[59].mxu1 }
 0x185   : > { %v1598_v13 = vadd.f32 %v5422_v41, %v5310_v57  ;;  %v5425_v27 = vadd.f32 %v5424_v63, %v5423_v22 }
 0x187   : > { %v5172_v15 = vpack.c.bf16 %v1598_v13, %v1598_v13  ;;  %v1838_v25 = vmul.f32 %v1598_v13, %v1598_v13  ;;  %v1601_v55 = vadd.f32 %v5425_v27, %v5313_v31  ;;  %v1799_v37 = vadd.f32 %v1798_v14, %v1598_v13 }
 0x188   : > { %v5314_v44 = vpop.f32.mrb[60].mxu0 }
 0x189   : > { %1768 = vst [vmem:[%s6604_s24 + $0xe0] sm:$0xf] %v5172_v15  ;;  %v5426_v0 = vpop.f32.mrb[60].mxu1  ;;  %v5315_v46 = vpop.f32.mrb[61].mxu0  ;;  %v5173_v18 = vpack.c.bf16 %v1601_v55, %v1601_v55  ;;  %v1839_v23 = vmul.f32 %v1601_v55, %v1601_v55  ;;  %v1869_v7 = vadd.f32 %v1868_v29, %v1838_v25  ;;  %v1800_v10 = vadd.f32 %v1799_v37, %v1601_v55 }
 0x18a   : > { %v5316_v42 = vadd.f32 %v5315_v46, %v5314_v44  ;;  %v5427_v60 = vpop.f32.mrb[61].mxu1  ;;  %v5317_v40 = vpop.f32.mrb[62].mxu0 }
 0x18b   : > { %v5428_v6 = vadd.f32 %v5427_v60, %v5426_v0  ;;  %v5429_v61 = vpop.f32.mrb[62].mxu1  ;;  %v5318_v20 = vpop.f32.mrb[63].mxu0  ;;  %1769 = vst [vmem:[%s6604_s24 + $0xe8] sm:$0xf] %v5173_v18  ;;  %v1870_v36 = vadd.f32 %v1869_v7, %v1839_v23 }
 0x18c   : > { %v5319_v26 = vadd.f32 %v5318_v20, %v5317_v40  ;;  %v5430_v50 = vpop.f32.mrb[63].mxu1 }
 0x18d   : > { %v1606_v3 = vadd.f32 %v5428_v6, %v5316_v42  ;;  %v5431_v51 = vadd.f32 %v5430_v50, %v5429_v61 }
 0x18f   : > { %v5174_v8 = vpack.c.bf16 %v1606_v3, %v1606_v3  ;;  %v1801_v35 = vadd.f32 %v1800_v10, %v1606_v3  ;;  %v1840_v43 = vmul.f32 %v1606_v3, %v1606_v3  ;;  %v1609_v59 = vadd.f32 %v5431_v51, %v5319_v26 }
 0x190   : > { %v5448_v39 = vpop.f32.mrb[64].mxu0 }
 0x191   : > { %1770 = vst [vmem:[%s6604_s24 + $0xf0] sm:$0xf] %v5174_v8  ;;  %v1871_v5 = vadd.f32 %v1870_v36, %v1840_v43  ;;  %v5175_v62 = vpack.c.bf16 %v1609_v59, %v1609_v59  ;;  %v7014_v11 = vadd.f32 %v1801_v35, %v1609_v59  ;;  %v1841_v53 = vmul.f32 %v1609_v59, %v1609_v59  ;;  %v5560_v56 = vpop.f32.mrb[64].mxu1  ;;  %v5449_v2 = vpop.f32.mrb[65].mxu0 }
 0x192   : > { %v5450_v19 = vadd.f32 %v5449_v2, %v5448_v39  ;;  %v5561_v58 = vpop.f32.mrb[65].mxu1  ;;  %v5451_v30 = vpop.f32.mrb[66].mxu0 }
 0x193   : > { %1771 = vst [vmem:[%s6604_s24 + $0xf8] sm:$0xf] %v5175_v62  ;;  %v7017_v24 = vadd.f32 %v1871_v5, %v1841_v53  ;;  %v5562_v47 = vadd.f32 %v5561_v58, %v5560_v56  ;;  %v5563_v12 = vpop.f32.mrb[66].mxu1  ;;  %v5452_v21 = vpop.f32.mrb[67].mxu0 }
 0x194   : > { %v5453_v32 = vadd.f32 %v5452_v21, %v5451_v30  ;;  %v5564_v28 = vpop.f32.mrb[67].mxu1 }
 0x195   : > { %v3965_v45 = vadd.f32 %v5562_v47, %v5450_v19  ;;  %v5565_v16 = vadd.f32 %v5564_v28, %v5563_v12 }
 0x197   : > { %v5176_v9 = vpack.c.bf16 %v3965_v45, %v3965_v45  ;;  %v3968_v57 = vadd.f32 %v5565_v16, %v5453_v32  ;;  %v4289_v52 = vmul.f32 %v3965_v45, %v3965_v45 }
 0x198   : > { %v5454_v38 = vpop.f32.mrb[68].mxu0 }
 0x199   : > { %4219 = vst [vmem:[%s6604_s24 + $0x4] sm:$0xf] %v5176_v9  ;;  %v5566_v4 = vpop.f32.mrb[68].mxu1  ;;  %v5455_v49 = vpop.f32.mrb[69].mxu0  ;;  %v5177_v1 = vpack.c.bf16 %v3968_v57, %v3968_v57  ;;  %v4251_v41 = vadd.f32 %v3968_v57, %v3965_v45  ;;  %v4290_v22 = vmul.f32 %v3968_v57, %v3968_v57 }
 0x19a   : > { %v5456_v17 = vadd.f32 %v5455_v49, %v5454_v38  ;;  %v5567_v33 = vpop.f32.mrb[69].mxu1  ;;  %v5457_v31 = vpop.f32.mrb[70].mxu0 }
 0x19b   : > { %v5568_v63 = vadd.f32 %v5567_v33, %v5566_v4  ;;  %v5569_v48 = vpop.f32.mrb[70].mxu1  ;;  %v5458_v54 = vpop.f32.mrb[71].mxu0  ;;  %4220 = vst [vmem:[%s6604_s24 + $0xc] sm:$0xf] %v5177_v1  ;;  %v4321_v13 = vadd.f32 %v4290_v22, %v4289_v52 }
 0x19c   : > { %v5459_v27 = vadd.f32 %v5458_v54, %v5457_v31  ;;  %v5570_v34 = vpop.f32.mrb[71].mxu1 }
 0x19d   : > { %v3973_v14 = vadd.f32 %v5568_v63, %v5456_v17  ;;  %v5571_v15 = vadd.f32 %v5570_v34, %v5569_v48 }
 0x19f   : > { %v5178_v25 = vpack.c.bf16 %v3973_v14, %v3973_v14  ;;  %v4252_v55 = vadd.f32 %v4251_v41, %v3973_v14  ;;  %v4291_v44 = vmul.f32 %v3973_v14, %v3973_v14  ;;  %v3976_v29 = vadd.f32 %v5571_v15, %v5459_v27 }
 0x1a0   : > { %v5460_v37 = vpop.f32.mrb[72].mxu0 }
 0x1a1   : > { %4221 = vst [vmem:[%s6604_s24 + $0x14] sm:$0xf] %v5178_v25  ;;  %v4322_v0 = vadd.f32 %v4321_v13, %v4291_v44  ;;  %v5572_v46 = vpop.f32.mrb[72].mxu1  ;;  %v5461_v18 = vpop.f32.mrb[73].mxu0  ;;  %v5179_v23 = vpack.c.bf16 %v3976_v29, %v3976_v29  ;;  %v4253_v42 = vadd.f32 %v4252_v55, %v3976_v29  ;;  %v4292_v60 = vmul.f32 %v3976_v29, %v3976_v29 }
 0x1a2   : > { %v5462_v40 = vadd.f32 %v5461_v18, %v5460_v37  ;;  %v5573_v7 = vpop.f32.mrb[73].mxu1  ;;  %v5463_v10 = vpop.f32.mrb[74].mxu0 }
 0x1a3   : > { %v5574_v6 = vadd.f32 %v5573_v7, %v5572_v46  ;;  %v5575_v61 = vpop.f32.mrb[74].mxu1  ;;  %v5464_v20 = vpop.f32.mrb[75].mxu0  ;;  %4222 = vst [vmem:[%s6604_s24 + $0x1c] sm:$0xf] %v5179_v23  ;;  %v4323_v26 = vadd.f32 %v4322_v0, %v4292_v60 }
 0x1a4   : > { %v5465_v50 = vadd.f32 %v5464_v20, %v5463_v10  ;;  %v5576_v36 = vpop.f32.mrb[75].mxu1 }
 0x1a5   : > { %v3981_v3 = vadd.f32 %v5574_v6, %v5462_v40  ;;  %v5577_v51 = vadd.f32 %v5576_v36, %v5575_v61 }
 0x1a7   : > { %v5180_v8 = vpack.c.bf16 %v3981_v3, %v3981_v3  ;;  %v4254_v35 = vadd.f32 %v4253_v42, %v3981_v3  ;;  %v4293_v43 = vmul.f32 %v3981_v3, %v3981_v3  ;;  %v3984_v59 = vadd.f32 %v5577_v51, %v5465_v50 }
 0x1a8   : > { %v5466_v39 = vpop.f32.mrb[76].mxu0 }
 0x1a9   : > { %4223 = vst [vmem:[%s6604_s24 + $0x24] sm:$0xf] %v5180_v8  ;;  %v4324_v5 = vadd.f32 %v4323_v26, %v4293_v43  ;;  %v5181_v62 = vpack.c.bf16 %v3984_v59, %v3984_v59  ;;  %v4255_v53 = vadd.f32 %v4254_v35, %v3984_v59  ;;  %v4294_v56 = vmul.f32 %v3984_v59, %v3984_v59  ;;  %v5578_v2 = vpop.f32.mrb[76].mxu1  ;;  %v5467_v19 = vpop.f32.mrb[77].mxu0 }
 0x1aa   : > { %v5468_v58 = vadd.f32 %v5467_v19, %v5466_v39  ;;  %v5579_v30 = vpop.f32.mrb[77].mxu1  ;;  %v5469_v47 = vpop.f32.mrb[78].mxu0 }
 0x1ab   : > { %4224 = vst [vmem:[%s6604_s24 + $0x2c] sm:$0xf] %v5181_v62  ;;  %v4325_v12 = vadd.f32 %v4324_v5, %v4294_v56  ;;  %v5580_v21 = vadd.f32 %v5579_v30, %v5578_v2  ;;  %v5581_v32 = vpop.f32.mrb[78].mxu1  ;;  %v5470_v28 = vpop.f32.mrb[79].mxu0 }
 0x1ac   : > { %v5471_v45 = vadd.f32 %v5470_v28, %v5469_v47  ;;  %v5582_v16 = vpop.f32.mrb[79].mxu1 }
 0x1ad   : > { %v3989_v9 = vadd.f32 %v5580_v21, %v5468_v58  ;;  %v5583_v57 = vadd.f32 %v5582_v16, %v5581_v32 }
 0x1af   : > { %v5182_v38 = vpack.c.bf16 %v3989_v9, %v3989_v9  ;;  %v4256_v52 = vadd.f32 %v4255_v53, %v3989_v9  ;;  %v4295_v4 = vmul.f32 %v3989_v9, %v3989_v9  ;;  %v3992_v49 = vadd.f32 %v5583_v57, %v5471_v45 }
 0x1b0   : > { %v5472_v1 = vpop.f32.mrb[80].mxu0 }
 0x1b1   : > { %4225 = vst [vmem:[%s6604_s24 + $0x34] sm:$0xf] %v5182_v38  ;;  %v4326_v41 = vadd.f32 %v4325_v12, %v4295_v4  ;;  %v5183_v22 = vpack.c.bf16 %v3992_v49, %v3992_v49  ;;  %v4257_v17 = vadd.f32 %v4256_v52, %v3992_v49  ;;  %v4296_v33 = vmul.f32 %v3992_v49, %v3992_v49  ;;  %v5584_v31 = vpop.f32.mrb[80].mxu1  ;;  %v5473_v63 = vpop.f32.mrb[81].mxu0 }
 0x1b2   : > { %v5474_v48 = vadd.f32 %v5473_v63, %v5472_v1  ;;  %v5585_v54 = vpop.f32.mrb[81].mxu1  ;;  %v5475_v13 = vpop.f32.mrb[82].mxu0 }
 0x1b3   : > { %4226 = vst [vmem:[%s6604_s24 + $0x3c] sm:$0xf] %v5183_v22  ;;  %v4327_v27 = vadd.f32 %v4326_v41, %v4296_v33  ;;  %v5586_v34 = vadd.f32 %v5585_v54, %v5584_v31  ;;  %v5587_v14 = vpop.f32.mrb[82].mxu1  ;;  %v5476_v15 = vpop.f32.mrb[83].mxu0 }
 0x1b4   : > { %v5477_v25 = vadd.f32 %v5476_v15, %v5475_v13  ;;  %v5588_v55 = vpop.f32.mrb[83].mxu1 }
 0x1b5   : > { %v3997_v44 = vadd.f32 %v5586_v34, %v5474_v48  ;;  %v5589_v29 = vadd.f32 %v5588_v55, %v5587_v14 }
 0x1b7   : > { %v5184_v37 = vpack.c.bf16 %v3997_v44, %v3997_v44  ;;  %v4258_v0 = vadd.f32 %v4257_v17, %v3997_v44  ;;  %v4297_v46 = vmul.f32 %v3997_v44, %v3997_v44  ;;  %v4000_v18 = vadd.f32 %v5589_v29, %v5477_v25 }
 0x1b8   : > { %v5478_v23 = vpop.f32.mrb[84].mxu0 }
 0x1b9   : > { %4227 = vst [vmem:[%s6604_s24 + $0x44] sm:$0xf] %v5184_v37  ;;  %v4328_v42 = vadd.f32 %v4327_v27, %v4297_v46  ;;  %v5185_v60 = vpack.c.bf16 %v4000_v18, %v4000_v18  ;;  %v4259_v40 = vadd.f32 %v4258_v0, %v4000_v18  ;;  %v4298_v7 = vmul.f32 %v4000_v18, %v4000_v18  ;;  %v5479_v10 = vpop.f32.mrb[85].mxu0  ;;  %v5590_v36 = vpop.f32.mrb[84].mxu1 }
 0x1ba   : > { %v5480_v6 = vadd.f32 %v5479_v10, %v5478_v23  ;;  %v5481_v61 = vpop.f32.mrb[86].mxu0  ;;  %v5591_v3 = vpop.f32.mrb[85].mxu1 }
 0x1bb   : > { %4228 = vst [vmem:[%s6604_s24 + $0x4c] sm:$0xf] %v5185_v60  ;;  %v4329_v20 = vadd.f32 %v4328_v42, %v4298_v7  ;;  %v5482_v26 = vpop.f32.mrb[87].mxu0  ;;  %v5592_v51 = vadd.f32 %v5591_v3, %v5590_v36  ;;  %v5593_v8 = vpop.f32.mrb[86].mxu1 }
 0x1bc   : > { %v5483_v50 = vadd.f32 %v5482_v26, %v5481_v61  ;;  %v5594_v35 = vpop.f32.mrb[87].mxu1 }
 0x1bd   : > { %v4005_v43 = vadd.f32 %v5592_v51, %v5480_v6  ;;  %v5595_v59 = vadd.f32 %v5594_v35, %v5593_v8 }
 0x1bf   : > { %v5186_v39 = vpack.c.bf16 %v4005_v43, %v4005_v43  ;;  %v4260_v5 = vadd.f32 %v4259_v40, %v4005_v43  ;;  %v4299_v62 = vmul.f32 %v4005_v43, %v4005_v43  ;;  %v4008_v53 = vadd.f32 %v5595_v59, %v5483_v50 }
 0x1c0   : > { %v5484_v30 = vpop.f32.mrb[88].mxu0 }
 0x1c1   : > { %4229 = vst [vmem:[%s6604_s24 + $0x54] sm:$0xf] %v5186_v39  ;;  %v4330_v56 = vadd.f32 %v4329_v20, %v4299_v62  ;;  %v5187_v2 = vpack.c.bf16 %v4008_v53, %v4008_v53  ;;  %v4261_v19 = vadd.f32 %v4260_v5, %v4008_v53  ;;  %v4300_v58 = vmul.f32 %v4008_v53, %v4008_v53  ;;  %v5485_v47 = vpop.f32.mrb[89].mxu0  ;;  %v5596_v28 = vpop.f32.mrb[88].mxu1 }
 0x1c2   : > { %v5486_v21 = vadd.f32 %v5485_v47, %v5484_v30  ;;  %v5487_v32 = vpop.f32.mrb[90].mxu0  ;;  %v5597_v16 = vpop.f32.mrb[89].mxu1 }
 0x1c3   : > { %4230 = vst [vmem:[%s6604_s24 + $0x5c] sm:$0xf] %v5187_v2  ;;  %v4331_v12 = vadd.f32 %v4330_v56, %v4300_v58  ;;  %v5488_v45 = vpop.f32.mrb[91].mxu0  ;;  %v5598_v57 = vadd.f32 %v5597_v16, %v5596_v28  ;;  %v5599_v38 = vpop.f32.mrb[90].mxu1 }
 0x1c4   : > { %v5489_v9 = vadd.f32 %v5488_v45, %v5487_v32  ;;  %v5600_v52 = vpop.f32.mrb[91].mxu1 }
 0x1c5   : > { %v4013_v4 = vadd.f32 %v5598_v57, %v5486_v21  ;;  %v5601_v49 = vadd.f32 %v5600_v52, %v5599_v38 }
 0x1c7   : > { %v5188_v1 = vpack.c.bf16 %v4013_v4, %v4013_v4  ;;  %v4262_v41 = vadd.f32 %v4261_v19, %v4013_v4  ;;  %v4301_v22 = vmul.f32 %v4013_v4, %v4013_v4  ;;  %v4016_v17 = vadd.f32 %v5601_v49, %v5489_v9 }
 0x1c8   : > { %v5490_v33 = vpop.f32.mrb[92].mxu0 }
 0x1c9   : > { %4231 = vst [vmem:[%s6604_s24 + $0x64] sm:$0xf] %v5188_v1  ;;  %v4332_v31 = vadd.f32 %v4331_v12, %v4301_v22  ;;  %v5189_v63 = vpack.c.bf16 %v4016_v17, %v4016_v17  ;;  %v4263_v48 = vadd.f32 %v4262_v41, %v4016_v17  ;;  %v4302_v54 = vmul.f32 %v4016_v17, %v4016_v17  ;;  %v5491_v13 = vpop.f32.mrb[93].mxu0 }
 0x1ca   : > { %v5492_v27 = vadd.f32 %v5491_v13, %v5490_v33  ;;  %v5493_v34 = vpop.f32.mrb[94].mxu0 }
 0x1cb   : > { %4232 = vst [vmem:[%s6604_s24 + $0x6c] sm:$0xf] %v5189_v63  ;;  %v4333_v14 = vadd.f32 %v4332_v31, %v4302_v54  ;;  %v5494_v15 = vpop.f32.mrb[95].mxu0  ;;  %v5602_v55 = vpop.f32.mrb[92].mxu1 }
 0x1cc   : > { %v5495_v25 = vadd.f32 %v5494_v15, %v5493_v34  ;;  %v5603_v44 = vpop.f32.mrb[93].mxu1 }
 0x1cd   : > { %v5604_v29 = vadd.f32 %v5603_v44, %v5602_v55  ;;  %v5605_v37 = vpop.f32.mrb[94].mxu1 }
 0x1ce   : > { %v5606_v0 = vpop.f32.mrb[95].mxu1 }
 0x1cf   : > { %v4021_v46 = vadd.f32 %v5604_v29, %v5492_v27  ;;  %v5607_v18 = vadd.f32 %v5606_v0, %v5605_v37 }
 0x1d1   : > { %v5190_v23 = vpack.c.bf16 %v4021_v46, %v4021_v46  ;;  %v4264_v42 = vadd.f32 %v4263_v48, %v4021_v46  ;;  %v4303_v60 = vmul.f32 %v4021_v46, %v4021_v46  ;;  %v4024_v40 = vadd.f32 %v5607_v18, %v5495_v25 }
 0x1d2   : > { %v5496_v7 = vpop.f32.mrb[96].mxu0 }
 0x1d3   : > { %v5497_v10 = vpop.f32.mrb[97].mxu0  ;;  %4233 = vst [vmem:[%s6604_s24 + $0x74] sm:$0xf] %v5190_v23  ;;  %v4334_v6 = vadd.f32 %v4333_v14, %v4303_v60  ;;  %v5191_v61 = vpack.c.bf16 %v4024_v40, %v4024_v40  ;;  %v4265_v20 = vadd.f32 %v4264_v42, %v4024_v40  ;;  %v4304_v26 = vmul.f32 %v4024_v40, %v4024_v40 }
 0x1d4   : > { %v5499_v50 = vpop.f32.mrb[98].mxu0  ;;  %v5498_v3 = vadd.f32 %v5497_v10, %v5496_v7 }
 0x1d5   : > { %v5608_v36 = vpop.f32.mrb[96].mxu1  ;;  %v5500_v51 = vpop.f32.mrb[99].mxu0  ;;  %4234 = vst [vmem:[%s6604_s24 + $0x7c] sm:$0xf] %v5191_v61  ;;  %v4335_v8 = vadd.f32 %v4334_v6, %v4304_v26 }
 0x1d6   : > { %v5609_v35 = vpop.f32.mrb[97].mxu1  ;;  %v5501_v43 = vadd.f32 %v5500_v51, %v5499_v50 }
 0x1d7   : > { %v5610_v59 = vadd.f32 %v5609_v35, %v5608_v36  ;;  %v5611_v39 = vpop.f32.mrb[98].mxu1 }
 0x1d8   : > { %v5612_v5 = vpop.f32.mrb[99].mxu1 }
 0x1d9   : > { %v4029_v62 = vadd.f32 %v5610_v59, %v5498_v3  ;;  %v5613_v53 = vadd.f32 %v5612_v5, %v5611_v39 }
 0x1db   : > { %v5192_v56 = vpack.c.bf16 %v4029_v62, %v4029_v62  ;;  %v4266_v2 = vadd.f32 %v4265_v20, %v4029_v62  ;;  %v4305_v19 = vmul.f32 %v4029_v62, %v4029_v62  ;;  %v4032_v58 = vadd.f32 %v5613_v53, %v5501_v43 }
 0x1dc   : > { %v5502_v30 = vpop.f32.mrb[100].mxu0 }
 0x1dd   : > { %4235 = vst [vmem:[%s6604_s24 + $0x84] sm:$0xf] %v5192_v56  ;;  %v4336_v47 = vadd.f32 %v4335_v8, %v4305_v19  ;;  %v5193_v12 = vpack.c.bf16 %v4032_v58, %v4032_v58  ;;  %v4267_v21 = vadd.f32 %v4266_v2, %v4032_v58  ;;  %v4306_v32 = vmul.f32 %v4032_v58, %v4032_v58  ;;  %v5503_v28 = vpop.f32.mrb[101].mxu0 }
 0x1de   : > { %v5504_v45 = vadd.f32 %v5503_v28, %v5502_v30  ;;  %v5505_v16 = vpop.f32.mrb[102].mxu0 }
 0x1df   : > { %4236 = vst [vmem:[%s6604_s24 + $0x8c] sm:$0xf] %v5193_v12  ;;  %v4337_v9 = vadd.f32 %v4336_v47, %v4306_v32  ;;  %v5506_v57 = vpop.f32.mrb[103].mxu0 }
 0x1e0   : > { %v5507_v38 = vadd.f32 %v5506_v57, %v5505_v16 }
 0x1e1   : > { %v5614_v52 = vpop.f32.mrb[100].mxu1 }
 0x1e2   : > { %v5615_v4 = vpop.f32.mrb[101].mxu1 }
 0x1e3   : > { %v5616_v49 = vadd.f32 %v5615_v4, %v5614_v52  ;;  %v5617_v1 = vpop.f32.mrb[102].mxu1 }
 0x1e4   : > { %v5618_v41 = vpop.f32.mrb[103].mxu1 }
 0x1e5   : > { %v4037_v22 = vadd.f32 %v5616_v49, %v5504_v45  ;;  %v5619_v17 = vadd.f32 %v5618_v41, %v5617_v1 }
 0x1e7   : > { %v5194_v33 = vpack.c.bf16 %v4037_v22, %v4037_v22  ;;  %v4268_v31 = vadd.f32 %v4267_v21, %v4037_v22  ;;  %v4307_v63 = vmul.f32 %v4037_v22, %v4037_v22  ;;  %v4040_v48 = vadd.f32 %v5619_v17, %v5507_v38  ;;  %v5508_v14 = vpop.f32.mrb[104].mxu0 }
 0x1e8   : > { %v5509_v15 = vpop.f32.mrb[105].mxu0 }
 0x1e9   : > { %4237 = vst [vmem:[%s6604_s24 + $0x94] sm:$0xf] %v5194_v33  ;;  %v4338_v54 = vadd.f32 %v4337_v9, %v4307_v63  ;;  %v5195_v13 = vpack.c.bf16 %v4040_v48, %v4040_v48  ;;  %v4269_v27 = vadd.f32 %v4268_v31, %v4040_v48  ;;  %v4308_v34 = vmul.f32 %v4040_v48, %v4040_v48  ;;  %v5511_v44 = vpop.f32.mrb[106].mxu0 }
 0x1ea   : > { %v5510_v55 = vadd.f32 %v5509_v15, %v5508_v14  ;;  %v5512_v37 = vpop.f32.mrb[107].mxu0 }
 0x1eb   : > { %4238 = vst [vmem:[%s6604_s24 + $0x9c] sm:$0xf] %v5195_v13  ;;  %v4339_v25 = vadd.f32 %v4338_v54, %v4308_v34  ;;  %v5620_v29 = vpop.f32.mrb[104].mxu1  ;;  %v5513_v46 = vadd.f32 %v5512_v37, %v5511_v44 }
 0x1ec   : > { %v5621_v0 = vpop.f32.mrb[105].mxu1 }
 0x1ed   : > { %v5622_v18 = vadd.f32 %v5621_v0, %v5620_v29  ;;  %v5623_v23 = vpop.f32.mrb[106].mxu1 }
 0x1ee   : > { %v5624_v42 = vpop.f32.mrb[107].mxu1 }
 0x1ef   : > { %v4045_v60 = vadd.f32 %v5622_v18, %v5510_v55  ;;  %v5625_v40 = vadd.f32 %v5624_v42, %v5623_v23 }
 0x1f1   : > { %v5196_v7 = vpack.c.bf16 %v4045_v60, %v4045_v60  ;;  %v4270_v10 = vadd.f32 %v4269_v27, %v4045_v60  ;;  %v4309_v6 = vmul.f32 %v4045_v60, %v4045_v60  ;;  %v4048_v61 = vadd.f32 %v5625_v40, %v5513_v46 }
 0x1f3   : > { %4239 = vst [vmem:[%s6604_s24 + $0xa4] sm:$0xf] %v5196_v7  ;;  %v4340_v20 = vadd.f32 %v4339_v25, %v4309_v6  ;;  %v5197_v26 = vpack.c.bf16 %v4048_v61, %v4048_v61  ;;  %v4271_v50 = vadd.f32 %v4270_v10, %v4048_v61  ;;  %v4310_v36 = vmul.f32 %v4048_v61, %v4048_v61 }
 0x1f5   : > { %4240 = vst [vmem:[%s6604_s24 + $0xac] sm:$0xf] %v5197_v26  ;;  %v4341_v3 = vadd.f32 %v4340_v20, %v4310_v36 }
 0x1f8   : > { %v5514_v51 = vpop.f32.mrb[108].mxu0 }
 0x1f9   : > { %v5515_v8 = vpop.f32.mrb[109].mxu0 }
 0x1fa   : > { %v5516_v35 = vadd.f32 %v5515_v8, %v5514_v51  ;;  %v5517_v43 = vpop.f32.mrb[110].mxu0 }
 0x1fb   : > { %v5626_v59 = vpop.f32.mrb[108].mxu1  ;;  %v5518_v39 = vpop.f32.mrb[111].mxu0 }
 0x1fc   : > { %v5627_v5 = vpop.f32.mrb[109].mxu1  ;;  %v5519_v62 = vadd.f32 %v5518_v39, %v5517_v43 }
 0x1fd   : > { %v5628_v53 = vadd.f32 %v5627_v5, %v5626_v59  ;;  %v5629_v56 = vpop.f32.mrb[110].mxu1 }
 0x1fe   : > { %v5630_v2 = vpop.f32.mrb[111].mxu1 }
 0x1ff   : > { %v4053_v19 = vadd.f32 %v5628_v53, %v5516_v35  ;;  %v5631_v58 = vadd.f32 %v5630_v2, %v5629_v56 }
 0x201   : > { %v5198_v30 = vpack.c.bf16 %v4053_v19, %v4053_v19  ;;  %v4272_v47 = vadd.f32 %v4271_v50, %v4053_v19  ;;  %v4311_v12 = vmul.f32 %v4053_v19, %v4053_v19  ;;  %v4056_v21 = vadd.f32 %v5631_v58, %v5519_v62 }
 0x203   : > { %4241 = vst [vmem:[%s6604_s24 + $0xb4] sm:$0xf] %v5198_v30  ;;  %v4342_v32 = vadd.f32 %v4341_v3, %v4311_v12  ;;  %v5199_v28 = vpack.c.bf16 %v4056_v21, %v4056_v21  ;;  %v4273_v45 = vadd.f32 %v4272_v47, %v4056_v21  ;;  %v4312_v16 = vmul.f32 %v4056_v21, %v4056_v21 }
 0x205   : > { %4242 = vst [vmem:[%s6604_s24 + $0xbc] sm:$0xf] %v5199_v28  ;;  %v4343_v9 = vadd.f32 %v4342_v32, %v4312_v16  ;;  %v5520_v57 = vpop.f32.mrb[112].mxu0 }
 0x206   : > { %v5521_v38 = vpop.f32.mrb[113].mxu0 }
 0x207   : > { %v5522_v52 = vadd.f32 %v5521_v38, %v5520_v57  ;;  %v5523_v4 = vpop.f32.mrb[114].mxu0 }
 0x208   : > { %v5524_v49 = vpop.f32.mrb[115].mxu0 }
 0x209   : > { %v5632_v1 = vpop.f32.mrb[112].mxu1  ;;  %v5525_v41 = vadd.f32 %v5524_v49, %v5523_v4 }
 0x20a   : > { %v5633_v22 = vpop.f32.mrb[113].mxu1 }
 0x20b   : > { %v5634_v17 = vadd.f32 %v5633_v22, %v5632_v1  ;;  %v5635_v33 = vpop.f32.mrb[114].mxu1 }
 0x20c   : > { %v5636_v31 = vpop.f32.mrb[115].mxu1 }
 0x20d   : > { %v4061_v63 = vadd.f32 %v5634_v17, %v5522_v52  ;;  %v5637_v48 = vadd.f32 %v5636_v31, %v5635_v33  ;;  %v1803_v31 = vrot.slane %v7014_v11, 4 }
 0x20f   : > { %v5200_v54 = vpack.c.bf16 %v4061_v63, %v4061_v63  ;;  %v4274_v13 = vadd.f32 %v4273_v45, %v4061_v63  ;;  %v4313_v27 = vmul.f32 %v4061_v63, %v4061_v63  ;;  %v4064_v34 = vadd.f32 %v5637_v48, %v5525_v41 }
 0x210   : > { %v1873_v48 = vrot.slane %v7017_v24, 4 }
 0x211   : > { %4243 = vst [vmem:[%s6604_s24 + $0xc4] sm:$0xf] %v5200_v54  ;;  %v4344_v14 = vadd.f32 %v4343_v9, %v4313_v27  ;;  %v5201_v15 = vpack.c.bf16 %v4064_v34, %v4064_v34  ;;  %v4275_v25 = vadd.f32 %v4274_v13, %v4064_v34  ;;  %v4314_v55 = vmul.f32 %v4064_v34, %v4064_v34 }
 0x212   : > { %v1804_v34 = vadd.f32 %v1803_v31, %v7014_v11  ;;  %v4513_v31 = vld [vmem:[%s6604_s24 + $0xa8] sm:$0xff] (%p6059_p5) }
 0x213   : > { %4244 = vst [vmem:[%s6604_s24 + $0xcc] sm:$0xf] %v5201_v15  ;;  %v4345_v44 = vadd.f32 %v4344_v14, %v4314_v55  ;;  %v5526_v29 = vpop.f32.mrb[116].mxu0  ;;  %v1874_v55 = vadd.f32 %v1873_v48, %v7017_v24  ;;  %v4517_v48 = vld [vmem:[%s6604_s24 + $0xb8] sm:$0xff] (%p6059_p5)  ;;  %4514 = vst [vmem:[%s7077_s11 + $0x148] sm:$0xff] (%p6059_p5), %v4513_v31 }
 0x214   : > { %v5527_v37 = vpop.f32.mrb[117].mxu0  ;;  %4518 = vst [vmem:[%s7077_s11 + $0x168] sm:$0xff] (%p6059_p5), %v4517_v48 }
 0x215   : > { %v5528_v0 = vadd.f32 %v5527_v37, %v5526_v29  ;;  %v5529_v46 = vpop.f32.mrb[118].mxu0  ;;  %v1875_v11 = vrot.slane %v1874_v55, 2 }
 0x216   : > { %v5530_v18 = vpop.f32.mrb[119].mxu0 }
 0x217   : > { %v5531_v23 = vadd.f32 %v5530_v18, %v5529_v46  ;;  %v1805_v46 = vrot.slane %v1804_v34, 2 }
 0x218   : > { %v5638_v42 = vpop.f32.mrb[116].mxu1 }
 0x219   : > { %v5639_v60 = vpop.f32.mrb[117].mxu1 }
 0x21a   : > { %v5640_v40 = vadd.f32 %v5639_v60, %v5638_v42  ;;  %v5641_v7 = vpop.f32.mrb[118].mxu1 }
 0x21b   : > { %v5642_v10 = vpop.f32.mrb[119].mxu1 }
 0x21c   : > { %v4069_v6 = vadd.f32 %v5640_v40, %v5528_v0  ;;  %v5643_v61 = vadd.f32 %v5642_v10, %v5641_v7  ;;  %v1806_v10 = vadd.f32 %v1805_v46, %v1804_v34 }
 0x21e   : > { %v5202_v20 = vpack.c.bf16 %v4069_v6, %v4069_v6  ;;  %v4276_v26 = vadd.f32 %v4275_v25, %v4069_v6  ;;  %v4315_v50 = vmul.f32 %v4069_v6, %v4069_v6  ;;  %v4072_v36 = vadd.f32 %v5643_v61, %v5531_v23 }
 0x21f   : > { %v1876_v61 = vadd.f32 %v1875_v11, %v1874_v55 }
 0x220   : > { %4245 = vst [vmem:[%s6604_s24 + $0xd4] sm:$0xf] %v5202_v20  ;;  %v4346_v3 = vadd.f32 %v4345_v44, %v4315_v50  ;;  %v5203_v51 = vpack.c.bf16 %v4072_v36, %v4072_v36  ;;  %v4277_v8 = vadd.f32 %v4276_v26, %v4072_v36  ;;  %v4316_v35 = vmul.f32 %v4072_v36, %v4072_v36 }
 0x221   : > { %v1807_v50 = vrot.slane %v1806_v10, 1 }
 0x222   : > { %4246 = vst [vmem:[%s6604_s24 + $0xdc] sm:$0xf] %v5203_v51  ;;  %v4347_v43 = vadd.f32 %v4346_v3, %v4316_v35  ;;  %v5532_v59 = vpop.f32.mrb[120].mxu0  ;;  %v1877_v51 = vrot.slane %v1876_v61, 1 }
 0x223   : > { %v5533_v39 = vpop.f32.mrb[121].mxu0 }
 0x224   : > { %v5534_v5 = vadd.f32 %v5533_v39, %v5532_v59  ;;  %v5535_v62 = vpop.f32.mrb[122].mxu0 }
 0x225   : > { %v5536_v53 = vpop.f32.mrb[123].mxu0 }
 0x226   : > { %v5537_v2 = vadd.f32 %v5536_v53, %v5535_v62 }
 0x227   : > { %v5644_v56 = vpop.f32.mrb[120].mxu1 }
 0x228   : > { %v5645_v19 = vpop.f32.mrb[121].mxu1 }
 0x229   : > { %v5646_v58 = vadd.f32 %v5645_v19, %v5644_v56  ;;  %v5647_v30 = vpop.f32.mrb[122].mxu1  ;;  %v4471_v19 = vld [vmem:[%s6604_s24] sm:$0xff] (%p6059_p5)  ;;  %v4525_v34 = vld [vmem:[%s6604_s24 + $0xd8] sm:$0xff] (%p6059_p5) }
 0x22a   : > { %v5648_v47 = vpop.f32.mrb[123].mxu1  ;;  %4472 = vst [vmem:[%s7077_s11] sm:$0xff] (%p6059_p5), %v4471_v19  ;;  %4526 = vst [vmem:[%s7077_s11 + $0x1a8] sm:$0xff] (%p6059_p5), %v4525_v34 }
 0x22b   : > { %v4077_v12 = vadd.f32 %v5646_v58, %v5534_v5  ;;  %v5649_v21 = vadd.f32 %v5648_v47, %v5647_v30  ;;  %v1878_v5 = vadd.f32 %v1877_v51, %v1876_v61  ;;  %v4473_v58 = vld [vmem:[%s6604_s24 + $0x8] sm:$0xff] (%p6059_p5)  ;;  %v4475_v30 = vld [vmem:[%s6604_s24 + $0x10] sm:$0xff] (%p6059_p5)  ;;  %v4477_v47 = vld [vmem:[%s6604_s24 + $0x18] sm:$0xff] (%p6059_p5) }
 0x22c   : > { %4474 = vst [vmem:[%s7077_s11 + $0x8] sm:$0xff] (%p6059_p5), %v4473_v58  ;;  %4476 = vst [vmem:[%s7077_s11 + $0x20] sm:$0xff] (%p6059_p5), %v4475_v30 }
 0x22d   : > { %v5204_v32 = vpack.c.bf16 %v4077_v12, %v4077_v12  ;;  %v4278_v28 = vadd.f32 %v4277_v8, %v4077_v12  ;;  %v4317_v45 = vmul.f32 %v4077_v12, %v4077_v12  ;;  %v4080_v16 = vadd.f32 %v5649_v21, %v5537_v2  ;;  %v4479_v12 = vld [vmem:[%s6604_s24 + $0x20] sm:$0xff] (%p6059_p5)  ;;  %v4481_v21 = vld [vmem:[%s6604_s24 + $0x28] sm:$0xff] (%p6059_p5)  ;;  %4478 = vst [vmem:[%s7077_s11 + $0x28] sm:$0xff] (%p6059_p5), %v4477_v47 }
 0x22e   : > { %4480 = vst [vmem:[%s7077_s11 + $0x40] sm:$0xff] (%p6059_p5), %v4479_v12  ;;  %4482 = vst [vmem:[%s7077_s11 + $0x48] sm:$0xff] (%p6059_p5), %v4481_v21 }
 0x22f   : > { %4247 = vst [vmem:[%s6604_s24 + $0xe4] sm:$0xf] %v5204_v32  ;;  %v4348_v9 = vadd.f32 %v4347_v43, %v4317_v45  ;;  %v5205_v57 = vpack.c.bf16 %v4080_v16, %v4080_v16  ;;  %v4279_v38 = vadd.f32 %v4278_v28, %v4080_v16  ;;  %v4318_v52 = vmul.f32 %v4080_v16, %v4080_v16  ;;  %v4483_v32 = vld [vmem:[%s6604_s24 + $0x30] sm:$0xff] (%p6059_p5)  ;;  %v4485_v28 = vld [vmem:[%s6604_s24 + $0x38] sm:$0xff] (%p6059_p5)  ;;  %v4487_v45 = vld [vmem:[%s6604_s24 + $0x40] sm:$0xff] (%p6059_p5) }
 0x230   : > { %v1808_v43 = vadd.f32 %v1807_v50, %v1806_v10  ;;  %v4489_v16 = vld [vmem:[%s6604_s24 + $0x48] sm:$0xff] (%p6059_p5)  ;;  %4484 = vst [vmem:[%s7077_s11 + $0x60] sm:$0xff] (%p6059_p5), %v4483_v32  ;;  %4486 = vst [vmem:[%s7077_s11 + $0x68] sm:$0xff] (%p6059_p5), %v4485_v28 }
 0x231   : > { %4248 = vst [vmem:[%s6604_s24 + $0xec] sm:$0xf] %v5205_v57  ;;  %v4349_v49 = vadd.f32 %v4348_v9, %v4318_v52  ;;  %v4491_v9 = vld [vmem:[%s6604_s24 + $0x50] sm:$0xff] (%p6059_p5)  ;;  %v4493_v57 = vld [vmem:[%s6604_s24 + $0x58] sm:$0xff] (%p6059_p5)  ;;  %4488 = vst [vmem:[%s7077_s11 + $0x80] sm:$0xff] (%p6059_p5), %v4487_v45 }
 0x232   : > { %4490 = vst [vmem:[%s7077_s11 + $0x88] sm:$0xff] (%p6059_p5), %v4489_v16  ;;  %4492 = vst [vmem:[%s7077_s11 + $0xa0] sm:$0xff] (%p6059_p5), %v4491_v9  ;;  %v4497_v52 = vld [vmem:[%s6604_s24 + $0x68] sm:$0xff] (%p6059_p5) }
 0x233   : > { %4494 = vst [vmem:[%s7077_s11 + $0xa8] sm:$0xff] (%p6059_p5), %v4493_v57  ;;  %4498 = vst [vmem:[%s7077_s11 + $0xc8] sm:$0xff] (%p6059_p5), %v4497_v52 }
 0x234   : > { %v5538_v4 = vpop.f32.mrb[124].mxu0 }
 0x235   : > { %v5539_v1 = vpop.f32.mrb[125].mxu0  ;;  %v5650_v63 = vpop.f32.mrb[124].mxu1 }
 0x236   : > { %v5540_v41 = vadd.f32 %v5539_v1, %v5538_v4  ;;  %v5541_v22 = vpop.f32.mrb[126].mxu0  ;;  %v5651_v54 = vpop.f32.mrb[125].mxu1  ;;  %v4499_v4 = vld [vmem:[%s6604_s24 + $0x70] sm:$0xff] (%p6059_p5)  ;;  %v4503_v1 = vld [vmem:[%s6604_s24 + $0x80] sm:$0xff] (%p6059_p5) }
 0x237   : > { %v5542_v17 = vpop.f32.mrb[127].mxu0  ;;  %v5652_v13 = vadd.f32 %v5651_v54, %v5650_v63  ;;  %v5653_v27 = vpop.f32.mrb[126].mxu1  ;;  %4500 = vst [vmem:[%s7077_s11 + $0xe0] sm:$0xff] (%p6059_p5), %v4499_v4  ;;  %4504 = vst [vmem:[%s7077_s11 + $0x100] sm:$0xff] (%p6059_p5), %v4503_v1  ;;  %v4515_v63 = vld [vmem:[%s6604_s24 + $0xb0] sm:$0xff] (%p6059_p5)  ;;  %v4519_v54 = vld [vmem:[%s6604_s24 + $0xc0] sm:$0xff] (%p6059_p5) }
 0x238   : > { %v5543_v33 = vadd.f32 %v5542_v17, %v5541_v22  ;;  %v5654_v14 = vpop.f32.mrb[127].mxu1  ;;  %v4507_v22 = vld [vmem:[%s6604_s24 + $0x90] sm:$0xff] (%p6059_p5)  ;;  %v4509_v17 = vld [vmem:[%s6604_s24 + $0x98] sm:$0xff] (%p6059_p5)  ;;  %4516 = vst [vmem:[%s7077_s11 + $0x160] sm:$0xff] (%p6059_p5), %v4515_v63  ;;  %4520 = vst [vmem:[%s7077_s11 + $0x180] sm:$0xff] (%p6059_p5), %v4519_v54 }
 0x239   : > { %v4085_v15 = vadd.f32 %v5652_v13, %v5540_v41  ;;  %v5655_v25 = vadd.f32 %v5654_v14, %v5653_v27  ;;  %v4505_v41 = vld [vmem:[%s6604_s24 + $0x88] sm:$0xff] (%p6059_p5)  ;;  %4508 = vst [vmem:[%s7077_s11 + $0x120] sm:$0xff] (%p6059_p5), %v4507_v22  ;;  %4510 = vst [vmem:[%s7077_s11 + $0x128] sm:$0xff] (%p6059_p5), %v4509_v17  ;;  %v4523_v27 = vld [vmem:[%s6604_s24 + $0xd0] sm:$0xff] (%p6059_p5) }
 0x23a   : > { %4506 = vst [vmem:[%s7077_s11 + $0x108] sm:$0xff] (%p6059_p5), %v4505_v41  ;;  %v4521_v13 = vld [vmem:[%s6604_s24 + $0xc8] sm:$0xff] (%p6059_p5)  ;;  %4524 = vst [vmem:[%s7077_s11 + $0x1a0] sm:$0xff] (%p6059_p5), %v4523_v27  ;;  %v4527_v14 = vld [vmem:[%s6604_s24 + $0xe0] sm:$0xff] (%p6059_p5) }
 0x23b   : > { %v5206_v44 = vpack.c.bf16 %v4085_v15, %v4085_v15  ;;  %v4280_v29 = vadd.f32 %v4279_v38, %v4085_v15  ;;  %v4319_v37 = vmul.f32 %v4085_v15, %v4085_v15  ;;  %v4088_v0 = vadd.f32 %v5655_v25, %v5543_v33  ;;  %v4495_v38 = vld [vmem:[%s6604_s24 + $0x60] sm:$0xff] (%p6059_p5)  ;;  %4522 = vst [vmem:[%s7077_s11 + $0x188] sm:$0xff] (%p6059_p5), %v4521_v13  ;;  %v4529_v15 = vld [vmem:[%s6604_s24 + $0xe8] sm:$0xff] (%p6059_p5) }
 0x23c   : > { %4496 = vst [vmem:[%s7077_s11 + $0xc0] sm:$0xff] (%p6059_p5), %v4495_v38  ;;  %v4511_v33 = vld [vmem:[%s6604_s24 + $0xa0] sm:$0xff] (%p6059_p5)  ;;  %4528 = vst [vmem:[%s7077_s11 + $0x1c0] sm:$0xff] (%p6059_p5), %v4527_v14 }
 0x23d   : > { %4249 = vst [vmem:[%s6604_s24 + $0xf4] sm:$0xf] %v5206_v44  ;;  %v4350_v18 = vadd.f32 %v4349_v49, %v4319_v37  ;;  %v5207_v23 = vpack.c.bf16 %v4088_v0, %v4088_v0  ;;  %v4281_v42 = vadd.f32 %v4280_v29, %v4088_v0  ;;  %v4320_v60 = vmul.f32 %v4088_v0, %v4088_v0  ;;  %v4501_v49 = vld [vmem:[%s6604_s24 + $0x78] sm:$0xff] (%p6059_p5) }
 0x23e   : > { %4502 = vst [vmem:[%s7077_s11 + $0xe8] sm:$0xff] (%p6059_p5), %v4501_v49  ;;  %4512 = vst [vmem:[%s7077_s11 + $0x140] sm:$0xff] (%p6059_p5), %v4511_v33 }
 0x23f   : > { %4250 = vst [vmem:[%s6604_s24 + $0xfc] sm:$0xf] %v5207_v23  ;;  %v4282_v40 = vrot.slane %v4281_v42, 4  ;;  %v4351_v7 = vadd.f32 %v4350_v18, %v4320_v60  ;;  %4530 = vst [vmem:[%s7077_s11 + $0x1c8] sm:$0xff] (%p6059_p5), %v4529_v15 }
 0x241   : > { %v4283_v6 = vadd.f32 %v4282_v40, %v4281_v42  ;;  %v4352_v24 = vrot.slane %v4351_v7, 4 }
 0x243   : > { %v4284_v20 = vrot.slane %v4283_v6, 2  ;;  %v4353_v26 = vadd.f32 %v4352_v24, %v4351_v7 }
 0x244   : > { %v4531_v25 = vld [vmem:[%s6604_s24 + $0xf0] sm:$0xff] (%p6059_p5) }
 0x245   : > { %v4285_v36 = vadd.f32 %v4284_v20, %v4283_v6  ;;  %v4354_v3 = vrot.slane %v4353_v26, 2  ;;  %4532 = vst [vmem:[%s7077_s11 + $0x1e0] sm:$0xff] (%p6059_p5), %v4531_v25 }
 0x246   : > { %v4533_v55 = vld [vmem:[%s6604_s24 + $0xf8] sm:$0xff] (%p6059_p5) }
 0x247   : > { %v4286_v8 = vrot.slane %v4285_v36, 1  ;;  %v4355_v35 = vadd.f32 %v4354_v3, %v4353_v26  ;;  %4534 = vst [vmem:[%s7077_s11 + $0x1e8] sm:$0xff] (%p6059_p5), %v4533_v55 }
 0x249   : > { %v4287_v59 = vadd.f32 %v4286_v8, %v4285_v36  ;;  %v4356_v39 = vrot.slane %v4355_v35, 1 }
 0x24a   : > { %4376 = sbr.rel (!%p6059_p5) target bundleno = 593 (0x251), region = 32 }
 0x24b   : > { %v4288_v62 = vadd.f32 %v4287_v59, %v1808_v43  ;;  %v4357_v53 = vadd.f32 %v4356_v39, %v4355_v35 }
 0x24d   : > { %v4358_v56 = vadd.f32 %v4357_v53, %v1878_v5 }
 0x24f   : > { %v4360_v2 = vsel %vm4359_vm1, %v4288_v62, %v4358_v56 }
 0x250   : > { %4361 = vst [vmem:[%s224_s5] sm:$0x3] %v4360_v2 }
 0x251 PF: > { %s14_s18 = sadd.s32 1, %s5991_s18   ;;  %s7166_s12 = smov %s5971_s13 }
 0x252   : > { %p11_p12 = scmp.ge.s32.totalorder %s14_s18, 6   ;;  %s7167_s13 = smov %s6070_s27 }
 0x253   : > { %s7168_s14 = smov %s5983_s16  ;;  %s7169_s15 = smov %s5987_s17 }
 0x254   : > { %s7170_s16 = smov %s7173_s19  ;;  %s7171_s17 = smov %s7177_s20 }
 0x255   :  { %13 = sbr.rel (!%p11_p12) target bundleno = 4 (0x4), region = 114 }

</bundles_post_ra>
